<compile_context>
chip_gen: v7x
topology: tpu7x:2x2x1
jax: 0.10.0
libtpu: 0.0.40
codegen_flags: <defaults>
</compile_context>

<pallas_src>
import functools

import jax
import jax.numpy as jnp
import numpy as np
from jax.experimental import pallas as pl
from jax.experimental.pallas import tpu as pltpu


# ---------------------------------------------------------------------------
# small helpers
# ---------------------------------------------------------------------------
def _pick_m_tile(m):
    """Row tile for the 1x1-conv kernels (multiple of 8, divides M)."""
    for tm in (1024, 512, 256, 128, 64, 32, 16, 8):
        if m % tm == 0:
            return tm
    return m


def _pick_row_tile(h):
    """Output-row block for the 3x3-conv kernel."""
    for th in (8, 4, 2, 1):
        if h % th == 0:
            return th
    return 1


def _silu_f32(y):
    # y is f32; exp and the approximate reciprocal both run on the EUP slot,
    # keeping the post-matmul epilogue off the VALU critical slot.
    return y * pl.reciprocal(1.0 + jnp.exp(-y), approx=True)


# ---------------------------------------------------------------------------
# Kernels
# ---------------------------------------------------------------------------
def _conv1x1_split_kernel(x_ref, wa_ref, wb_ref, sa_ref, ba_ref, sb_ref, bb_ref,
                          a_ref, b_ref):
    # x_ref: (TM, Cin) bf16; wa/wb: (Cin, c) bf16; scales/biases: (1, c) f32
    # a_ref/b_ref: (TM, c) bf16  -- the two chunks of cv1's output, written directly.
    x = x_ref[...]
    ya = jnp.dot(x, wa_ref[...], preferred_element_type=jnp.float32)
    ya = ya * sa_ref[...] + ba_ref[...]
    a_ref[...] = _silu_f32(ya).astype(a_ref.dtype)
    yb = jnp.dot(x, wb_ref[...], preferred_element_type=jnp.float32)
    yb = yb * sb_ref[...] + bb_ref[...]
    b_ref[...] = _silu_f32(yb).astype(b_ref.dtype)


def _make_conv1x1_merge_kernel(n_in):
    # Fused "concat + 1x1 conv + BN + SiLU": out = SiLU(affine(sum_i x_i @ w_i)).
    def kernel(*refs):
        x_refs = refs[:n_in]
        w_refs = refs[n_in:2 * n_in]
        s_ref, b_ref, o_ref = refs[2 * n_in:]
        acc = jnp.dot(x_refs[0][...], w_refs[0][...],
                      preferred_element_type=jnp.float32)
        for xr, wr in zip(x_refs[1:], w_refs[1:]):
            acc = acc + jnp.dot(xr[...], wr[...],
                                preferred_element_type=jnp.float32)
        y = acc * s_ref[...] + b_ref[...]
        o_ref[...] = _silu_f32(y).astype(o_ref.dtype)
    return kernel


def _make_conv3x3_kernel(th, w_out):
    def kernel(xp_ref, w_ref, s_ref, b_ref, o_ref):
        # xp_ref: (1, Hp, Wp, Cin) bf16  zero-padded input image for this batch elem
        # w_ref : (3, 3, Cin, Cout) bf16 HWIO
        # s_ref/b_ref: (1, Cout) f32
        # o_ref : (1, TH, W, Cout)       TH output rows
        cin = xp_ref.shape[-1]
        cout = o_ref.shape[-1]
        h0 = pl.multiple_of(pl.program_id(1) * th, th)
        window = xp_ref[0, pl.ds(h0, th + 2)]            # (TH+2, Wp, Cin)
        acc = jnp.zeros((th * w_out, cout), jnp.float32)
        for dy in range(3):
            rows = window[dy:dy + th]                    # (TH, Wp, Cin)
            for dx in range(3):
                # 9 accumulating (TH*W, Cin) x (Cin, Cout) MXU matmuls.
                tap = rows[:, dx:dx + w_out, :].reshape(th * w_out, cin)
                acc = acc + jnp.dot(tap, w_ref[dy, dx],
                                    preferred_element_type=jnp.float32)
        y = acc * s_ref[...] + b_ref[...]
        y = _silu_f32(y)
        o_ref[0] = y.reshape(th, w_out, cout).astype(o_ref.dtype)
    return kernel


# ---------------------------------------------------------------------------
# Wrappers
# ---------------------------------------------------------------------------
def conv1x1_split(x2d, wa, wb, sa, ba, sb, bb):
    M, cin = x2d.shape
    c = wa.shape[1]
    tm = _pick_m_tile(M)
    vec = lambda v: v.reshape(1, c).astype(jnp.float32)
    return pl.pallas_call(
        _conv1x1_split_kernel,
        grid=(M // tm,),
        in_specs=[
            pl.BlockSpec((tm, cin), lambda i: (i, 0)),
            pl.BlockSpec((cin, c), lambda i: (0, 0)),
            pl.BlockSpec((cin, c), lambda i: (0, 0)),
            pl.BlockSpec((1, c), lambda i: (0, 0)),
            pl.BlockSpec((1, c), lambda i: (0, 0)),
            pl.BlockSpec((1, c), lambda i: (0, 0)),
            pl.BlockSpec((1, c), lambda i: (0, 0)),
        ],
        out_specs=(pl.BlockSpec((tm, c), lambda i: (i, 0)),
                   pl.BlockSpec((tm, c), lambda i: (i, 0))),
        out_shape=(jax.ShapeDtypeStruct((M, c), jnp.bfloat16),
                   jax.ShapeDtypeStruct((M, c), jnp.bfloat16)),
        compiler_params=pltpu.CompilerParams(dimension_semantics=("parallel",)),
    )(x2d, wa, wb, vec(sa), vec(ba), vec(sb), vec(bb))


def conv1x1_merge(xs, ws, scale, bias, out_dtype=jnp.float32):
    M = xs[0].shape[0]
    cout = ws[0].shape[1]
    tm = _pick_m_tile(M)
    in_specs = [pl.BlockSpec((tm, x.shape[1]), lambda i: (i, 0)) for x in xs]
    in_specs += [pl.BlockSpec(w.shape, lambda i: (0, 0)) for w in ws]
    in_specs += [pl.BlockSpec((1, cout), lambda i: (0, 0)),
                 pl.BlockSpec((1, cout), lambda i: (0, 0))]
    return pl.pallas_call(
        _make_conv1x1_merge_kernel(len(xs)),
        grid=(M // tm,),
        in_specs=in_specs,
        out_specs=pl.BlockSpec((tm, cout), lambda i: (i, 0)),
        out_shape=jax.ShapeDtypeStruct((M, cout), out_dtype),
        compiler_params=pltpu.CompilerParams(dimension_semantics=("parallel",)),
    )(*xs, *ws,
      scale.reshape(1, cout).astype(jnp.float32),
      bias.reshape(1, cout).astype(jnp.float32))


def conv3x3_bn_silu(x_nhwc, w, scale, bias, out_dtype=jnp.bfloat16):
    N, H, W, cin = x_nhwc.shape
    cout = w.shape[3]
    th = _pick_row_tile(H)
    xp = jnp.pad(x_nhwc, ((0, 0), (1, 1), (1, 1), (0, 0)))      # 'same' padding
    Hp, Wp = H + 2, W + 2
    # TODO(synk): for production image sizes, replace the full-image input block
    # with a (TH+2)-row window (manual DMA / pl.ANY) so the VMEM footprint is
    # O(TH*Wp*Cin) on v7x (64 MiB), and fold the zero-padding into boundary-masked
    # taps instead of the jnp.pad HBM pass.
    return pl.pallas_call(
        _make_conv3x3_kernel(th, W),
        grid=(N, H // th),
        in_specs=[
            pl.BlockSpec((1, Hp, Wp, cin), lambda n, h: (n, 0, 0, 0)),
            pl.BlockSpec((3, 3, cin, cout), lambda n, h: (0, 0, 0, 0)),
            pl.BlockSpec((1, cout), lambda n, h: (0, 0)),
            pl.BlockSpec((1, cout), lambda n, h: (0, 0)),
        ],
        out_specs=pl.BlockSpec((1, th, W, cout), lambda n, h: (n, h, 0, 0)),
        out_shape=jax.ShapeDtypeStruct((N, H, W, cout), out_dtype),
        compiler_params=pltpu.CompilerParams(
            dimension_semantics=("parallel", "parallel")),
    )(xp, w,
      scale.reshape(1, cout).astype(jnp.float32),
      bias.reshape(1, cout).astype(jnp.float32))


# ---------------------------------------------------------------------------
# C2f forward (n=1, shortcut=False, g=1, e=0.5 -- module defaults)
# ---------------------------------------------------------------------------
def c2f_forward(x_nchw, kp, c):
    # NCHW -> NHWC boundary transpose (layout glue; a full NHWC model would drop it).
    x = jnp.transpose(x_nchw, (0, 2, 3, 1)).astype(jnp.bfloat16)
    N, H, W, c1 = x.shape
    M = N * H * W

    # cv1 (1x1 + BN + SiLU) -> chunks a, b written as two separate outputs.
    a2d, b2d = conv1x1_split(x.reshape(M, c1),
                             kp['cv1_wa'], kp['cv1_wb'],
                             kp['cv1_sa'], kp['cv1_ba'],
                             kp['cv1_sb'], kp['cv1_bb'])

    # m = Bottleneck(c, c, shortcut=False): two 3x3 conv + BN + SiLU stages on b.
    b_nhwc = b2d.reshape(N, H, W, c)
    m1 = conv3x3_bn_silu(b_nhwc, kp['m_cv1_w'], kp['m_cv1_s'], kp['m_cv1_b'])
    m2 = conv3x3_bn_silu(m1, kp['m_cv2_w'], kp['m_cv2_s'], kp['m_cv2_b'])

    # cv2 (1x1 + BN + SiLU) on concat([a, b, m2]) -- fused; concat never hits HBM.
    out2d = conv1x1_merge([a2d, b2d, m2.reshape(M, c)],
                          [kp['cv2_wa'], kp['cv2_wb'], kp['cv2_wm']],
                          kp['cv2_s'], kp['cv2_b'], out_dtype=jnp.float32)
    out = out2d.reshape(N, H, W, -1)
    return jnp.transpose(out, (0, 3, 1, 2))                     # back to NCHW


# ---------------------------------------------------------------------------
# Deterministic parameters (inference-mode BN folded to scale/bias), f32 canonical
# ---------------------------------------------------------------------------
def init_params(key, c1, c2, c):
    ks = jax.random.split(key, 8)

    def bn(k, ch):
        k1, k2, k3, k4 = jax.random.split(k, 4)
        gamma = jax.random.uniform(k1, (ch,), minval=0.5, maxval=1.5)
        beta = 0.1 * jax.random.normal(k2, (ch,))
        mean = 0.1 * jax.random.normal(k3, (ch,))
        var = jax.random.uniform(k4, (ch,), minval=0.5, maxval=1.5)
        scale = gamma / jnp.sqrt(var + 1e-5)
        return scale.astype(jnp.float32), (beta - mean * scale).astype(jnp.float32)

    p = {}
    p['cv1_w'] = 0.2 * jax.random.normal(ks[0], (c1, 2 * c), jnp.float32)     # (Cin, Cout)
    p['cv1_s'], p['cv1_b'] = bn(ks[1], 2 * c)
    p['m_cv1_w'] = 0.2 * jax.random.normal(ks[2], (3, 3, c, c), jnp.float32)  # HWIO
    p['m_cv1_s'], p['m_cv1_b'] = bn(ks[3], c)
    p['m_cv2_w'] = 0.2 * jax.random.normal(ks[4], (3, 3, c, c), jnp.float32)  # HWIO
    p['m_cv2_s'], p['m_cv2_b'] = bn(ks[5], c)
    p['cv2_w'] = 0.2 * jax.random.normal(ks[6], (3 * c, c2), jnp.float32)     # (Cin, Cout)
    p['cv2_s'], p['cv2_b'] = bn(ks[7], c2)
    return p


def prepare_kernel_params(p, c):
    """Split cv1/cv2 weights for the fused split/merge kernels, cast MXU operands to bf16."""
    bf = lambda a: a.astype(jnp.bfloat16)
    return {
        'cv1_wa': bf(p['cv1_w'][:, :c]), 'cv1_wb': bf(p['cv1_w'][:, c:]),
        'cv1_sa': p['cv1_s'][:c], 'cv1_sb': p['cv1_s'][c:],
        'cv1_ba': p['cv1_b'][:c], 'cv1_bb': p['cv1_b'][c:],
        'm_cv1_w': bf(p['m_cv1_w']), 'm_cv1_s': p['m_cv1_s'], 'm_cv1_b': p['m_cv1_b'],
        'm_cv2_w': bf(p['m_cv2_w']), 'm_cv2_s': p['m_cv2_s'], 'm_cv2_b': p['m_cv2_b'],
        'cv2_wa': bf(p['cv2_w'][:c]), 'cv2_wb': bf(p['cv2_w'][c:2 * c]),
        'cv2_wm': bf(p['cv2_w'][2 * c:]),
        'cv2_s': p['cv2_s'], 'cv2_b': p['cv2_b'],
    }


# ---------------------------------------------------------------------------
# Pure-JAX f32 reference (C2f forward with n=1, shortcut=False)
# ---------------------------------------------------------------------------
def _silu(x):
    return x * jax.nn.sigmoid(x)


def c2f_reference(x_nchw, p, c):
    x = jnp.transpose(x_nchw, (0, 2, 3, 1)).astype(jnp.float32)
    y = _silu(jnp.einsum('nhwc,cd->nhwd', x, p['cv1_w']) * p['cv1_s'] + p['cv1_b'])
    a, b = y[..., :c], y[..., c:]

    def conv3(inp, w, s, bi):
        o = jax.lax.conv_general_dilated(
            inp, w, (1, 1), 'SAME', dimension_numbers=('NHWC', 'HWIO', 'NHWC'))
        return _silu(o * s + bi)

    m1 = conv3(b, p['m_cv1_w'], p['m_cv1_s'], p['m_cv1_b'])
    m2 = conv3(m1, p['m_cv2_w'], p['m_cv2_s'], p['m_cv2_b'])
    z = jnp.concatenate([a, b, m2], axis=-1)                    # [a, b, m(b)]
    out = _silu(jnp.einsum('nhwc,cd->nhwd', z, p['cv2_w']) * p['cv2_s'] + p['cv2_b'])
    return jnp.transpose(out, (0, 3, 1, 2))


# ---------------------------------------------------------------------------
if __name__ == "__main__":
    c1, c2_out, e = 8, 8, 0.5
    c = int(c2_out * e)                  # hidden channels = 4
    N, H, W = 2, 16, 16

    key = jax.random.PRNGKey(0)
    kx, kparam = jax.random.split(key)
    x = jax.random.normal(kx, (N, c1, H, W), jnp.float32)       # NCHW like PyTorch
    params = init_params(kparam, c1, c2_out, c)
    kparams = prepare_kernel_params(params, c)

    run = jax.jit(functools.partial(c2f_forward, c=c))
    out = jax.block_until_ready(run(x, kparams))

    ref = jax.block_until_ready(c2f_reference(x, params, c))
    assert out.shape == (N, c2_out, H, W)
    # bf16 MXU operands -> looser tolerance than the pure-f32 version.
    np.testing.assert_allclose(np.asarray(out), np.asarray(ref), atol=5e-2, rtol=5e-2)

    print("KERNEL_OK")
</pallas_src>

<mosaic_0001>
module attributes {stable_mosaic.version = 11 : i64} {
  func.func @_conv1x1_split_kernel(%arg0: i32, %arg1: memref<512x8xbf16, #tpu.memory_space<vmem>>, %arg2: memref<8x4xbf16, #tpu.memory_space<vmem>>, %arg3: memref<8x4xbf16, #tpu.memory_space<vmem>>, %arg4: memref<1x4xf32, #tpu.memory_space<vmem>>, %arg5: memref<1x4xf32, #tpu.memory_space<vmem>>, %arg6: memref<1x4xf32, #tpu.memory_space<vmem>>, %arg7: memref<1x4xf32, #tpu.memory_space<vmem>>, %arg8: memref<512x4xbf16, #tpu.memory_space<vmem>>, %arg9: memref<512x4xbf16, #tpu.memory_space<vmem>>) attributes {dimension_semantics = [#tpu.dimension_semantics<parallel>], iteration_bounds = array<i64: 1>, scalar_prefetch = 0 : i64, scratch_operands = 0 : i64, tpu.core_type = #tpu.core_type<tc>, window_params = [{transform_indices = @transform_0, window_bounds = array<i64: 512, 8>}, {pipeline_mode = #tpu.pipeline_mode<synchronous>, transform_indices = @transform_1, window_bounds = array<i64: 8, 4>}, {pipeline_mode = #tpu.pipeline_mode<synchronous>, transform_indices = @transform_2, window_bounds = array<i64: 8, 4>}, {pipeline_mode = #tpu.pipeline_mode<synchronous>, transform_indices = @transform_3, window_bounds = array<i64: 1, 4>}, {pipeline_mode = #tpu.pipeline_mode<synchronous>, transform_indices = @transform_4, window_bounds = array<i64: 1, 4>}, {pipeline_mode = #tpu.pipeline_mode<synchronous>, transform_indices = @transform_5, window_bounds = array<i64: 1, 4>}, {pipeline_mode = #tpu.pipeline_mode<synchronous>, transform_indices = @transform_6, window_bounds = array<i64: 1, 4>}, {transform_indices = @transform_7, window_bounds = array<i64: 512, 4>}, {transform_indices = @transform_8, window_bounds = array<i64: 512, 4>}]} {
    %c0 = arith.constant 0 : index
    %c0_0 = arith.constant 0 : index
    %0 = vector.load %arg1[%c0, %c0_0] : memref<512x8xbf16, #tpu.memory_space<vmem>>, vector<512x8xbf16>
    %c0_1 = arith.constant 0 : index
    %c0_2 = arith.constant 0 : index
    %1 = vector.load %arg2[%c0_1, %c0_2] : memref<8x4xbf16, #tpu.memory_space<vmem>>, vector<8x4xbf16>
    %cst = arith.constant dense<0.000000e+00> : vector<512x4xf32>
    %2 = tpu.matmul %0, %1, %cst {dimension_numbers = #tpu.dot_dimension_numbers<[1], [0], [0], [1], [0, 0, 1, 1], [], []>} : vector<512x8xbf16>, vector<8x4xbf16>, vector<512x4xf32> -> vector<512x4xf32>
    %c0_3 = arith.constant 0 : index
    %c0_4 = arith.constant 0 : index
    %3 = vector.load %arg4[%c0_3, %c0_4] : memref<1x4xf32, #tpu.memory_space<vmem>>, vector<1x4xf32>
    %4 = vector.broadcast %3 : vector<1x4xf32> to vector<512x4xf32>
    %5 = arith.mulf %2, %4 : vector<512x4xf32>
    %c0_5 = arith.constant 0 : index
    %c0_6 = arith.constant 0 : index
    %6 = vector.load %arg5[%c0_5, %c0_6] : memref<1x4xf32, #tpu.memory_space<vmem>>, vector<1x4xf32>
    %7 = vector.broadcast %6 : vector<1x4xf32> to vector<512x4xf32>
    %8 = arith.addf %5, %7 : vector<512x4xf32>
    %cst_7 = arith.constant 0.000000e+00 : f32
    %9 = vector.broadcast %cst_7 : f32 to vector<512x4xf32>
    %10 = arith.subf %9, %8 : vector<512x4xf32>
    %11 = math.exp %10 : vector<512x4xf32>
    %cst_8 = arith.constant 1.000000e+00 : f32
    %12 = vector.broadcast %cst_8 : f32 to vector<512x4xf32>
    %13 = arith.addf %12, %11 : vector<512x4xf32>
    %14 = tpu.reciprocal %13 {approx = true} : vector<512x4xf32> -> vector<512x4xf32>
    %15 = arith.mulf %8, %14 : vector<512x4xf32>
    %16 = arith.truncf %15 : vector<512x4xf32> to vector<512x4xbf16>
    %c0_9 = arith.constant 0 : index
    %c0_10 = arith.constant 0 : index
    %17 = vector.load %arg8[%c0_9, %c0_10] : memref<512x4xbf16, #tpu.memory_space<vmem>>, vector<512x4xbf16>
    tpu.vector_store %arg8[%c0_9, %c0_10], %16 {strides = array<i32>} : memref<512x4xbf16, #tpu.memory_space<vmem>>, vector<512x4xbf16>,
    %c0_11 = arith.constant 0 : index
    %c0_12 = arith.constant 0 : index
    %18 = vector.load %arg3[%c0_11, %c0_12] : memref<8x4xbf16, #tpu.memory_space<vmem>>, vector<8x4xbf16>
    %cst_13 = arith.constant dense<0.000000e+00> : vector<512x4xf32>
    %19 = tpu.matmul %0, %18, %cst_13 {dimension_numbers = #tpu.dot_dimension_numbers<[1], [0], [0], [1], [0, 0, 1, 1], [], []>} : vector<512x8xbf16>, vector<8x4xbf16>, vector<512x4xf32> -> vector<512x4xf32>
    %c0_14 = arith.constant 0 : index
    %c0_15 = arith.constant 0 : index
    %20 = vector.load %arg6[%c0_14, %c0_15] : memref<1x4xf32, #tpu.memory_space<vmem>>, vector<1x4xf32>
    %21 = vector.broadcast %20 : vector<1x4xf32> to vector<512x4xf32>
    %22 = arith.mulf %19, %21 : vector<512x4xf32>
    %c0_16 = arith.constant 0 : index
    %c0_17 = arith.constant 0 : index
    %23 = vector.load %arg7[%c0_16, %c0_17] : memref<1x4xf32, #tpu.memory_space<vmem>>, vector<1x4xf32>
    %24 = vector.broadcast %23 : vector<1x4xf32> to vector<512x4xf32>
    %25 = arith.addf %22, %24 : vector<512x4xf32>
    %cst_18 = arith.constant 0.000000e+00 : f32
    %26 = vector.broadcast %cst_18 : f32 to vector<512x4xf32>
    %27 = arith.subf %26, %25 : vector<512x4xf32>
    %28 = math.exp %27 : vector<512x4xf32>
    %cst_19 = arith.constant 1.000000e+00 : f32
    %29 = vector.broadcast %cst_19 : f32 to vector<512x4xf32>
    %30 = arith.addf %29, %28 : vector<512x4xf32>
    %31 = tpu.reciprocal %30 {approx = true} : vector<512x4xf32> -> vector<512x4xf32>
    %32 = arith.mulf %25, %31 : vector<512x4xf32>
    %33 = arith.truncf %32 : vector<512x4xf32> to vector<512x4xbf16>
    %c0_20 = arith.constant 0 : index
    %c0_21 = arith.constant 0 : index
    %34 = vector.load %arg9[%c0_20, %c0_21] : memref<512x4xbf16, #tpu.memory_space<vmem>>, vector<512x4xbf16>
    tpu.vector_store %arg9[%c0_20, %c0_21], %33 {strides = array<i32>} : memref<512x4xbf16, #tpu.memory_space<vmem>>, vector<512x4xbf16>,
    return
  }
  func.func @transform_0(%arg0: i32) -> (i32, i32) {
    %c0_i32 = arith.constant 0 : i32
    %c0_i32_0 = arith.constant 0 : i32
    return %arg0, %c0_i32 : i32, i32
  }
  func.func @transform_1(%arg0: i32) -> (i32, i32) {
    %c0_i32 = arith.constant 0 : i32
    %c0_i32_0 = arith.constant 0 : i32
    %c0_i32_1 = arith.constant 0 : i32
    return %c0_i32, %c0_i32_0 : i32, i32
  }
  func.func @transform_2(%arg0: i32) -> (i32, i32) {
    %c0_i32 = arith.constant 0 : i32
    %c0_i32_0 = arith.constant 0 : i32
    %c0_i32_1 = arith.constant 0 : i32
    return %c0_i32, %c0_i32_0 : i32, i32
  }
  func.func @transform_3(%arg0: i32) -> (i32, i32) {
    %c0_i32 = arith.constant 0 : i32
    %c0_i32_0 = arith.constant 0 : i32
    %c0_i32_1 = arith.constant 0 : i32
    return %c0_i32, %c0_i32_0 : i32, i32
  }
  func.func @transform_4(%arg0: i32) -> (i32, i32) {
    %c0_i32 = arith.constant 0 : i32
    %c0_i32_0 = arith.constant 0 : i32
    %c0_i32_1 = arith.constant 0 : i32
    return %c0_i32, %c0_i32_0 : i32, i32
  }
  func.func @transform_5(%arg0: i32) -> (i32, i32) {
    %c0_i32 = arith.constant 0 : i32
    %c0_i32_0 = arith.constant 0 : i32
    %c0_i32_1 = arith.constant 0 : i32
    return %c0_i32, %c0_i32_0 : i32, i32
  }
  func.func @transform_6(%arg0: i32) -> (i32, i32) {
    %c0_i32 = arith.constant 0 : i32
    %c0_i32_0 = arith.constant 0 : i32
    %c0_i32_1 = arith.constant 0 : i32
    return %c0_i32, %c0_i32_0 : i32, i32
  }
  func.func @transform_7(%arg0: i32) -> (i32, i32) {
    %c0_i32 = arith.constant 0 : i32
    %c0_i32_0 = arith.constant 0 : i32
    return %arg0, %c0_i32 : i32, i32
  }
  func.func @transform_8(%arg0: i32) -> (i32, i32) {
    %c0_i32 = arith.constant 0 : i32
    %c0_i32_0 = arith.constant 0 : i32
    return %arg0, %c0_i32 : i32, i32
  }
}

module attributes {stable_mosaic.version = 11 : i64} {
  func.func @kernel(%arg0: i32, %arg1: i32, %arg2: memref<1x18x18x4xbf16, #tpu.memory_space<vmem>>, %arg3: memref<3x3x4x4xbf16, #tpu.memory_space<vmem>>, %arg4: memref<1x4xf32, #tpu.memory_space<vmem>>, %arg5: memref<1x4xf32, #tpu.memory_space<vmem>>, %arg6: memref<1x8x16x4xbf16, #tpu.memory_space<vmem>>) attributes {dimension_semantics = [#tpu.dimension_semantics<parallel>, #tpu.dimension_semantics<parallel>], iteration_bounds = array<i64: 2, 2>, scalar_prefetch = 0 : i64, scratch_operands = 0 : i64, tpu.core_type = #tpu.core_type<tc>, window_params = [{transform_indices = @transform_0, window_bounds = array<i64: 1, 18, 18, 4>}, {pipeline_mode = #tpu.pipeline_mode<synchronous>, transform_indices = @transform_1, window_bounds = array<i64: 3, 3, 4, 4>}, {pipeline_mode = #tpu.pipeline_mode<synchronous>, transform_indices = @transform_2, window_bounds = array<i64: 1, 4>}, {pipeline_mode = #tpu.pipeline_mode<synchronous>, transform_indices = @transform_3, window_bounds = array<i64: 1, 4>}, {transform_indices = @transform_4, window_bounds = array<i64: 1, 8, 16, 4>}]} {
    %c8_i32 = arith.constant 8 : i32
    %0 = arith.muli %arg1, %c8_i32 : i32
    %1 = tpu.assume_multiple %0, 8 : i32
    %c0 = arith.constant 0 : index
    %2 = arith.index_cast %1 : i32 to index
    %c0_0 = arith.constant 0 : index
    %c0_1 = arith.constant 0 : index
    %3 = vector.load %arg2[%c0, %2, %c0_0, %c0_1] : memref<1x18x18x4xbf16, #tpu.memory_space<vmem>>, vector<1x10x18x4xbf16>
    %4 = vector.shape_cast %3 : vector<1x10x18x4xbf16> to vector<10x18x4xbf16>
    %cst = arith.constant 0.000000e+00 : f32
    %5 = vector.broadcast %cst : f32 to vector<128x4xf32>
    %6 = vector.extract_strided_slice %4 {offsets = [0, 0, 0], sizes = [8, 18, 4], strides = [1, 1, 1]} : vector<10x18x4xbf16> to vector<8x18x4xbf16>
    %7 = vector.extract_strided_slice %6 {offsets = [0, 0, 0], sizes = [8, 16, 4], strides = [1, 1, 1]} : vector<8x18x4xbf16> to vector<8x16x4xbf16>
    %8 = vector.shape_cast %7 : vector<8x16x4xbf16> to vector<128x4xbf16>
    %c0_2 = arith.constant 0 : index
    %c0_3 = arith.constant 0 : index
    %c0_4 = arith.constant 0 : index
    %c0_5 = arith.constant 0 : index
    %9 = vector.load %arg3[%c0_2, %c0_3, %c0_4, %c0_5] : memref<3x3x4x4xbf16, #tpu.memory_space<vmem>>, vector<1x1x4x4xbf16>
    %10 = vector.shape_cast %9 : vector<1x1x4x4xbf16> to vector<4x4xbf16>
    %cst_6 = arith.constant dense<0.000000e+00> : vector<128x4xf32>
    %11 = tpu.matmul %8, %10, %cst_6 {dimension_numbers = #tpu.dot_dimension_numbers<[1], [0], [0], [1], [0, 0, 1, 1], [], []>} : vector<128x4xbf16>, vector<4x4xbf16>, vector<128x4xf32> -> vector<128x4xf32>
    %12 = arith.addf %5, %11 : vector<128x4xf32>
    %13 = vector.extract_strided_slice %6 {offsets = [0, 1, 0], sizes = [8, 16, 4], strides = [1, 1, 1]} : vector<8x18x4xbf16> to vector<8x16x4xbf16>
    %14 = vector.shape_cast %13 : vector<8x16x4xbf16> to vector<128x4xbf16>
    %c0_7 = arith.constant 0 : index
    %c1 = arith.constant 1 : index
    %c0_8 = arith.constant 0 : index
    %c0_9 = arith.constant 0 : index
    %15 = vector.load %arg3[%c0_7, %c1, %c0_8, %c0_9] : memref<3x3x4x4xbf16, #tpu.memory_space<vmem>>, vector<1x1x4x4xbf16>
    %16 = vector.shape_cast %15 : vector<1x1x4x4xbf16> to vector<4x4xbf16>
    %cst_10 = arith.constant dense<0.000000e+00> : vector<128x4xf32>
    %17 = tpu.matmul %14, %16, %cst_10 {dimension_numbers = #tpu.dot_dimension_numbers<[1], [0], [0], [1], [0, 0, 1, 1], [], []>} : vector<128x4xbf16>, vector<4x4xbf16>, vector<128x4xf32> -> vector<128x4xf32>
    %18 = arith.addf %12, %17 : vector<128x4xf32>
    %19 = vector.extract_strided_slice %6 {offsets = [0, 2, 0], sizes = [8, 16, 4], strides = [1, 1, 1]} : vector<8x18x4xbf16> to vector<8x16x4xbf16>
    %20 = vector.shape_cast %19 : vector<8x16x4xbf16> to vector<128x4xbf16>
    %c0_11 = arith.constant 0 : index
    %c2 = arith.constant 2 : index
    %c0_12 = arith.constant 0 : index
    %c0_13 = arith.constant 0 : index
    %21 = vector.load %arg3[%c0_11, %c2, %c0_12, %c0_13] : memref<3x3x4x4xbf16, #tpu.memory_space<vmem>>, vector<1x1x4x4xbf16>
    %22 = vector.shape_cast %21 : vector<1x1x4x4xbf16> to vector<4x4xbf16>
    %cst_14 = arith.constant dense<0.000000e+00> : vector<128x4xf32>
    %23 = tpu.matmul %20, %22, %cst_14 {dimension_numbers = #tpu.dot_dimension_numbers<[1], [0], [0], [1], [0, 0, 1, 1], [], []>} : vector<128x4xbf16>, vector<4x4xbf16>, vector<128x4xf32> -> vector<128x4xf32>
    %24 = arith.addf %18, %23 : vector<128x4xf32>
    %25 = vector.extract_strided_slice %4 {offsets = [1, 0, 0], sizes = [8, 18, 4], strides = [1, 1, 1]} : vector<10x18x4xbf16> to vector<8x18x4xbf16>
    %26 = vector.extract_strided_slice %25 {offsets = [0, 0, 0], sizes = [8, 16, 4], strides = [1, 1, 1]} : vector<8x18x4xbf16> to vector<8x16x4xbf16>
    %27 = vector.shape_cast %26 : vector<8x16x4xbf16> to vector<128x4xbf16>
    %c1_15 = arith.constant 1 : index
    %c0_16 = arith.constant 0 : index
    %c0_17 = arith.constant 0 : index
    %c0_18 = arith.constant 0 : index
    %28 = vector.load %arg3[%c1_15, %c0_16, %c0_17, %c0_18] : memref<3x3x4x4xbf16, #tpu.memory_space<vmem>>, vector<1x1x4x4xbf16>
    %29 = vector.shape_cast %28 : vector<1x1x4x4xbf16> to vector<4x4xbf16>
    %cst_19 = arith.constant dense<0.000000e+00> : vector<128x4xf32>
    %30 = tpu.matmul %27, %29, %cst_19 {dimension_numbers = #tpu.dot_dimension_numbers<[1], [0], [0], [1], [0, 0, 1, 1], [], []>} : vector<128x4xbf16>, vector<4x4xbf16>, vector<128x4xf32> -> vector<128x4xf32>
    %31 = arith.addf %24, %30 : vector<128x4xf32>
    %32 = vector.extract_strided_slice %25 {offsets = [0, 1, 0], sizes = [8, 16, 4], strides = [1, 1, 1]} : vector<8x18x4xbf16> to vector<8x16x4xbf16>
    %33 = vector.shape_cast %32 : vector<8x16x4xbf16> to vector<128x4xbf16>
    %c1_20 = arith.constant 1 : index
    %c1_21 = arith.constant 1 : index
    %c0_22 = arith.constant 0 : index
    %c0_23 = arith.constant 0 : index
    %34 = vector.load %arg3[%c1_20, %c1_21, %c0_22, %c0_23] : memref<3x3x4x4xbf16, #tpu.memory_space<vmem>>, vector<1x1x4x4xbf16>
    %35 = vector.shape_cast %34 : vector<1x1x4x4xbf16> to vector<4x4xbf16>
    %cst_24 = arith.constant dense<0.000000e+00> : vector<128x4xf32>
    %36 = tpu.matmul %33, %35, %cst_24 {dimension_numbers = #tpu.dot_dimension_numbers<[1], [0], [0], [1], [0, 0, 1, 1], [], []>} : vector<128x4xbf16>, vector<4x4xbf16>, vector<128x4xf32> -> vector<128x4xf32>
    %37 = arith.addf %31, %36 : vector<128x4xf32>
    %38 = vector.extract_strided_slice %25 {offsets = [0, 2, 0], sizes = [8, 16, 4], strides = [1, 1, 1]} : vector<8x18x4xbf16> to vector<8x16x4xbf16>
    %39 = vector.shape_cast %38 : vector<8x16x4xbf16> to vector<128x4xbf16>
    %c1_25 = arith.constant 1 : index
    %c2_26 = arith.constant 2 : index
    %c0_27 = arith.constant 0 : index
    %c0_28 = arith.constant 0 : index
    %40 = vector.load %arg3[%c1_25, %c2_26, %c0_27, %c0_28] : memref<3x3x4x4xbf16, #tpu.memory_space<vmem>>, vector<1x1x4x4xbf16>
    %41 = vector.shape_cast %40 : vector<1x1x4x4xbf16> to vector<4x4xbf16>
    %cst_29 = arith.constant dense<0.000000e+00> : vector<128x4xf32>
    %42 = tpu.matmul %39, %41, %cst_29 {dimension_numbers = #tpu.dot_dimension_numbers<[1], [0], [0], [1], [0, 0, 1, 1], [], []>} : vector<128x4xbf16>, vector<4x4xbf16>, vector<128x4xf32> -> vector<128x4xf32>
    %43 = arith.addf %37, %42 : vector<128x4xf32>
    %44 = vector.extract_strided_slice %4 {offsets = [2, 0, 0], sizes = [8, 18, 4], strides = [1, 1, 1]} : vector<10x18x4xbf16> to vector<8x18x4xbf16>
    %45 = vector.extract_strided_slice %44 {offsets = [0, 0, 0], sizes = [8, 16, 4], strides = [1, 1, 1]} : vector<8x18x4xbf16> to vector<8x16x4xbf16>
    %46 = vector.shape_cast %45 : vector<8x16x4xbf16> to vector<128x4xbf16>
    %c2_30 = arith.constant 2 : index
    %c0_31 = arith.constant 0 : index
    %c0_32 = arith.constant 0 : index
    %c0_33 = arith.constant 0 : index
    %47 = vector.load %arg3[%c2_30, %c0_31, %c0_32, %c0_33] : memref<3x3x4x4xbf16, #tpu.memory_space<vmem>>, vector<1x1x4x4xbf16>
    %48 = vector.shape_cast %47 : vector<1x1x4x4xbf16> to vector<4x4xbf16>
    %cst_34 = arith.constant dense<0.000000e+00> : vector<128x4xf32>
    %49 = tpu.matmul %46, %48, %cst_34 {dimension_numbers = #tpu.dot_dimension_numbers<[1], [0], [0], [1], [0, 0, 1, 1], [], []>} : vector<128x4xbf16>, vector<4x4xbf16>, vector<128x4xf32> -> vector<128x4xf32>
    %50 = arith.addf %43, %49 : vector<128x4xf32>
    %51 = vector.extract_strided_slice %44 {offsets = [0, 1, 0], sizes = [8, 16, 4], strides = [1, 1, 1]} : vector<8x18x4xbf16> to vector<8x16x4xbf16>
    %52 = vector.shape_cast %51 : vector<8x16x4xbf16> to vector<128x4xbf16>
    %c2_35 = arith.constant 2 : index
    %c1_36 = arith.constant 1 : index
    %c0_37 = arith.constant 0 : index
    %c0_38 = arith.constant 0 : index
    %53 = vector.load %arg3[%c2_35, %c1_36, %c0_37, %c0_38] : memref<3x3x4x4xbf16, #tpu.memory_space<vmem>>, vector<1x1x4x4xbf16>
    %54 = vector.shape_cast %53 : vector<1x1x4x4xbf16> to vector<4x4xbf16>
    %cst_39 = arith.constant dense<0.000000e+00> : vector<128x4xf32>
    %55 = tpu.matmul %52, %54, %cst_39 {dimension_numbers = #tpu.dot_dimension_numbers<[1], [0], [0], [1], [0, 0, 1, 1], [], []>} : vector<128x4xbf16>, vector<4x4xbf16>, vector<128x4xf32> -> vector<128x4xf32>
    %56 = arith.addf %50, %55 : vector<128x4xf32>
    %57 = vector.extract_strided_slice %44 {offsets = [0, 2, 0], sizes = [8, 16, 4], strides = [1, 1, 1]} : vector<8x18x4xbf16> to vector<8x16x4xbf16>
    %58 = vector.shape_cast %57 : vector<8x16x4xbf16> to vector<128x4xbf16>
    %c2_40 = arith.constant 2 : index
    %c2_41 = arith.constant 2 : index
    %c0_42 = arith.constant 0 : index
    %c0_43 = arith.constant 0 : index
    %59 = vector.load %arg3[%c2_40, %c2_41, %c0_42, %c0_43] : memref<3x3x4x4xbf16, #tpu.memory_space<vmem>>, vector<1x1x4x4xbf16>
    %60 = vector.shape_cast %59 : vector<1x1x4x4xbf16> to vector<4x4xbf16>
    %cst_44 = arith.constant dense<0.000000e+00> : vector<128x4xf32>
    %61 = tpu.matmul %58, %60, %cst_44 {dimension_numbers = #tpu.dot_dimension_numbers<[1], [0], [0], [1], [0, 0, 1, 1], [], []>} : vector<128x4xbf16>, vector<4x4xbf16>, vector<128x4xf32> -> vector<128x4xf32>
    %62 = arith.addf %56, %61 : vector<128x4xf32>
    %c0_45 = arith.constant 0 : index
    %c0_46 = arith.constant 0 : index
    %63 = vector.load %arg4[%c0_45, %c0_46] : memref<1x4xf32, #tpu.memory_space<vmem>>, vector<1x4xf32>
    %64 = vector.broadcast %63 : vector<1x4xf32> to vector<128x4xf32>
    %65 = arith.mulf %62, %64 : vector<128x4xf32>
    %c0_47 = arith.constant 0 : index
    %c0_48 = arith.constant 0 : index
    %66 = vector.load %arg5[%c0_47, %c0_48] : memref<1x4xf32, #tpu.memory_space<vmem>>, vector<1x4xf32>
    %67 = vector.broadcast %66 : vector<1x4xf32> to vector<128x4xf32>
    %68 = arith.addf %65, %67 : vector<128x4xf32>
    %cst_49 = arith.constant 0.000000e+00 : f32
    %69 = vector.broadcast %cst_49 : f32 to vector<128x4xf32>
    %70 = arith.subf %69, %68 : vector<128x4xf32>
    %71 = math.exp %70 : vector<128x4xf32>
    %cst_50 = arith.constant 1.000000e+00 : f32
    %72 = vector.broadcast %cst_50 : f32 to vector<128x4xf32>
    %73 = arith.addf %72, %71 : vector<128x4xf32>
    %74 = tpu.reciprocal %73 {approx = true} : vector<128x4xf32> -> vector<128x4xf32>
    %75 = arith.mulf %68, %74 : vector<128x4xf32>
    %76 = vector.shape_cast %75 : vector<128x4xf32> to vector<8x16x4xf32>
    %77 = arith.truncf %76 : vector<8x16x4xf32> to vector<8x16x4xbf16>
    %c0_51 = arith.constant 0 : index
    %c0_52 = arith.constant 0 : index
    %c0_53 = arith.constant 0 : index
    %c0_54 = arith.constant 0 : index
    %78 = vector.load %arg6[%c0_51, %c0_52, %c0_53, %c0_54] : memref<1x8x16x4xbf16, #tpu.memory_space<vmem>>, vector<1x8x16x4xbf16>
    %79 = vector.shape_cast %78 : vector<1x8x16x4xbf16> to vector<8x16x4xbf16>
    %80 = vector.shape_cast %77 : vector<8x16x4xbf16> to vector<1x8x16x4xbf16>
    tpu.vector_store %arg6[%c0_51, %c0_52, %c0_53, %c0_54], %80 {strides = array<i32>} : memref<1x8x16x4xbf16, #tpu.memory_space<vmem>>, vector<1x8x16x4xbf16>,
    return
  }
  func.func @transform_0(%arg0: i32, %arg1: i32) -> (i32, i32, i32, i32) {
    %c0_i32 = arith.constant 0 : i32
    %c0_i32_0 = arith.constant 0 : i32
    %c0_i32_1 = arith.constant 0 : i32
    %c0_i32_2 = arith.constant 0 : i32
    return %arg0, %c0_i32, %c0_i32_0, %c0_i32_1 : i32, i32, i32, i32
  }
  func.func @transform_1(%arg0: i32, %arg1: i32) -> (i32, i32, i32, i32) {
    %c0_i32 = arith.constant 0 : i32
    %c0_i32_0 = arith.constant 0 : i32
    %c0_i32_1 = arith.constant 0 : i32
    %c0_i32_2 = arith.constant 0 : i32
    %c0_i32_3 = arith.constant 0 : i32
    return %c0_i32, %c0_i32_0, %c0_i32_1, %c0_i32_2 : i32, i32, i32, i32
  }
  func.func @transform_2(%arg0: i32, %arg1: i32) -> (i32, i32) {
    %c0_i32 = arith.constant 0 : i32
    %c0_i32_0 = arith.constant 0 : i32
    %c0_i32_1 = arith.constant 0 : i32
    return %c0_i32, %c0_i32_0 : i32, i32
  }
  func.func @transform_3(%arg0: i32, %arg1: i32) -> (i32, i32) {
    %c0_i32 = arith.constant 0 : i32
    %c0_i32_0 = arith.constant 0 : i32
    %c0_i32_1 = arith.constant 0 : i32
    return %c0_i32, %c0_i32_0 : i32, i32
  }
  func.func @transform_4(%arg0: i32, %arg1: i32) -> (i32, i32, i32, i32) {
    %c0_i32 = arith.constant 0 : i32
    %c0_i32_0 = arith.constant 0 : i32
    %c0_i32_1 = arith.constant 0 : i32
    return %arg0, %arg1, %c0_i32, %c0_i32_0 : i32, i32, i32, i32
  }
}

module attributes {stable_mosaic.version = 11 : i64} {
  func.func @kernel(%arg0: i32, %arg1: memref<512x4xbf16, #tpu.memory_space<vmem>>, %arg2: memref<512x4xbf16, #tpu.memory_space<vmem>>, %arg3: memref<512x4xbf16, #tpu.memory_space<vmem>>, %arg4: memref<4x8xbf16, #tpu.memory_space<vmem>>, %arg5: memref<4x8xbf16, #tpu.memory_space<vmem>>, %arg6: memref<4x8xbf16, #tpu.memory_space<vmem>>, %arg7: memref<1x8xf32, #tpu.memory_space<vmem>>, %arg8: memref<1x8xf32, #tpu.memory_space<vmem>>, %arg9: memref<512x8xf32, #tpu.memory_space<vmem>>) attributes {dimension_semantics = [#tpu.dimension_semantics<parallel>], iteration_bounds = array<i64: 1>, scalar_prefetch = 0 : i64, scratch_operands = 0 : i64, tpu.core_type = #tpu.core_type<tc>, window_params = [{transform_indices = @transform_0, window_bounds = array<i64: 512, 4>}, {transform_indices = @transform_1, window_bounds = array<i64: 512, 4>}, {transform_indices = @transform_2, window_bounds = array<i64: 512, 4>}, {pipeline_mode = #tpu.pipeline_mode<synchronous>, transform_indices = @transform_3, window_bounds = array<i64: 4, 8>}, {pipeline_mode = #tpu.pipeline_mode<synchronous>, transform_indices = @transform_4, window_bounds = array<i64: 4, 8>}, {pipeline_mode = #tpu.pipeline_mode<synchronous>, transform_indices = @transform_5, window_bounds = array<i64: 4, 8>}, {pipeline_mode = #tpu.pipeline_mode<synchronous>, transform_indices = @transform_6, window_bounds = array<i64: 1, 8>}, {pipeline_mode = #tpu.pipeline_mode<synchronous>, transform_indices = @transform_7, window_bounds = array<i64: 1, 8>}, {transform_indices = @transform_8, window_bounds = array<i64: 512, 8>}]} {
    %c0 = arith.constant 0 : index
    %c0_0 = arith.constant 0 : index
    %0 = vector.load %arg1[%c0, %c0_0] : memref<512x4xbf16, #tpu.memory_space<vmem>>, vector<512x4xbf16>
    %c0_1 = arith.constant 0 : index
    %c0_2 = arith.constant 0 : index
    %1 = vector.load %arg4[%c0_1, %c0_2] : memref<4x8xbf16, #tpu.memory_space<vmem>>, vector<4x8xbf16>
    %cst = arith.constant dense<0.000000e+00> : vector<512x8xf32>
    %2 = tpu.matmul %0, %1, %cst {dimension_numbers = #tpu.dot_dimension_numbers<[1], [0], [0], [1], [0, 0, 1, 1], [], []>} : vector<512x4xbf16>, vector<4x8xbf16>, vector<512x8xf32> -> vector<512x8xf32>
    %c0_3 = arith.constant 0 : index
    %c0_4 = arith.constant 0 : index
    %3 = vector.load %arg2[%c0_3, %c0_4] : memref<512x4xbf16, #tpu.memory_space<vmem>>, vector<512x4xbf16>
    %c0_5 = arith.constant 0 : index
    %c0_6 = arith.constant 0 : index
    %4 = vector.load %arg5[%c0_5, %c0_6] : memref<4x8xbf16, #tpu.memory_space<vmem>>, vector<4x8xbf16>
    %cst_7 = arith.constant dense<0.000000e+00> : vector<512x8xf32>
    %5 = tpu.matmul %3, %4, %cst_7 {dimension_numbers = #tpu.dot_dimension_numbers<[1], [0], [0], [1], [0, 0, 1, 1], [], []>} : vector<512x4xbf16>, vector<4x8xbf16>, vector<512x8xf32> -> vector<512x8xf32>
    %6 = arith.addf %2, %5 : vector<512x8xf32>
    %c0_8 = arith.constant 0 : index
    %c0_9 = arith.constant 0 : index
    %7 = vector.load %arg3[%c0_8, %c0_9] : memref<512x4xbf16, #tpu.memory_space<vmem>>, vector<512x4xbf16>
    %c0_10 = arith.constant 0 : index
    %c0_11 = arith.constant 0 : index
    %8 = vector.load %arg6[%c0_10, %c0_11] : memref<4x8xbf16, #tpu.memory_space<vmem>>, vector<4x8xbf16>
    %cst_12 = arith.constant dense<0.000000e+00> : vector<512x8xf32>
    %9 = tpu.matmul %7, %8, %cst_12 {dimension_numbers = #tpu.dot_dimension_numbers<[1], [0], [0], [1], [0, 0, 1, 1], [], []>} : vector<512x4xbf16>, vector<4x8xbf16>, vector<512x8xf32> -> vector<512x8xf32>
    %10 = arith.addf %6, %9 : vector<512x8xf32>
    %c0_13 = arith.constant 0 : index
    %c0_14 = arith.constant 0 : index
    %11 = vector.load %arg7[%c0_13, %c0_14] : memref<1x8xf32, #tpu.memory_space<vmem>>, vector<1x8xf32>
    %12 = vector.broadcast %11 : vector<1x8xf32> to vector<512x8xf32>
    %13 = arith.mulf %10, %12 : vector<512x8xf32>
    %c0_15 = arith.constant 0 : index
    %c0_16 = arith.constant 0 : index
    %14 = vector.load %arg8[%c0_15, %c0_16] : memref<1x8xf32, #tpu.memory_space<vmem>>, vector<1x8xf32>
    %15 = vector.broadcast %14 : vector<1x8xf32> to vector<512x8xf32>
    %16 = arith.addf %13, %15 : vector<512x8xf32>
    %cst_17 = arith.constant 0.000000e+00 : f32
    %17 = vector.broadcast %cst_17 : f32 to vector<512x8xf32>
    %18 = arith.subf %17, %16 : vector<512x8xf32>
    %19 = math.exp %18 : vector<512x8xf32>
    %cst_18 = arith.constant 1.000000e+00 : f32
    %20 = vector.broadcast %cst_18 : f32 to vector<512x8xf32>
    %21 = arith.addf %20, %19 : vector<512x8xf32>
    %22 = tpu.reciprocal %21 {approx = true} : vector<512x8xf32> -> vector<512x8xf32>
    %23 = arith.mulf %16, %22 : vector<512x8xf32>
    %c0_19 = arith.constant 0 : index
    %c0_20 = arith.constant 0 : index
    %24 = vector.load %arg9[%c0_19, %c0_20] : memref<512x8xf32, #tpu.memory_space<vmem>>, vector<512x8xf32>
    tpu.vector_store %arg9[%c0_19, %c0_20], %23 {strides = array<i32>} : memref<512x8xf32, #tpu.memory_space<vmem>>, vector<512x8xf32>,
    return
  }
  func.func @transform_0(%arg0: i32) -> (i32, i32) {
    %c0_i32 = arith.constant 0 : i32
    %c0_i32_0 = arith.constant 0 : i32
    return %arg0, %c0_i32 : i32, i32
  }
  func.func @transform_1(%arg0: i32) -> (i32, i32) {
    %c0_i32 = arith.constant 0 : i32
    %c0_i32_0 = arith.constant 0 : i32
    return %arg0, %c0_i32 : i32, i32
  }
  func.func @transform_2(%arg0: i32) -> (i32, i32) {
    %c0_i32 = arith.constant 0 : i32
    %c0_i32_0 = arith.constant 0 : i32
    return %arg0, %c0_i32 : i32, i32
  }
  func.func @transform_3(%arg0: i32) -> (i32, i32) {
    %c0_i32 = arith.constant 0 : i32
    %c0_i32_0 = arith.constant 0 : i32
    %c0_i32_1 = arith.constant 0 : i32
    return %c0_i32, %c0_i32_0 : i32, i32
  }
  func.func @transform_4(%arg0: i32) -> (i32, i32) {
    %c0_i32 = arith.constant 0 : i32
    %c0_i32_0 = arith.constant 0 : i32
    %c0_i32_1 = arith.constant 0 : i32
    return %c0_i32, %c0_i32_0 : i32, i32
  }
  func.func @transform_5(%arg0: i32) -> (i32, i32) {
    %c0_i32 = arith.constant 0 : i32
    %c0_i32_0 = arith.constant 0 : i32
    %c0_i32_1 = arith.constant 0 : i32
    return %c0_i32, %c0_i32_0 : i32, i32
  }
  func.func @transform_6(%arg0: i32) -> (i32, i32) {
    %c0_i32 = arith.constant 0 : i32
    %c0_i32_0 = arith.constant 0 : i32
    %c0_i32_1 = arith.constant 0 : i32
    return %c0_i32, %c0_i32_0 : i32, i32
  }
  func.func @transform_7(%arg0: i32) -> (i32, i32) {
    %c0_i32 = arith.constant 0 : i32
    %c0_i32_0 = arith.constant 0 : i32
    %c0_i32_1 = arith.constant 0 : i32
    return %c0_i32, %c0_i32_0 : i32, i32
  }
  func.func @transform_8(%arg0: i32) -> (i32, i32) {
    %c0_i32 = arith.constant 0 : i32
    %c0_i32_0 = arith.constant 0 : i32
    return %arg0, %c0_i32 : i32, i32
  }
}

</mosaic_0001>

<bundles_post_ra>
// kernel: c2f_forward.5
= control target key start
LH: loop header
LB: loop body
LE: loop exit
PB: predicated region body
PF: predicated region fallthrough
CT: control target
= control target key end

     0   :  { %s2863_s15 = smov 0   ;;  %s2865_s16 = smov 0   ;;  %s3620_s0 = inlined_call_operand.vmem [shape: bf16[2,18,18,4], index: 0, kind: input, shape index: {}]   ;;  %s3621_s1 = inlined_call_operand.vmem [shape: bf16[3,3,4,4], index: 1, kind: input, shape index: {}]   ;;  %s3622_s2 = inlined_call_operand.vmem [shape: f32[1,4], index: 2, kind: input, shape index: {}]   ;;  %s3623_s3 = inlined_call_operand.vmem [shape: f32[1,4], index: 3, kind: input, shape index: {}]   ;;  %s3624_s4 = inlined_call_operand.vmem [shape: bf16[2,16,16,4], index: 4, kind: output, shape index: {}]  }
   0x1   :  { %s2867_s17 = smov 0   ;;  %s2869_s18 = smov 0  }
   0x2   :  { %s2871_s19 = smov 0  }
   0x3 LB: > { %s23_s20 = sadd.s32 1, %s2828_s17  ;;  %s26_s21 = sadd.s32 1, %s2832_s18  ;;  %s2836_s19 = sphi %s2871_s19, %s14_s19   ;;  %s2832_s18 = sphi %s2869_s18, %s3633_s18   ;;  %s2828_s17 = sphi %s2867_s17, %s3632_s17   ;;  %s2824_s16 = sphi %s2865_s16, %s3631_s16   ;;  %s2820_s15 = sphi %s2863_s15, %s3630_s15  }
   0x4   : > { %p24_p0 = scmp.ge.s32.totalorder %s23_s20, 2  ;;  %p2134_p1 = scmp.ge.s32.totalorder %s2836_s19, 1 }
   0x5   : > { %p176_p2 = scmp.lt.s32.totalorder %s2836_s19, 5 }
   0x6   : > { %s3635_s20 = smov (%p24_p0, %s23_s20), 0  ;;  %s3637_s21 = smov (!%p24_p0, %s26_s21), %s2832_s18 }
   0x7   : > { %p177_p3 = pnand %p2134_p1, %p176_p2  ;;  %p28_p4 = scmp.ge.s32.totalorder %s3637_s21, 2 }
   0x8   : > { %v2143_v0 = vld [vmem:[%s3621_s1 + $0x2] sm:$0x3] (!%p177_p3)  ;;  %vm505_vm0 = vcmask (!%p177_p3), 1041408   ;;  %v2901_v1 = vld [vmem:[%s3621_s1 + $0x8] sm:$0x3] (!%p177_p3)  ;;  %p207_p5 = scmp.lt.s32.totalorder (!%p177_p3), %s2824_s16, 1 }
   0x9   : > { %s3639_s21 = smov (%p28_p4, %s3637_s21), 0  ;;  %180 = sbr.rel (%p177_p3) target bundleno = 434 (0x1b2), region = 36 }
   0xa   : > { %2673 = vmatprep.subr.msk.bf16.mxu1 (!%p177_p3), %vm505_vm0, %v2143_v0  ;;  %2677 = vmatprep.subr.msk.bf16.mxu0 (!%p177_p3), %vm505_vm0, %v2901_v1  ;;  %v507_v2 = vsel (!%p177_p3), %vm505_vm0, %v2143_v0, 0  ;;  %v2909_v3 = vsel (!%p177_p3), %vm505_vm0, %v2901_v1, 0  ;;  %v258_v4 = vld [vmem:[%s3621_s1] sm:$0x3] (!%p177_p3)  ;;  %s2283_s28 = smul.u32 (!%p177_p3), 96, %s2820_s15  ;;  %vm480_vm3 = vcmask (!%p177_p3), 31744  }
   0xb   : > { %2382 = vmatpush3.bf16.msra.mxu1 (!%p177_p3), %v507_v2  ;;  %2454 = vmatpush3.bf16.msra.mxu0 (!%p177_p3), %v2909_v3  ;;  %v2222_v5 = vld [vmem:[%s3621_s1 + $0xa] sm:$0x3] (!%p177_p3)  ;;  %vm259_vm1 = vsmask.f32 (!%p177_p3), 3328  ;;  %vm260_vm2 = vsmask.f32 (!%p177_p3), 7440 }
   0xc   : > { %2674 = vmatprep.subr.msk.bf16.mxu1 (!%p177_p3), %vm505_vm0, %v258_v4  ;;  %2679 = vmatprep.subr.msk.bf16.mxu0 (!%p177_p3), %vm505_vm0, %v2222_v5  ;;  %v2930_v6 = vsel (!%p177_p3), %vm505_vm0, %v258_v4, 0  ;;  %v2956_v18 = vsel (!%p177_p3), %vm505_vm0, %v2222_v5, 0  ;;  %v2961_v23 = vld [vmem:[%s3621_s1 + $0xc] sm:$0x3] (!%p177_p3)  ;;  %vm2973_vm4 = vmor (!%p177_p3), %vm259_vm1, %vm260_vm2  ;;  %vm778_vm5 = vcmask (!%p177_p3), 1042432   ;;  %vm779_vm6 = vcmask (!%p177_p3), 1046532  }
   0xd   : > { %v2982_v38 = vsel (!%p177_p3), %vm505_vm0, %v2961_v23, 0  ;;  %vm3056_vm7 = vmor (!%p177_p3), %vm778_vm5, %vm779_vm6  ;;  %vm2021_vm8 = vcmask (!%p177_p3), 27648  }
  0x10   : > { %s3641_s16 = smov (!%p207_p5, %s2824_s16), 1 }
  0x11   : > { %s2683_s5 = smul.u32 216, %s3641_s16 }
  0x13   : > { %s211_s8 = scalar_lea.vmem %s3620_s0, %s2683_s5  ;;  %s2136_s5 = sshll.u32 %s2820_s15, 3 }
  0x14   : > { %s2927_s9 = scalar_lea.vmem %s211_s8, %s2283_s28  ;;  %p3497_p6 = scmp.lt.s32.totalorder %s2136_s5, 15 }
  0x15   : > { %v2933_v7 = vld [vmem:[%s2927_s9] sm:$0xf]  ;;  %v2936_v8 = vld [vmem:[%s2927_s9 + $0x4] sm:$0xf]  ;;  %v2939_v9 = vld [vmem:[%s2927_s9 + $0x8] sm:$0x1] }
  0x16   : > { %v263_v10 = vshrl.u32 %v2933_v7, 16  ;;  %v266_v11 = vshll.u32 %v2933_v7, 16  ;;  %v272_v12 = vshll.u32 %v2936_v8, 16  ;;  %v276_v13 = vshrl.u32 %v2936_v8, 16  ;;  %v2946_v14 = vld [vmem:[%s2927_s9 + $0xc] sm:$0xf] }
  0x17   : > { %v282_v15 = vshll.u32 %v2939_v9, 16  ;;  %v2950_v16 = vld [vmem:[%s2927_s9 + $0x10] sm:$0xf]  ;;  %v2953_v17 = vld [vmem:[%s2927_s9 + $0x14] sm:$0x1]  ;;  %v287_v25 = vshrl.u32 %v2946_v14, 16 }
  0x18   : > { %v265_v19 = vrot.slane %v263_v10, 4  ;;  %v268_v20 = vrot.slane %v266_v11, 5  ;;  %v274_v21 = vrot.slane %v272_v12, 5  ;;  %v278_v22 = vrot.slane %v276_v13, 4  ;;  %v2969_v32 = vld [vmem:[%s2927_s9 + $0x18] sm:$0xf] }
  0x19   : > { %v284_v24 = vrot.slane %v282_v15, 5  ;;  %v290_v26 = vshll.u32 %v2946_v14, 16  ;;  %v296_v27 = vshll.u32 %v2950_v16, 16  ;;  %v300_v30 = vshrl.u32 %v2950_v16, 16  ;;  %v2978_v37 = vld [vmem:[%s2927_s9 + $0x1c] sm:$0xf] }
  0x1a   : > { %v269_v28 = vor.u32 %v268_v20, %v265_v19  ;;  %v279_v29 = vor.u32 %v278_v22, %v274_v21  ;;  %v306_v31 = vshll.u32 %v2953_v17, 16  ;;  %v289_v34 = vrot.slane %v287_v25, 4  ;;  %v2986_v45 = vld [vmem:[%s2927_s9 + $0x20] sm:$0x1]  ;;  %v2996_v56 = vld [vmem:[%s2927_s9 + $0x24] sm:$0xf] }
  0x1b   : > { %v292_v35 = vrot.slane %v290_v26, 5  ;;  %v298_v36 = vrot.slane %v296_v27, 5  ;;  %v302_v41 = vrot.slane %v300_v30, 4  ;;  %v793_v44 = vrot.slane %v2953_v17, 5  ;;  %v3001_v61 = vld [vmem:[%s2927_s9 + $0x28] sm:$0xf] }
  0x1c   : > { %v270_v39 = vrot.slane %v269_v28, 4  ;;  %v280_v40 = vrot.slane %v279_v29, 4  ;;  %v308_v42 = vrot.slane %v306_v31, 5  ;;  %v311_v46 = vshrl.u32 %v2969_v32, 16  ;;  %v3009_v4 = vld [vmem:[%s2927_s9 + $0x2c] sm:$0x1] }
  0x1d   : > { %v293_v43 = vor.u32 %v292_v35, %v289_v34  ;;  %v314_v47 = vshll.u32 %v2969_v32, 16  ;;  %v303_v50 = vor.u32 %v302_v41, %v298_v36  ;;  %v320_v51 = vshll.u32 %v2978_v37, 16  ;;  %v3015_v13 = vld [vmem:[%s2927_s9 + $0x30] sm:$0xf]  ;;  %v3022_v22 = vld [vmem:[%s3621_s1 + $0x4] sm:$0x3] }
  0x1e   : > { %v275_v48 = vsel %vm2973_vm4, %v270_v39, %v274_v21  ;;  %v285_v49 = vsel %vm2973_vm4, %v280_v40, %v284_v24  ;;  %v313_v54 = vrot.slane %v311_v46, 4  ;;  %v324_v59 = vshrl.u32 %v2978_v37, 16  ;;  %v3027_v28 = vld [vmem:[%s2927_s9 + $0x34] sm:$0xf]  ;;  %v3034_v34 = vld [vmem:[%s2927_s9 + $0x38] sm:$0x1] }
  0x1f   : > { %v2144_v52 = vcombine.low %v275_v48, %v285_v49  ;;  %v294_v53 = vrot.slane %v293_v43, 4  ;;  %v316_v55 = vrot.slane %v314_v47, 5  ;;  %v304_v57 = vrot.slane %v303_v50, 4  ;;  %s3643_s5 = smov (!%p3497_p6, %s2136_s5), 15  ;;  %s2138_s15 = sshll.u32 %s3641_s16, 5 }
  0x20   : > { %v322_v58 = vrot.slane %v320_v51, 5  ;;  %v330_v60 = vshll.u32 %v2986_v45, 16  ;;  %v797_v0 = vrot.slane %v2978_v37, 5  ;;  %v800_v2 = vrot.slane %v2986_v45, 5  ;;  %v3047_v51 = vld [vmem:[%s2927_s9 + $0x3c] sm:$0xf] }
  0x21   : > { %2383 = vmatprep.mubr.msk.bf16.mxu1 %vm480_vm3, %v2144_v52  ;;  %v299_v62 = vsel %vm2973_vm4, %v294_v53, %v298_v36  ;;  %v317_v63 = vor.u32 %v316_v55, %v313_v54  ;;  %v309_v5 = vsel %vm2973_vm4, %v304_v57, %v308_v42  ;;  %v326_v10 = vrot.slane %v324_v59, 4  ;;  %v3052_v57 = vld [vmem:[%s2927_s9 + $0x40] sm:$0xf]  ;;  %s2137_s7 = sshll.u32 %s3643_s5, 1 }
  0x22   : > { %v332_v11 = vrot.slane %v330_v60, 5  ;;  %v335_v12 = vshrl.u32 %v2996_v56, 16  ;;  %v2145_v15 = vcombine.low %v299_v62, %v309_v5  ;;  %v338_v20 = vshll.u32 %v2996_v56, 16  ;;  %s3531_s16 = sadd.s32 %s2138_s15, %s2137_s7 }
  0x23   : > { %v318_v19 = vrot.slane %v317_v63, 4  ;;  %v344_v21 = vshll.u32 %v3001_v61, 16  ;;  %v327_v24 = vor.u32 %v326_v10, %v322_v58  ;;  %v348_v26 = vshrl.u32 %v3001_v61, 16  ;;  %s2139_s8 = sshll.u32 %s3531_s16, 2 }
  0x24   : > { %v337_v25 = vrot.slane %v335_v12, 4  ;;  %v354_v27 = vshll.u32 %v3009_v4, 16  ;;  %2455 = vmatprep.mubr.msk.bf16.mxu0 %vm480_vm3, %v2145_v15  ;;  %2384 = vmatmul.mubr.msk.bf16.vlgmr.msra.gmra.mrb[0].mxu1 %vm480_vm3, %v2145_v15  ;;  %v340_v30 = vrot.slane %v338_v20, 5  ;;  %v359_v35 = vshrl.u32 %v3015_v13, 16  ;;  %v3073_v20 = vld [vmem:[%s2927_s9 + $0x44] sm:$0x1]  ;;  %s3556_s11 = scalar_lea.vmem %s3624_s4, %s2139_s8 }
  0x25   : > { %v323_v29 = vsel %vm2973_vm4, %v318_v19, %v322_v58  ;;  %v346_v31 = vrot.slane %v344_v21, 5  ;;  %2400 = vmatpush3.bf16.msra.mxu1 %v2930_v6  ;;  %v328_v36 = vrot.slane %v327_v24, 4  ;;  %v350_v39 = vrot.slane %v348_v26, 4 }
  0x26   : > { %v356_v40 = vrot.slane %v354_v27, 5  ;;  %v362_v41 = vshll.u32 %v3015_v13, 16  ;;  %v341_v42 = vor.u32 %v340_v30, %v337_v25  ;;  %v361_v43 = vrot.slane %v359_v35, 4  ;;  %2675 = vmatprep.subr.msk.bf16.mxu1 %vm505_vm0, %v3022_v22 }
  0x27   : > { %v368_v46 = vshll.u32 %v3027_v28, 16  ;;  %v372_v47 = vshrl.u32 %v3027_v28, 16  ;;  %v333_v48 = vsel %vm2973_vm4, %v328_v36, %v332_v11  ;;  %v351_v49 = vor.u32 %v350_v39, %v346_v31  ;;  %v3086_v36 = vld [vmem:[%s2927_s9 + $0x48] sm:$0xf] }
  0x28   : > { %v364_v6 = vrot.slane %v362_v41, 5  ;;  %v378_v50 = vshll.u32 %v3034_v34, 16  ;;  %v3049_v52 = vcombine.low %v323_v29, %v333_v48  ;;  %v342_v53 = vrot.slane %v341_v42, 4  ;;  %v3101_v42 = vld [vmem:[%s2927_s9 + $0x4c] sm:$0xf] }
  0x29   : > { %v370_v54 = vrot.slane %v368_v46, 5  ;;  %v374_v55 = vrot.slane %v372_v47, 4  ;;  %v352_v58 = vrot.slane %v351_v49, 4  ;;  %v2177_v63 = vrot.slane %v2946_v14, 9 }
  0x2a   : > { %v365_v59 = vor.u32 %v364_v6, %v361_v43  ;;  %v380_v60 = vrot.slane %v378_v50, 5  ;;  %2456 = vmatmul.mubr.msk.bf16.vlgmr.msra.gmra.mrb[0].mxu0 %vm480_vm3, %v3049_v52  ;;  %2387 = vmatprep.mubr.msk.bf16.mxu1 %vm480_vm3, %v3049_v52  ;;  %v347_v5 = vsel %vm2973_vm4, %v342_v53, %v346_v31  ;;  %v790_v11 = vrot.slane %v2950_v16, 5 }
  0x2b   : > { %v375_v10 = vor.u32 %v374_v55, %v370_v54  ;;  %v383_v12 = vshrl.u32 %v3047_v51, 16  ;;  %2472 = vmatpush3.bf16.msra.mxu0 %v2956_v18  ;;  %v357_v15 = vsel %vm2973_vm4, %v352_v58, %v356_v40  ;;  %v386_v21 = vshll.u32 %v3047_v51, 16 }
  0x2c   : > { %v366_v19 = vrot.slane %v365_v59, 4  ;;  %v392_v24 = vshll.u32 %v3052_v57, 16  ;;  %v3077_v25 = vcombine.low %v347_v5, %v357_v15  ;;  %v791_v27 = vsel %vm3056_vm7, %v2177_v63, %v790_v11  ;;  %2680 = vmatprep.subr.msk.bf16.mxu0 %vm505_vm0, %v2961_v23 }
  0x2d   : > { %v376_v26 = vrot.slane %v375_v10, 4  ;;  %v792_v29 = vrot.slane %v790_v11, 4  ;;  %v385_v30 = vrot.slane %v383_v12, 4  ;;  %v388_v31 = vrot.slane %v386_v21, 5 }
  0x2e   : > { %v371_v18 = vsel %vm2973_vm4, %v366_v19, %v370_v54  ;;  %v394_v35 = vrot.slane %v392_v24, 5  ;;  %2459 = vmatprep.mubr.msk.bf16.mxu0 %vm480_vm3, %v3077_v25  ;;  %2388 = vmatmul.mubr.msk.bf16.gmra.mrb[4].mxu1 %vm480_vm3, %v3077_v25  ;;  %v396_v40 = vshrl.u32 %v3052_v57, 16  ;;  %v402_v41 = vshll.u32 %v3073_v20, 16  ;;  %v3118_v54 = vld [vmem:[%s2927_s9 + $0x50] sm:$0x1] }
  0x2f   : > { %v381_v39 = vsel %vm2973_vm4, %v376_v26, %v380_v60  ;;  %v794_v23 = vsel %vm3056_vm7, %v792_v29, %v793_v44  ;;  %v389_v47 = vor.u32 %v388_v31, %v385_v30  ;;  %v2178_v48 = vrot.slane %v2969_v32, 9  ;;  %v3143_v29 = vld [vmem:[%s2927_s9 + $0x58] sm:$0xf] }
  0x30   : > { %v3103_v43 = vcombine.low %v371_v18, %v381_v39  ;;  %v3105_v46 = vcombine.low %v791_v27, %v794_v23  ;;  %v398_v49 = vrot.slane %v396_v40, 4  ;;  %v404_v17 = vrot.slane %v402_v41, 5  ;;  %v3149_v39 = vld [vmem:[%s2927_s9 + $0x5c] sm:$0x1] }
  0x31   : > { %v799_v6 = vrot.slane %v797_v0, 4  ;;  %v407_v44 = vshrl.u32 %v3086_v36, 16  ;;  %v390_v50 = vrot.slane %v389_v47, 4  ;;  %v798_v53 = vsel %vm3056_vm7, %v2178_v48, %v797_v0  ;;  %v3130_v0 = vld [vmem:[%s2927_s9 + $0x54] sm:$0xf] }
  0x32   : > { %2391 = vmatprep.mubr.msk.bf16.mxu1 %vm480_vm3, %v3103_v43  ;;  %v410_v55 = vshll.u32 %v3086_v36, 16  ;;  %v416_v58 = vshll.u32 %v3101_v42, 16  ;;  %2460 = vmatmul.mubr.msk.bf16.gmra.mrb[4].mxu0 %vm480_vm3, %v3103_v43  ;;  %v399_v59 = vor.u32 %v398_v49, %v394_v35  ;;  %v420_v5 = vshrl.u32 %v3101_v42, 16 }
  0x33   : > { %v801_v60 = vsel %vm3056_vm7, %v799_v6, %v800_v2  ;;  %v409_v63 = vrot.slane %v407_v44, 4  ;;  %2473 = vmatprep.mubr.msk.bf16.mxu0 %vm480_vm3, %v3105_v46  ;;  %v395_v10 = vsel %vm2973_vm4, %v390_v50, %v394_v35  ;;  %v426_v2 = vshll.u32 %v3118_v54, 16 }
  0x34   : > { %v3136_v11 = vcombine.low %v798_v53, %v801_v60  ;;  %v412_v12 = vrot.slane %v410_v55, 5  ;;  %v418_v45 = vrot.slane %v416_v58, 5  ;;  %v400_v15 = vrot.slane %v399_v59, 4  ;;  %v3168_v58 = vld [vmem:[%s3621_s1 + $0xe] sm:$0x3] }
  0x35   : > { %v422_v19 = vrot.slane %v420_v5, 4  ;;  %v2179_v21 = vrot.slane %v2996_v56, 9  ;;  %v804_v26 = vrot.slane %v3001_v61, 5  ;;  %v807_v27 = vrot.slane %v3009_v4, 5 }
  0x36   : > { %v413_v24 = vor.u32 %v412_v12, %v409_v63  ;;  %v431_v18 = vshrl.u32 %v3130_v0, 16  ;;  %v405_v30 = vsel %vm2973_vm4, %v400_v15, %v404_v17  ;;  %v428_v35 = vrot.slane %v426_v2, 5 }
  0x37   : > { %v423_v31 = vor.u32 %v422_v19, %v418_v45  ;;  %v434_v23 = vshll.u32 %v3130_v0, 16  ;;  %v3152_v40 = vcombine.low %v395_v10, %v405_v30  ;;  %v805_v47 = vsel %vm3056_vm7, %v2179_v21, %v804_v26 }
  0x38   : > { %v414_v41 = vrot.slane %v413_v24, 4  ;;  %v806_v4 = vrot.slane %v804_v26, 4  ;;  %v433_v49 = vrot.slane %v431_v18, 4  ;;  %v440_v44 = vshll.u32 %v3143_v29, 16 }
  0x39   : > { %v424_v48 = vrot.slane %v423_v31, 4  ;;  %v436_v6 = vrot.slane %v434_v23, 5  ;;  %2392 = vmatmul.mubr.msk.bf16.gmra.mrb[8].mxu1 %vm480_vm3, %v3152_v40  ;;  %v444_v53 = vshrl.u32 %v3143_v29, 16  ;;  %v450_v55 = vshll.u32 %v3149_v39, 16 }
  0x3a   : > { %v419_v17 = vsel %vm2973_vm4, %v414_v41, %v418_v45  ;;  %v808_v50 = vsel %vm3056_vm7, %v806_v4, %v807_v27  ;;  %2474 = vmatmul.mubr.msk.bf16.vlgmr.msra.gmra.mrb[0].mxu0 %vm480_vm3, %v3136_v11  ;;  %v442_v5 = vrot.slane %v440_v44, 5  ;;  %v2180_v45 = vrot.slane %v3015_v13, 9 }
  0x3b   : > { %v429_v59 = vsel %vm2973_vm4, %v424_v48, %v428_v35  ;;  %v3174_v60 = vcombine.low %v805_v47, %v808_v50  ;;  %v437_v63 = vor.u32 %v436_v6, %v433_v49  ;;  %2490 = vmatpush3.bf16.msra.mxu0 %v2982_v38  ;;  %v446_v12 = vrot.slane %v444_v53, 4  ;;  %v3212_v53 = vld [vmem:[%s2927_s9 + $0x64] sm:$0xf] }
  0x3c   : > { %v3177_v10 = vcombine.low %v419_v17, %v429_v59  ;;  %v811_v19 = vrot.slane %v3027_v28, 5  ;;  %v814_v2 = vrot.slane %v3034_v34, 5  ;;  %v2181_v21 = vrot.slane %v3047_v51, 9  ;;  %2681 = vmatprep.subr.msk.bf16.mxu0 %vm505_vm0, %v3168_v58 }
  0x3d   : > { %2477 = vmatprep.mubr.msk.bf16.mxu0 %vm480_vm3, %v3174_v60  ;;  %v438_v15 = vrot.slane %v437_v63, 4  ;;  %v447_v38 = vor.u32 %v446_v12, %v442_v5  ;;  %v452_v24 = vrot.slane %v450_v55, 5  ;;  %v818_v26 = vrot.slane %v3052_v57, 5 }
  0x3e   : > { %2395 = vmatprep.mubr.msk.bf16.mxu1 %vm480_vm3, %v3177_v10  ;;  %v821_v27 = vrot.slane %v3073_v20, 5  ;;  %v812_v18 = vsel %vm3056_vm7, %v2180_v45, %v811_v19  ;;  %v813_v30 = vrot.slane %v811_v19, 4  ;;  %v2160_v34 = vcombine.low %v2933_v7, %v2936_v8  ;;  %v3234_v19 = vld [vmem:[%s2927_s9 + $0x68] sm:$0x1] }
  0x3f   : > { %v825_v31 = vrot.slane %v3101_v42, 5  ;;  %v443_v35 = vsel %vm2973_vm4, %v438_v15, %v442_v5  ;;  %v448_v23 = vrot.slane %v447_v38, 4  ;;  %v819_v41 = vsel %vm3056_vm7, %v2181_v21, %v818_v26  ;;  %v3223_v5 = vld [vmem:[%s2927_s9 + $0x60] sm:$0xf] }
  0x40   : > { %v820_v47 = vrot.slane %v818_v26, 4  ;;  %v815_v20 = vsel %vm3056_vm7, %v813_v30, %v814_v2  ;;  %v2182_v4 = vrot.slane %v3086_v36, 9  ;;  %v828_v49 = vrot.slane %v3118_v54, 5 }
  0x41   : > { %v827_v48 = vrot.slane %v825_v31, 4  ;;  %v453_v6 = vsel %vm2973_vm4, %v448_v23, %v452_v24  ;;  %v3206_v44 = vcombine.low %v812_v18, %v815_v20  ;;  %v2183_v50 = vrot.slane %v3130_v0, 9  ;;  %v3259_v23 = vld [vmem:[%s2927_s9 + $0x70] sm:$0xf] }
  0x42   : > { %v822_v17 = vsel %vm3056_vm7, %v820_v47, %v821_v27  ;;  %v3214_v55 = vcombine.low %v443_v35, %v453_v6  ;;  %v832_v63 = vrot.slane %v3143_v29, 5  ;;  %v835_v54 = vrot.slane %v3149_v39, 5 }
  0x43   : > { %v3216_v59 = vcombine.low %v819_v41, %v822_v17  ;;  %2478 = vmatmul.mubr.msk.bf16.gmra.mrb[4].mxu0 %vm480_vm3, %v3206_v44  ;;  %v826_v12 = vsel %vm3056_vm7, %v2182_v4, %v825_v31  ;;  %v829_v45 = vsel %vm3056_vm7, %v827_v48, %v828_v49  ;;  %v1280_v39 = vrot.slane %v3212_v53, 5  ;;  %v257_v49 = vld [vmem:[%s2927_s9 + $0x74] sm:$0x1] }
  0x44   : > { %2396 = vmatmul.mubr.msk.bf16.gmra.mrb[12].mxu1 %vm480_vm3, %v3214_v55  ;;  %v834_v15 = vrot.slane %v832_v63, 4  ;;  %v833_v2 = vsel %vm3056_vm7, %v2183_v50, %v832_v63  ;;  %v786_v21 = vrot.slane %v2939_v9, 5  ;;  %v2221_v24 = vrot.slane %v3223_v5, 9 }
  0x45   : > { %2481 = vmatprep.mubr.msk.bf16.mxu0 %vm480_vm3, %v3216_v59  ;;  %2401 = vmatprep.mubr.msk.bf16.mxu1 %vm480_vm3, %v2160_v34  ;;  %v2176_v26 = vrot.slane %v2933_v7, 9  ;;  %v3245_v27 = vcombine.low %v826_v12, %v829_v45  ;;  %v1282_v18 = vrot.slane %v1280_v39, 4  ;;  %v1283_v30 = vrot.slane %v3234_v19, 5  ;;  %v3250_v34 = vld [vmem:[%s2927_s9 + $0x6c] sm:$0xf] }
  0x46   : > { %v836_v38 = vsel %vm3056_vm7, %v834_v15, %v835_v54  ;;  %v783_v31 = vrot.slane %v2936_v8, 5  ;;  %v3254_v9 = vcombine.low %v2946_v14, %v2950_v16  ;;  %v1536_v7 = vshrl.u32 %v3250_v34, 16 }
  0x47   : > { %v3256_v35 = vcombine.low %v833_v2, %v836_v38  ;;  %v1539_v41 = vshll.u32 %v3250_v34, 16  ;;  %v3265_v47 = vcombine.low %v2969_v32, %v2978_v37  ;;  %v1549_v4 = vshrl.u32 %v3259_v23, 16  ;;  %v2201_v37 = vld [vmem:[%s3621_s1 + $0x6] sm:$0x3] }
  0x48   : > { %v784_v8 = vsel %vm3056_vm7, %v2176_v26, %v783_v31  ;;  %v785_v20 = vrot.slane %v783_v31, 4  ;;  %v888_v14 = vsel %vm505_vm0, %v3022_v22, 0  ;;  %v1281_v16 = vsel %vm3056_vm7, %v2221_v24, %v1280_v39 }
  0x49   : > { %v1284_v48 = vsel %vm3056_vm7, %v1282_v18, %v1283_v30  ;;  %v1538_v6 = vrot.slane %v1536_v7, 4  ;;  %v1541_v17 = vrot.slane %v1539_v41, 5  ;;  %v1545_v63 = vshll.u32 %v3259_v23, 16 }
  0x4a   : > { %v787_v32 = vsel %vm3056_vm7, %v785_v20, %v786_v21  ;;  %v1551_v54 = vrot.slane %v1549_v4, 4  ;;  %v3291_v12 = vcombine.low %v1281_v16, %v1284_v48  ;;  %v1555_v45 = vshll.u32 %v257_v49, 16 }
  0x4b   : > { %2482 = vmatmul.mubr.msk.bf16.gmra.mrb[8].mxu0 %vm480_vm3, %v3245_v27  ;;  %v2185_v22 = vcombine.low %v784_v8, %v787_v32  ;;  %v1542_v50 = vor.u32 %v1541_v17, %v1538_v6  ;;  %v2252_v15 = vrot.slane %v3250_v34, 9  ;;  %v1547_v2 = vrot.slane %v1545_v63, 5 }
  0x4c   : > { %2402 = vmatmul.mubr.msk.bf16.vlgmr.msra.gmra.mrb[0].mxu1 %vm480_vm3, %v3254_v9  ;;  %2485 = vmatprep.mubr.msk.bf16.mxu0 %vm480_vm3, %v3256_v35  ;;  %v1686_v21 = vrot.slane %v3259_v23, 5  ;;  %v1689_v38 = vrot.slane %v257_v49, 5  ;;  %v3298_v24 = vcombine.low %v2996_v56, %v3001_v61  ;;  %v3302_v26 = vcombine.low %v3015_v13, %v3027_v28 }
  0x4d   : > { %2418 = vmatpush3.bf16.msra.mxu1 %v888_v14  ;;  %2405 = vmatprep.mubr.msk.bf16.mxu1 %vm480_vm3, %v3265_v47  ;;  %v1543_v39 = vrot.slane %v1542_v50, 4  ;;  %v1557_v18 = vrot.slane %v1555_v45, 5  ;;  %v1552_v31 = vor.u32 %v1551_v54, %v1547_v2  ;;  %v3328_v62 = vcombine.low %v3047_v51, %v3052_v57  ;;  %v2253_v14 = vld [vmem:[%s3621_s1 + $0x10] sm:$0x3] }
  0x4e   : > { %2676 = vmatprep.subr.msk.bf16.mxu1 %vm505_vm0, %v2201_v37  ;;  %v3308_v7 = vsel %vm3056_vm7, %v2252_v15, %v1686_v21  ;;  %v1688_v41 = vrot.slane %v1686_v21, 4  ;;  %v1568_v20 = vsel %vm505_vm0, %v3168_v58, 0  ;;  %v3334_v4 = vcombine.low %v3086_v36, %v3101_v42 }
  0x4f   : > { %v1548_v30 = vsel %vm2973_vm4, %v1543_v39, %v1547_v2  ;;  %v1553_v8 = vrot.slane %v1552_v31, 4  ;;  %v2167_v51 = vcombine.low %v3130_v0, %v3143_v29  ;;  %v2202_v57 = vcombine.low %v3223_v5, %v3212_v53 }
  0x50   : > { %v3314_v56 = vsel %vm3056_vm7, %v1688_v41, %v1689_v38  ;;  %v1014_v36 = vsel %vm505_vm0, %v2201_v37, 0  ;;  %v2233_v42 = vcombine.low %v3250_v34, %v3259_v23  ;;  %v1133_v0 = vshll.u32 %v3223_v5, 16 }
  0x51   : > { %v2254_v61 = vcombine.low %v3308_v7, %v3314_v56  ;;  %v1558_v13 = vsel %vm2973_vm4, %v1553_v8, %v1557_v18  ;;  %v1143_v29 = vshrl.u32 %v3212_v53, 16  ;;  %v1700_v58 = vsel %vm505_vm0, %v2253_v14, 0 }
  0x52   : > { %v2243_v28 = vcombine.low %v1548_v30, %v1558_v13  ;;  %v1135_v23 = vrot.slane %v1133_v0, 5 }
  0x53   : > { %2486 = vmatmul.mubr.msk.bf16.gmra.mrb[12].mxu0 %vm480_vm3, %v3291_v12  ;;  %v1145_v48 = vrot.slane %v1143_v29, 4 }
  0x54   : > { %2406 = vmatmul.mubr.msk.bf16.gmra.mrb[4].mxu1 %vm480_vm3, %v3298_v24  ;;  %2491 = vmatprep.mubr.msk.bf16.mxu0 %vm480_vm3, %v3265_v47 }
  0x55   : > { %2409 = vmatprep.mubr.msk.bf16.mxu1 %vm480_vm3, %v3302_v26 }
  0x5b   : > { %2492 = vmatmul.mubr.msk.bf16.vlgmr.msra.gmra.mrb[0].mxu0 %vm480_vm3, %v3298_v24 }
  0x5c   : > { %2410 = vmatmul.mubr.msk.bf16.gmra.mrb[8].mxu1 %vm480_vm3, %v3328_v62  ;;  %2508 = vmatpush3.bf16.msra.mxu0 %v1568_v20 }
  0x5d   : > { %2413 = vmatprep.mubr.msk.bf16.mxu1 %vm480_vm3, %v3334_v4  ;;  %2495 = vmatprep.mubr.msk.bf16.mxu0 %vm480_vm3, %v3302_v26 }
  0x5e   : > { %2682 = vmatprep.subr.msk.bf16.mxu0 %vm505_vm0, %v2253_v14 }
  0x63   : > { %2496 = vmatmul.mubr.msk.bf16.gmra.mrb[4].mxu0 %vm480_vm3, %v3328_v62 }
  0x64   : > { %2414 = vmatmul.mubr.msk.bf16.gmra.mrb[12].mxu1 %vm480_vm3, %v2167_v51  ;;  %2499 = vmatprep.mubr.msk.bf16.mxu0 %vm480_vm3, %v3334_v4 }
  0x65   : > { %2419 = vmatprep.mubr.msk.bf16.mxu1 %vm480_vm3, %v2185_v22 }
  0x6b   : > { %2500 = vmatmul.mubr.msk.bf16.gmra.mrb[8].mxu0 %vm480_vm3, %v2167_v51 }
  0x6c   : > { %2420 = vmatmul.mubr.msk.bf16.vlgmr.msra.gmra.mrb[0].mxu1 %vm480_vm3, %v3105_v46  ;;  %2503 = vmatprep.mubr.msk.bf16.mxu0 %vm480_vm3, %v2202_v57  ;;  %v1130_v46 = vshrl.u32 %v3223_v5, 16  ;;  %v1149_v5 = vshll.u32 %v3234_v19, 16 }
  0x6d   : > { %2436 = vmatpush3.bf16.msra.mxu1 %v1014_v36  ;;  %2423 = vmatprep.mubr.msk.bf16.mxu1 %vm480_vm3, %v3136_v11 }
  0x6e   : > { %2678 = vmatprep.subr.msk.bf16.mxu1 %vm505_vm0, %v2901_v1  ;;  %v1139_v1 = vshll.u32 %v3212_v53, 16  ;;  %v1132_v34 = vrot.slane %v1130_v46, 4  ;;  %v1151_v49 = vrot.slane %v1149_v5, 5 }
  0x70   : > { %v1141_v16 = vrot.slane %v1139_v1, 5 }
  0x72   : > { %v1146_v53 = vor.u32 %v1145_v48, %v1141_v16 }
  0x73   : > { %2504 = vmatmul.mubr.msk.bf16.gmra.mrb[12].mxu0 %vm480_vm3, %v2233_v42 }
  0x74   : > { %2424 = vmatmul.mubr.msk.bf16.gmra.mrb[4].mxu1 %vm480_vm3, %v3174_v60  ;;  %2509 = vmatprep.mubr.msk.bf16.mxu0 %vm480_vm3, %v3049_v52  ;;  %v1136_v52 = vor.u32 %v1135_v23, %v1132_v34  ;;  %v1147_v37 = vrot.slane %v1146_v53, 4 }
  0x75   : > { %2427 = vmatprep.mubr.msk.bf16.mxu1 %vm480_vm3, %v3206_v44 }
  0x76   : > { %v1137_v32 = vrot.slane %v1136_v52, 4 }
  0x7b   : > { %2510 = vmatmul.mubr.msk.bf16.vlgmr.msra.gmra.mrb[0].mxu0 %vm480_vm3, %v3077_v25  ;;  %v1142_v25 = vsel %vm2973_vm4, %v1137_v32, %v1141_v16 }
  0x7c   : > { %2428 = vmatmul.mubr.msk.bf16.gmra.mrb[8].mxu1 %vm480_vm3, %v3216_v59  ;;  %2526 = vmatpush3.bf16.msra.mxu0 %v1700_v58 }
  0x7d   : > { %2431 = vmatprep.mubr.msk.bf16.mxu1 %vm480_vm3, %v3245_v27  ;;  %2513 = vmatprep.mubr.msk.bf16.mxu0 %vm480_vm3, %v3103_v43  ;;  %v1152_v43 = vsel %vm2973_vm4, %v1147_v37, %v1151_v49 }
  0x7e   : > { %v2212_v19 = vcombine.low %v1142_v25, %v1152_v43 }
  0x83   : > { %2514 = vmatmul.mubr.msk.bf16.gmra.mrb[4].mxu0 %vm480_vm3, %v3152_v40 }
  0x84   : > { %2432 = vmatmul.mubr.msk.bf16.gmra.mrb[12].mxu1 %vm480_vm3, %v3256_v35  ;;  %2517 = vmatprep.mubr.msk.bf16.mxu0 %vm480_vm3, %v3177_v10 }
  0x85   : > { %2437 = vmatprep.mubr.msk.bf16.mxu1 %vm480_vm3, %v3254_v9 }
  0x8b   : > { %2518 = vmatmul.mubr.msk.bf16.gmra.mrb[8].mxu0 %vm480_vm3, %v3214_v55 }
  0x8c   : > { %2438 = vmatmul.mubr.msk.bf16.vlgmr.msra.gmra.mrb[0].mxu1 %vm480_vm3, %v3265_v47  ;;  %2521 = vmatprep.mubr.msk.bf16.mxu0 %vm480_vm3, %v2212_v19  ;;  %v3452_v47 = vld [vmem:[%s3623_s3] ss:$0 sm:$0xff] }
  0x8d   : > { %2544 = vmatpush3.bf16.msra.mxu1 %v2909_v3  ;;  %2441 = vmatprep.mubr.msk.bf16.mxu1 %vm480_vm3, %v3298_v24 }
  0x93   : > { %2522 = vmatmul.mubr.msk.bf16.gmra.mrb[12].mxu0 %vm480_vm3, %v2243_v28 }
  0x94   : > { %2442 = vmatmul.mubr.msk.bf16.gmra.mrb[4].mxu1 %vm480_vm3, %v3302_v26  ;;  %2527 = vmatprep.mubr.msk.bf16.mxu0 %vm480_vm3, %v3136_v11 }
  0x95   : > { %2445 = vmatprep.mubr.msk.bf16.mxu1 %vm480_vm3, %v3328_v62 }
  0x9b   : > { %2528 = vmatmul.mubr.msk.bf16.vlgmr.msra.gmra.mrb[0].mxu0 %vm480_vm3, %v3174_v60 }
  0x9c   : > { %2446 = vmatmul.mubr.msk.bf16.gmra.mrb[8].mxu1 %vm480_vm3, %v3334_v4  ;;  %2531 = vmatprep.mubr.msk.bf16.mxu0 %vm480_vm3, %v3206_v44 }
  0x9d   : > { %2449 = vmatprep.mubr.msk.bf16.mxu1 %vm480_vm3, %v2167_v51 }
  0xa3   : > { %2532 = vmatmul.mubr.msk.bf16.gmra.mrb[4].mxu0 %vm480_vm3, %v3216_v59 }
  0xa4   : > { %2450 = vmatmul.mubr.msk.bf16.gmra.mrb[12].mxu1 %vm480_vm3, %v2202_v57  ;;  %2535 = vmatprep.mubr.msk.bf16.mxu0 %vm480_vm3, %v3245_v27 }
  0xa5   : > { %2463 = vmatprep.mubr.msk.bf16.mxu1 %vm480_vm3, %v3152_v40 }
  0xab   : > { %2536 = vmatmul.mubr.msk.bf16.gmra.mrb[8].mxu0 %vm480_vm3, %v3256_v35 }
  0xac   : > { %2464 = vmatmul.mubr.msk.bf16.vlgmr.msra.gmra.mrb[8].mxu1 %vm480_vm3, %v3177_v10  ;;  %2539 = vmatprep.mubr.msk.bf16.mxu0 %vm480_vm3, %v3291_v12 }
  0xad   : > { %2467 = vmatprep.mubr.msk.bf16.mxu1 %vm480_vm3, %v3214_v55  ;;  %v3447_v55 = vld [vmem:[%s3622_s2] ss:$0 sm:$0xff] }
  0xb3   : > { %2540 = vmatmul.mubr.msk.bf16.gmra.mrb[12].mxu0 %vm480_vm3, %v2254_v61 }
  0xb4   : > { %2468 = vmatmul.mubr.msk.bf16.gmra.mrb[12].mxu1 %vm480_vm3, %v2212_v19 }
 0x15f   : > { %v2439_v3 = vpop.f32.mrb[0].mxu1 }
 0x160   : > { %v1050_v33 = vpop.f32.mrb[1].mxu1 }
 0x161   : > { %v2440_v11 = vpop.f32.mrb[2].mxu1 }
 0x162   : > { %v1053_v40 = vpop.f32.mrb[3].mxu1 }
 0x167   : > { %v2443_v60 = vpop.f32.mrb[4].mxu1 }
 0x168   : > { %v1066_v44 = vpop.f32.mrb[5].mxu1 }
 0x169   : > { %v2444_v10 = vpop.f32.mrb[6].mxu1 }
 0x16a   : > { %v1069_v59 = vpop.f32.mrb[7].mxu1 }
 0x16e   : > { %v2529_v27 = vpop.f32.mrb[0].mxu0 }
 0x16f   : > { %v2545_v9 = vadd.f32 %v2529_v27, %v2439_v3  ;;  %v1736_v35 = vpop.f32.mrb[1].mxu0 }
 0x170   : > { %v2546_v6 = vadd.f32 %v1736_v35, %v1050_v33  ;;  %v2530_v17 = vpop.f32.mrb[2].mxu0 }
 0x171   : > { %v1824_v22 = vmul.f32 %v2545_v9, %v3447_v55  ;;  %v2547_v50 = vadd.f32 %v2530_v17, %v2440_v11  ;;  %v1739_v63 = vpop.f32.mrb[3].mxu0 }
 0x172   : > { %v1822_v54 = vmul.f32 %v2546_v6, %v3447_v55  ;;  %v2548_v12 = vadd.f32 %v1739_v63, %v1053_v40 }
 0x173   : > { %v3457_v45 = vadd.f32 %v3452_v47, %v1824_v22  ;;  %v1825_v15 = vmul.f32 %v2547_v50, %v3447_v55 }
 0x174   : > { %v3461_v39 = vadd.f32 %v3452_v47, %v1822_v54  ;;  %v1823_v2 = vmul.f32 %v2548_v12, %v3447_v55 }
 0x175   : > { %v1863_v21 = vsub.f32 0.0, %v3457_v45  ;;  %v3466_v38 = vadd.f32 %v3452_v47, %v1825_v15 }
 0x176   : > { %v1861_v24 = vsub.f32 0.0, %v3461_v39  ;;  %v3470_v26 = vadd.f32 %v3452_v47, %v1823_v2  ;;  %v2533_v18 = vpop.f32.mrb[4].mxu0 }
 0x177   : > { %v1881_v30 = vmul.f32 1.442695, %v1863_v21  ;;  %v1864_v31 = vsub.f32 0.0, %v3466_v38  ;;  %v2549_v7 = vadd.f32 %v2533_v18, %v2443_v60  ;;  %v1752_v41 = vpop.f32.mrb[5].mxu0 }
 0x178   : > { %v1877_v8 = vmul.f32 1.442695, %v1861_v24  ;;  %v1862_v56 = vsub.f32 0.0, %v3470_v26  ;;  %v2550_v61 = vadd.f32 %v1752_v41, %v1066_v44  ;;  %v2534_v13 = vpop.f32.mrb[6].mxu0 }
 0x179   : > { %2734 = vpow2.f32 %v1881_v30  ;;  %v1883_v28 = vmul.f32 1.442695, %v1864_v31  ;;  %v1828_v62 = vmul.f32 %v2549_v7, %v3447_v55  ;;  %v2551_v20 = vadd.f32 %v2534_v13, %v2444_v10  ;;  %v1755_v4 = vpop.f32.mrb[7].mxu0 }
 0x17a   : > { %2736 = vpow2.f32 %v1877_v8  ;;  %v1879_v14 = vmul.f32 1.442695, %v1862_v56  ;;  %v1826_v51 = vmul.f32 %v2550_v61, %v3447_v55  ;;  %v2552_v57 = vadd.f32 %v1755_v4, %v1069_v59 }
 0x17b   : > { %2738 = vpow2.f32 %v1883_v28  ;;  %v3477_v36 = vadd.f32 %v3452_v47, %v1828_v62  ;;  %v1829_v42 = vmul.f32 %v2551_v20, %v3447_v55 }
 0x17c   : > { %2740 = vpow2.f32 %v1879_v14  ;;  %v3481_v46 = vadd.f32 %v3452_v47, %v1826_v51  ;;  %v1827_v0 = vmul.f32 %v2552_v57, %v3447_v55 }
 0x17d   : > { %v1867_v1 = vsub.f32 0.0, %v3477_v36  ;;  %v3486_v29 = vadd.f32 %v3452_v47, %v1829_v42 }
 0x17e   : > { %v1865_v58 = vsub.f32 0.0, %v3481_v46  ;;  %v3491_v34 = vadd.f32 %v3452_v47, %v1827_v0  ;;  %v2537_v23 = vpop.f32.mrb[8].mxu0 }
 0x17f   : > { %v1889_v16 = vmul.f32 1.442695, %v1867_v1  ;;  %v1868_v48 = vsub.f32 0.0, %v3486_v29  ;;  %v2465_v52 = vpop.f32.mrb[8].mxu1  ;;  %v1768_v53 = vpop.f32.mrb[9].mxu0 }
 0x180   : > { %v1885_v5 = vmul.f32 1.442695, %v1865_v58  ;;  %v1866_v32 = vsub.f32 0.0, %v3491_v34  ;;  %v2553_v37 = vadd.f32 %v2537_v23, %v2465_v52  ;;  %v1230_v49 = vpop.f32.mrb[9].mxu1  ;;  %v2538_v25 = vpop.f32.mrb[10].mxu0 }
 0x181   : > { %2742 = vpow2.f32 %v1889_v16  ;;  %v1891_v43 = vmul.f32 1.442695, %v1868_v48  ;;  %v2554_v19 = vadd.f32 %v1768_v53, %v1230_v49  ;;  %v2466_v3 = vpop.f32.mrb[10].mxu1  ;;  %v1771_v33 = vpop.f32.mrb[11].mxu0 }
 0x182   : > { %2744 = vpow2.f32 %v1885_v5  ;;  %v1887_v11 = vmul.f32 1.442695, %v1866_v32  ;;  %v1832_v40 = vmul.f32 %v2553_v37, %v3447_v55  ;;  %v2555_v60 = vadd.f32 %v2538_v25, %v2466_v3  ;;  %v1233_v44 = vpop.f32.mrb[11].mxu1 }
 0x183   : > { %v2735_v10 = vpop.eup %2734  ;;  %2746 = vpow2.f32 %v1891_v43  ;;  %v1830_v59 = vmul.f32 %v2554_v19, %v3447_v55  ;;  %v2556_v27 = vadd.f32 %v1771_v33, %v1233_v44 }
 0x184   : > { %v2737_v9 = vpop.eup %2736  ;;  %v1911_v35 = vadd.f32 1.0, %v2735_v10  ;;  %2748 = vpow2.f32 %v1887_v11  ;;  %v3504_v6 = vadd.f32 %v3452_v47, %v1832_v40  ;;  %v1833_v17 = vmul.f32 %v2555_v60, %v3447_v55 }
 0x185   : > { %v2739_v22 = vpop.eup %2738  ;;  %v1909_v50 = vadd.f32 1.0, %v2737_v9  ;;  %v3514_v63 = vadd.f32 %v3452_v47, %v1830_v59  ;;  %v1831_v54 = vmul.f32 %v2556_v27, %v3447_v55 }
 0x186   : > { %v2741_v12 = vpop.eup %2740  ;;  %2750 = vrcp.f32 %v1911_v35  ;;  %v1912_v15 = vadd.f32 1.0, %v2739_v22  ;;  %v1871_v2 = vsub.f32 0.0, %v3504_v6  ;;  %v3519_v21 = vadd.f32 %v3452_v47, %v1833_v17  ;;  %v2541_v24 = vpop.f32.mrb[12].mxu0 }
 0x187   : > { %2752 = vrcp.f32 %v1909_v50  ;;  %v1910_v18 = vadd.f32 1.0, %v2741_v12  ;;  %v1869_v30 = vsub.f32 0.0, %v3514_v63  ;;  %v3523_v31 = vadd.f32 %v3452_v47, %v1831_v54  ;;  %v2469_v7 = vpop.f32.mrb[12].mxu1  ;;  %v1784_v41 = vpop.f32.mrb[13].mxu0 }
 0x188   : > { %2754 = vrcp.f32 %v1912_v15  ;;  %v1897_v8 = vmul.f32 1.442695, %v1871_v2  ;;  %v1872_v56 = vsub.f32 0.0, %v3519_v21  ;;  %v2557_v61 = vadd.f32 %v2541_v24, %v2469_v7  ;;  %v1246_v13 = vpop.f32.mrb[13].mxu1  ;;  %v2542_v28 = vpop.f32.mrb[14].mxu0 }
 0x189   : > { %2756 = vrcp.f32 %v1910_v18  ;;  %v1893_v62 = vmul.f32 1.442695, %v1869_v30  ;;  %v1870_v20 = vsub.f32 0.0, %v3523_v31  ;;  %v2558_v4 = vadd.f32 %v1784_v41, %v1246_v13  ;;  %v2470_v14 = vpop.f32.mrb[14].mxu1  ;;  %v1787_v51 = vpop.f32.mrb[15].mxu0 }
 0x18a   : > { %2758 = vpow2.f32 %v1897_v8  ;;  %v1899_v57 = vmul.f32 1.442695, %v1872_v56  ;;  %v1836_v42 = vmul.f32 %v2557_v61, %v3447_v55  ;;  %v2559_v0 = vadd.f32 %v2542_v28, %v2470_v14  ;;  %v1249_v1 = vpop.f32.mrb[15].mxu1 }
 0x18b   : > { %v2743_v58 = vpop.eup %2742  ;;  %2760 = vpow2.f32 %v1893_v62  ;;  %v1895_v23 = vmul.f32 1.442695, %v1870_v20  ;;  %v1834_v16 = vmul.f32 %v2558_v4, %v3447_v55  ;;  %v2560_v48 = vadd.f32 %v1787_v51, %v1249_v1 }
 0x18c   : > { %v2745_v52 = vpop.eup %2744  ;;  %v1915_v53 = vadd.f32 1.0, %v2743_v58  ;;  %2762 = vpow2.f32 %v1899_v57  ;;  %v3534_v5 = vadd.f32 %v3452_v47, %v1836_v42  ;;  %v1837_v32 = vmul.f32 %v2559_v0, %v3447_v55 }
 0x18d   : > { %v2747_v37 = vpop.eup %2746  ;;  %v1913_v49 = vadd.f32 1.0, %v2745_v52  ;;  %2764 = vpow2.f32 %v1895_v23  ;;  %v3538_v25 = vadd.f32 %v3452_v47, %v1834_v16  ;;  %v1835_v43 = vmul.f32 %v2560_v48, %v3447_v55 }
 0x18e   : > { %v2749_v19 = vpop.eup %2748  ;;  %2766 = vrcp.f32 %v1915_v53  ;;  %v1916_v3 = vadd.f32 1.0, %v2747_v37  ;;  %v1875_v33 = vsub.f32 0.0, %v3534_v5  ;;  %v3543_v11 = vadd.f32 %v3452_v47, %v1837_v32 }
 0x18f   : > { %2768 = vrcp.f32 %v1913_v49  ;;  %v1914_v40 = vadd.f32 1.0, %v2749_v19  ;;  %v1873_v60 = vsub.f32 0.0, %v3538_v25  ;;  %v3548_v44 = vadd.f32 %v3452_v47, %v1835_v43 }
 0x190   : > { %v2751_v10 = vpop.eup %2750  ;;  %2770 = vrcp.f32 %v1916_v3  ;;  %v1905_v59 = vmul.f32 1.442695, %v1875_v33  ;;  %v1876_v55 = vsub.f32 0.0, %v3543_v11 }
 0x191   : > { %v2753_v27 = vpop.eup %2752  ;;  %v1943_v9 = vmul.f32 %v2751_v10, %v3457_v45  ;;  %2772 = vrcp.f32 %v1914_v40  ;;  %v1901_v35 = vmul.f32 1.442695, %v1873_v60  ;;  %v1874_v17 = vsub.f32 0.0, %v3548_v44 }
 0x192   : > { %v2755_v22 = vpop.eup %2754  ;;  %v1941_v47 = vmul.f32 %v2753_v27, %v3461_v39  ;;  %2774 = vpow2.f32 %v1905_v59  ;;  %v1907_v50 = vmul.f32 1.442695, %v1876_v55 }
 0x193   : > { %v2757_v54 = vpop.eup %2756  ;;  %v2286_v12 = vpack.c.bf16 %v1943_v9, %v1943_v9  ;;  %v1944_v45 = vmul.f32 %v2755_v22, %v3466_v38  ;;  %2776 = vpow2.f32 %v1901_v35  ;;  %v1903_v15 = vmul.f32 1.442695, %v1874_v17 }
 0x194   : > { %v2759_v2 = vpop.eup %2758  ;;  %v2284_v24 = vpack.c.bf16 %v1941_v47, %v1941_v47  ;;  %v1942_v18 = vmul.f32 %v2757_v54, %v3470_v26  ;;  %2778 = vpow2.f32 %v1907_v50 }
 0x195   : > { %v2761_v30 = vpop.eup %2760  ;;  %2024 = vst.msk [vmem:[%s3556_s11 + $0x8] sm:$0xf] %vm2021_vm8, %v2286_v12  ;;  %v2287_v39 = vpack.c.bf16 %v1944_v45, %v1944_v45  ;;  %v1919_v7 = vadd.f32 1.0, %v2759_v2  ;;  %2780 = vpow2.f32 %v1903_v15 }
 0x196   : > { %v2763_v41 = vpop.eup %2762  ;;  %2022 = vst.msk [vmem:[%s3556_s11] sm:$0xf] %vm2021_vm8, %v2284_v24  ;;  %v2285_v8 = vpack.c.bf16 %v1942_v18, %v1942_v18  ;;  %v1917_v38 = vadd.f32 1.0, %v2761_v30 }
 0x197   : > { %v2765_v56 = vpop.eup %2764  ;;  %2025 = vst.msk [vmem:[%s3556_s11 + $0xc] sm:$0xf] %vm2021_vm8, %v2287_v39  ;;  %2782 = vrcp.f32 %v1919_v7  ;;  %v1920_v61 = vadd.f32 1.0, %v2763_v41 }
 0x198   : > { %v2767_v13 = vpop.eup %2766  ;;  %2023 = vst.msk [vmem:[%s3556_s11 + $0x4] sm:$0xf] %vm2021_vm8, %v2285_v8  ;;  %2784 = vrcp.f32 %v1917_v38  ;;  %v1918_v26 = vadd.f32 1.0, %v2765_v56 }
 0x199   : > { %v2769_v28 = vpop.eup %2768  ;;  %v1947_v62 = vmul.f32 %v2767_v13, %v3477_v36  ;;  %2786 = vrcp.f32 %v1920_v61 }
 0x19a   : > { %v2771_v20 = vpop.eup %2770  ;;  %v1945_v4 = vmul.f32 %v2769_v28, %v3481_v46  ;;  %2788 = vrcp.f32 %v1918_v26 }
 0x19b   : > { %v2773_v14 = vpop.eup %2772  ;;  %v2290_v51 = vpack.c.bf16 %v1947_v62, %v1947_v62  ;;  %v1948_v57 = vmul.f32 %v2771_v20, %v3486_v29 }
 0x19c   : > { %v2775_v42 = vpop.eup %2774  ;;  %v2288_v0 = vpack.c.bf16 %v1945_v4, %v1945_v4  ;;  %v1946_v1 = vmul.f32 %v2773_v14, %v3491_v34 }
 0x19d   : > { %v2777_v58 = vpop.eup %2776  ;;  %2028 = vst.msk [vmem:[%s3556_s11 + $0x18] sm:$0xf] %vm2021_vm8, %v2290_v51  ;;  %v2291_v36 = vpack.c.bf16 %v1948_v57, %v1948_v57  ;;  %v1923_v23 = vadd.f32 1.0, %v2775_v42 }
 0x19e   : > { %v2779_v16 = vpop.eup %2778  ;;  %2026 = vst.msk [vmem:[%s3556_s11 + $0x10] sm:$0xf] %vm2021_vm8, %v2288_v0  ;;  %v2289_v46 = vpack.c.bf16 %v1946_v1, %v1946_v1  ;;  %v1921_v48 = vadd.f32 1.0, %v2777_v58 }
 0x19f   : > { %v2781_v52 = vpop.eup %2780  ;;  %2029 = vst.msk [vmem:[%s3556_s11 + $0x1c] sm:$0xf] %vm2021_vm8, %v2291_v36  ;;  %2790 = vrcp.f32 %v1923_v23  ;;  %v1924_v29 = vadd.f32 1.0, %v2779_v16 }
 0x1a0   : > { %2027 = vst.msk [vmem:[%s3556_s11 + $0x14] sm:$0xf] %vm2021_vm8, %v2289_v46  ;;  %2792 = vrcp.f32 %v1921_v48  ;;  %v1922_v34 = vadd.f32 1.0, %v2781_v52 }
 0x1a1   : > { %v2783_v53 = vpop.eup %2782  ;;  %2794 = vrcp.f32 %v1924_v29 }
 0x1a2   : > { %v2785_v32 = vpop.eup %2784  ;;  %v1951_v37 = vmul.f32 %v2783_v53, %v3504_v6  ;;  %2796 = vrcp.f32 %v1922_v34 }
 0x1a3   : > { %v2787_v49 = vpop.eup %2786  ;;  %v1949_v43 = vmul.f32 %v2785_v32, %v3514_v63 }
 0x1a4   : > { %v2789_v19 = vpop.eup %2788  ;;  %v2294_v3 = vpack.c.bf16 %v1951_v37, %v1951_v37  ;;  %v1952_v33 = vmul.f32 %v2787_v49, %v3519_v21 }
 0x1a5   : > { %v2292_v40 = vpack.c.bf16 %v1949_v43, %v1949_v43  ;;  %v1950_v60 = vmul.f32 %v2789_v19, %v3523_v31 }
 0x1a6   : > { %2032 = vst.msk [vmem:[%s3556_s11 + $0x28] sm:$0xf] %vm2021_vm8, %v2294_v3  ;;  %v2295_v10 = vpack.c.bf16 %v1952_v33, %v1952_v33 }
 0x1a7   : > { %2030 = vst.msk [vmem:[%s3556_s11 + $0x20] sm:$0xf] %vm2021_vm8, %v2292_v40  ;;  %v2293_v59 = vpack.c.bf16 %v1950_v60, %v1950_v60 }
 0x1a8   : > { %2033 = vst.msk [vmem:[%s3556_s11 + $0x2c] sm:$0xf] %vm2021_vm8, %v2295_v10 }
 0x1a9   : > { %v2791_v6 = vpop.eup %2790  ;;  %2031 = vst.msk [vmem:[%s3556_s11 + $0x24] sm:$0xf] %vm2021_vm8, %v2293_v59 }
 0x1aa   : > { %v2793_v63 = vpop.eup %2792  ;;  %v1955_v21 = vmul.f32 %v2791_v6, %v3534_v5 }
 0x1ab   : > { %v2795_v55 = vpop.eup %2794  ;;  %v1953_v31 = vmul.f32 %v2793_v63, %v3538_v25 }
 0x1ac   : > { %v2797_v27 = vpop.eup %2796  ;;  %v2298_v9 = vpack.c.bf16 %v1955_v21, %v1955_v21  ;;  %v1956_v35 = vmul.f32 %v2795_v55, %v3543_v11 }
 0x1ad   : > { %v2296_v17 = vpack.c.bf16 %v1953_v31, %v1953_v31  ;;  %v1954_v22 = vmul.f32 %v2797_v27, %v3548_v44 }
 0x1ae   : > { %2036 = vst.msk [vmem:[%s3556_s11 + $0x38] sm:$0xf] %vm2021_vm8, %v2298_v9  ;;  %v2299_v47 = vpack.c.bf16 %v1956_v35, %v1956_v35 }
 0x1af   : > { %2034 = vst.msk [vmem:[%s3556_s11 + $0x30] sm:$0xf] %vm2021_vm8, %v2296_v17  ;;  %v2297_v50 = vpack.c.bf16 %v1954_v22, %v1954_v22 }
 0x1b0   : > { %2037 = vst.msk [vmem:[%s3556_s11 + $0x3c] sm:$0xf] %vm2021_vm8, %v2299_v47 }
 0x1b1   : > { %2035 = vst.msk [vmem:[%s3556_s11 + $0x34] sm:$0xf] %vm2021_vm8, %v2297_v50 }
 0x1b2 PF: > { %s14_s19 = sadd.s32 1, %s2836_s19   ;;  %s3630_s15 = smov %s2828_s17 }
 0x1b3   : > { %p11_p7 = scmp.ge.s32.totalorder %s14_s19, 6   ;;  %s3631_s16 = smov %s2832_s18 }
 0x1b4   : > { %s3632_s17 = smov %s3635_s20  ;;  %s3633_s18 = smov %s3639_s21 }
 0x1b5   :  { %13 = sbr.rel (!%p11_p7) target bundleno = 3 (0x3), region = 75 }

// kernel: c2f_forward.4
= control target key start
LH: loop header
LB: loop body
LE: loop exit
PB: predicated region body
PF: predicated region fallthrough
CT: control target
= control target key end

     0   :  { %vm351_vm0 = vcmask 1043456   ;;  %vm254_vm1 = vcmask 64512   ;;  %vm1426_vm2 = vcmask 27648   ;;  %s5645_s1 = inlined_call_operand.vmem [shape: bf16[8,4], index: 1, kind: input, shape index: {}]   ;;  %s5646_s2 = inlined_call_operand.vmem [shape: bf16[8,4], index: 2, kind: input, shape index: {}]   ;;  %s5647_s0 = inlined_call_operand.vmem [shape: bf16[512,8], index: 0, kind: input, shape index: {}]   ;;  %s5648_s3 = inlined_call_operand.vmem [shape: f32[1,4], index: 3, kind: input, shape index: {}]   ;;  %s5649_s5 = inlined_call_operand.vmem [shape: f32[1,4], index: 5, kind: input, shape index: {}]   ;;  %s5650_s4 = inlined_call_operand.vmem [shape: f32[1,4], index: 4, kind: input, shape index: {}]   ;;  %s5651_s6 = inlined_call_operand.vmem [shape: f32[1,4], index: 6, kind: input, shape index: {}]   ;;  %s5652_s7 = inlined_call_operand.vmem [shape: bf16[512,4], index: 7, kind: output, shape index: {0}]   ;;  %s5653_s8 = inlined_call_operand.vmem [shape: bf16[512,4], index: 8, kind: output, shape index: {1}]  }
   0x1   :  { %v93_v0 = vld [vmem:[%s5645_s1] sm:$0xf]  ;;  %v3195_v5 = vld [vmem:[%s5647_s0 + $0x8] sm:$0xff]   ;;  %v3196_v6 = vld [vmem:[%s5647_s0 + $0x10] sm:$0xff]  }
   0x2   :  { %v1491_v1 = vld [vmem:[%s5646_s2] sm:$0xf]  ;;  %3192 = vmatprep.subr.msk.bf16.mxu0 %vm351_vm0, %v93_v0  ;;  %v353_v2 = vsel %vm351_vm0, %v93_v0, 0  ;;  %v3197_v7 = vld [vmem:[%s5647_s0 + $0x18] sm:$0xff]   ;;  %v3199_v9 = vld [vmem:[%s5647_s0 + $0x28] sm:$0xff]  }
   0x3   :  { %3193 = vmatprep.subr.msk.bf16.mxu1 %vm351_vm0, %v1491_v1  ;;  %v1493_v3 = vsel %vm351_vm0, %v1491_v1, 0  ;;  %v3194_v4 = vld [vmem:[%s5647_s0] sm:$0xff]   ;;  %3061 = vmatpush3.bf16.msra.mxu0 %v353_v2  ;;  %v3200_v10 = vld [vmem:[%s5647_s0 + $0x30] sm:$0xff]   ;;  %v3201_v11 = vld [vmem:[%s5647_s0 + $0x38] sm:$0xff]  }
   0x4   :  { %3127 = vmatpush3.bf16.msra.mxu1 %v1493_v3  ;;  %3062 = vmatprep.mubr.msk.bf16.mxu0 %vm254_vm1, %v3194_v4  ;;  %v3198_v8 = vld [vmem:[%s5647_s0 + $0x20] sm:$0xff]   ;;  %v3203_v13 = vld [vmem:[%s5647_s0 + $0x48] sm:$0xff]   ;;  %v3204_v14 = vld [vmem:[%s5647_s0 + $0x50] sm:$0xff]  }
   0x5   :  { %3128 = vmatprep.mubr.msk.bf16.mxu1 %vm254_vm1, %v3194_v4  ;;  %v3202_v12 = vld [vmem:[%s5647_s0 + $0x40] sm:$0xff]   ;;  %v3205_v15 = vld [vmem:[%s5647_s0 + $0x58] sm:$0xff]   ;;  %v3207_v17 = vld [vmem:[%s5647_s0 + $0x68] sm:$0xff]  }
   0x6   :  { %3063 = vmatmul.mubr.msk.bf16.vlgmr.msra.gmra.mrb[0].mxu0 %vm254_vm1, %v3195_v5  ;;  %v3206_v16 = vld [vmem:[%s5647_s0 + $0x60] sm:$0xff]   ;;  %v3208_v18 = vld [vmem:[%s5647_s0 + $0x70] sm:$0xff]   ;;  %v3209_v19 = vld [vmem:[%s5647_s0 + $0x78] sm:$0xff]  }
   0x7   :  { %3129 = vmatmul.mubr.msk.bf16.vlgmr.msra.gmra.mrb[0].mxu1 %vm254_vm1, %v3195_v5  ;;  %3066 = vmatprep.mubr.msk.bf16.mxu0 %vm254_vm1, %v3196_v6  ;;  %v3210_v20 = vld [vmem:[%s5647_s0 + $0x80] sm:$0xff]   ;;  %v3211_v21 = vld [vmem:[%s5647_s0 + $0x88] sm:$0xff]   ;;  %v3212_v22 = vld [vmem:[%s5647_s0 + $0x90] sm:$0xff]  }
   0x8   :  { %3132 = vmatprep.mubr.msk.bf16.mxu1 %vm254_vm1, %v3196_v6  ;;  %v3213_v23 = vld [vmem:[%s5647_s0 + $0x98] sm:$0xff]   ;;  %v3214_v24 = vld [vmem:[%s5647_s0 + $0xa0] sm:$0xff]   ;;  %v3215_v25 = vld [vmem:[%s5647_s0 + $0xa8] sm:$0xff]  }
   0x9   :  { %v3216_v26 = vld [vmem:[%s5647_s0 + $0xb0] sm:$0xff]   ;;  %v3217_v27 = vld [vmem:[%s5647_s0 + $0xb8] sm:$0xff]   ;;  %v3218_v28 = vld [vmem:[%s5647_s0 + $0xc0] sm:$0xff]  }
   0xa   :  { %v3219_v29 = vld [vmem:[%s5647_s0 + $0xc8] sm:$0xff]   ;;  %v3220_v30 = vld [vmem:[%s5647_s0 + $0xd0] sm:$0xff]   ;;  %v3221_v31 = vld [vmem:[%s5647_s0 + $0xd8] sm:$0xff]  }
   0xb   :  { %v3222_v32 = vld [vmem:[%s5647_s0 + $0xe0] sm:$0xff]   ;;  %v3223_v33 = vld [vmem:[%s5647_s0 + $0xe8] sm:$0xff]   ;;  %v3224_v34 = vld [vmem:[%s5647_s0 + $0xf0] sm:$0xff]  }
   0xc   :  { %v3225_v35 = vld [vmem:[%s5647_s0 + $0xf8] sm:$0xff]   ;;  %v3960_v36 = vld [vmem:[%s5648_s3] ss:$0 sm:$0xff] }
   0xd   :  { %v3965_v37 = vld [vmem:[%s5649_s5] ss:$0 sm:$0xff] }
   0xe   :  { %3067 = vmatmul.mubr.msk.bf16.gmra.mrb[4].mxu0 %vm254_vm1, %v3197_v7  ;;  %v3970_v39 = vld [vmem:[%s5650_s4] ss:$0 sm:$0xff] }
   0xf   :  { %3133 = vmatmul.mubr.msk.bf16.gmra.mrb[4].mxu1 %vm254_vm1, %v3197_v7  ;;  %3070 = vmatprep.mubr.msk.bf16.mxu0 %vm254_vm1, %v3198_v8  ;;  %v3975_v41 = vld [vmem:[%s5651_s6] ss:$0 sm:$0xff] }
  0x10   :  { %3136 = vmatprep.mubr.msk.bf16.mxu1 %vm254_vm1, %v3198_v8 }
  0x16   :  { %3071 = vmatmul.mubr.msk.bf16.gmra.mrb[8].mxu0 %vm254_vm1, %v3199_v9 }
  0x17   :  { %3137 = vmatmul.mubr.msk.bf16.gmra.mrb[8].mxu1 %vm254_vm1, %v3199_v9  ;;  %3074 = vmatprep.mubr.msk.bf16.mxu0 %vm254_vm1, %v3200_v10 }
  0x18   :  { %3140 = vmatprep.mubr.msk.bf16.mxu1 %vm254_vm1, %v3200_v10 }
  0x1e   :  { %3075 = vmatmul.mubr.msk.bf16.gmra.mrb[12].mxu0 %vm254_vm1, %v3201_v11 }
  0x1f   :  { %3141 = vmatmul.mubr.msk.bf16.gmra.mrb[12].mxu1 %vm254_vm1, %v3201_v11  ;;  %3078 = vmatprep.mubr.msk.bf16.mxu0 %vm254_vm1, %v3202_v12 }
  0x20   :  { %3144 = vmatprep.mubr.msk.bf16.mxu1 %vm254_vm1, %v3202_v12 }
  0x26   :  { %3079 = vmatmul.mubr.msk.bf16.gmra.mrb[16].mxu0 %vm254_vm1, %v3203_v13 }
  0x27   :  { %3145 = vmatmul.mubr.msk.bf16.gmra.mrb[16].mxu1 %vm254_vm1, %v3203_v13  ;;  %3082 = vmatprep.mubr.msk.bf16.mxu0 %vm254_vm1, %v3204_v14 }
  0x28   :  { %3148 = vmatprep.mubr.msk.bf16.mxu1 %vm254_vm1, %v3204_v14 }
  0x2e   :  { %3083 = vmatmul.mubr.msk.bf16.gmra.mrb[20].mxu0 %vm254_vm1, %v3205_v15 }
  0x2f   :  { %3149 = vmatmul.mubr.msk.bf16.gmra.mrb[20].mxu1 %vm254_vm1, %v3205_v15  ;;  %3086 = vmatprep.mubr.msk.bf16.mxu0 %vm254_vm1, %v3206_v16 }
  0x30   :  { %3152 = vmatprep.mubr.msk.bf16.mxu1 %vm254_vm1, %v3206_v16 }
  0x36   :  { %3087 = vmatmul.mubr.msk.bf16.gmra.mrb[24].mxu0 %vm254_vm1, %v3207_v17 }
  0x37   :  { %3153 = vmatmul.mubr.msk.bf16.gmra.mrb[24].mxu1 %vm254_vm1, %v3207_v17  ;;  %3090 = vmatprep.mubr.msk.bf16.mxu0 %vm254_vm1, %v3208_v18 }
  0x38   :  { %3156 = vmatprep.mubr.msk.bf16.mxu1 %vm254_vm1, %v3208_v18 }
  0x3e   :  { %3091 = vmatmul.mubr.msk.bf16.gmra.mrb[28].mxu0 %vm254_vm1, %v3209_v19 }
  0x3f   :  { %3157 = vmatmul.mubr.msk.bf16.gmra.mrb[28].mxu1 %vm254_vm1, %v3209_v19  ;;  %3094 = vmatprep.mubr.msk.bf16.mxu0 %vm254_vm1, %v3210_v20 }
  0x40   :  { %3160 = vmatprep.mubr.msk.bf16.mxu1 %vm254_vm1, %v3210_v20 }
  0x46   :  { %3095 = vmatmul.mubr.msk.bf16.gmra.mrb[32].mxu0 %vm254_vm1, %v3211_v21 }
  0x47   :  { %3161 = vmatmul.mubr.msk.bf16.gmra.mrb[32].mxu1 %vm254_vm1, %v3211_v21  ;;  %3098 = vmatprep.mubr.msk.bf16.mxu0 %vm254_vm1, %v3212_v22 }
  0x48   :  { %3164 = vmatprep.mubr.msk.bf16.mxu1 %vm254_vm1, %v3212_v22 }
  0x4e   :  { %3099 = vmatmul.mubr.msk.bf16.gmra.mrb[36].mxu0 %vm254_vm1, %v3213_v23 }
  0x4f   :  { %3165 = vmatmul.mubr.msk.bf16.gmra.mrb[36].mxu1 %vm254_vm1, %v3213_v23  ;;  %3102 = vmatprep.mubr.msk.bf16.mxu0 %vm254_vm1, %v3214_v24 }
  0x50   :  { %3168 = vmatprep.mubr.msk.bf16.mxu1 %vm254_vm1, %v3214_v24 }
  0x56   :  { %3103 = vmatmul.mubr.msk.bf16.gmra.mrb[40].mxu0 %vm254_vm1, %v3215_v25 }
  0x57   :  { %3169 = vmatmul.mubr.msk.bf16.gmra.mrb[40].mxu1 %vm254_vm1, %v3215_v25  ;;  %3106 = vmatprep.mubr.msk.bf16.mxu0 %vm254_vm1, %v3216_v26 }
  0x58   :  { %3172 = vmatprep.mubr.msk.bf16.mxu1 %vm254_vm1, %v3216_v26 }
  0x5e   :  { %3107 = vmatmul.mubr.msk.bf16.gmra.mrb[44].mxu0 %vm254_vm1, %v3217_v27 }
  0x5f   :  { %3173 = vmatmul.mubr.msk.bf16.gmra.mrb[44].mxu1 %vm254_vm1, %v3217_v27  ;;  %3110 = vmatprep.mubr.msk.bf16.mxu0 %vm254_vm1, %v3218_v28 }
  0x60   :  { %3176 = vmatprep.mubr.msk.bf16.mxu1 %vm254_vm1, %v3218_v28 }
  0x66   :  { %3111 = vmatmul.mubr.msk.bf16.gmra.mrb[48].mxu0 %vm254_vm1, %v3219_v29 }
  0x67   :  { %3177 = vmatmul.mubr.msk.bf16.gmra.mrb[48].mxu1 %vm254_vm1, %v3219_v29  ;;  %3114 = vmatprep.mubr.msk.bf16.mxu0 %vm254_vm1, %v3220_v30 }
  0x68   :  { %3180 = vmatprep.mubr.msk.bf16.mxu1 %vm254_vm1, %v3220_v30 }
  0x6e   :  { %3115 = vmatmul.mubr.msk.bf16.gmra.mrb[52].mxu0 %vm254_vm1, %v3221_v31 }
  0x6f   :  { %3181 = vmatmul.mubr.msk.bf16.gmra.mrb[52].mxu1 %vm254_vm1, %v3221_v31  ;;  %3118 = vmatprep.mubr.msk.bf16.mxu0 %vm254_vm1, %v3222_v32 }
  0x70   :  { %3184 = vmatprep.mubr.msk.bf16.mxu1 %vm254_vm1, %v3222_v32 }
  0x76   :  { %3119 = vmatmul.mubr.msk.bf16.gmra.mrb[56].mxu0 %vm254_vm1, %v3223_v33 }
  0x77   :  { %3185 = vmatmul.mubr.msk.bf16.gmra.mrb[56].mxu1 %vm254_vm1, %v3223_v33  ;;  %3122 = vmatprep.mubr.msk.bf16.mxu0 %vm254_vm1, %v3224_v34 }
  0x78   :  { %3188 = vmatprep.mubr.msk.bf16.mxu1 %vm254_vm1, %v3224_v34 }
  0x7e   :  { %3123 = vmatmul.mubr.msk.bf16.gmra.mrb[60].mxu0 %vm254_vm1, %v3225_v35 }
  0x7f   :  { %3189 = vmatmul.mubr.msk.bf16.gmra.mrb[60].mxu1 %vm254_vm1, %v3225_v35 }
  0xd9   :  { %v3064_v38 = vpop.f32.mrb[0].mxu0 }
  0xda   :  { %v3130_v40 = vpop.f32.mrb[0].mxu1  ;;  %v653_v42 = vmul.f32 %v3064_v38, %v3960_v36  ;;  %v389_v44 = vpop.f32.mrb[1].mxu0 }
  0xdb   :  { %v1793_v43 = vmul.f32 %v3130_v40, %v3965_v37  ;;  %v1529_v45 = vpop.f32.mrb[1].mxu1  ;;  %v651_v46 = vmul.f32 %v3960_v36, %v389_v44  ;;  %v3065_v48 = vpop.f32.mrb[2].mxu0 }
  0xdc   :  { %v1791_v47 = vmul.f32 %v3965_v37, %v1529_v45  ;;  %v3131_v49 = vpop.f32.mrb[2].mxu1  ;;  %v3982_v50 = vadd.f32 %v3970_v39, %v653_v42  ;;  %v654_v52 = vmul.f32 %v3065_v48, %v3960_v36  ;;  %v392_v54 = vpop.f32.mrb[3].mxu0 }
  0xdd   :  { %v3985_v51 = vadd.f32 %v3975_v41, %v1793_v43  ;;  %v1794_v53 = vmul.f32 %v3131_v49, %v3965_v37  ;;  %v1532_v55 = vpop.f32.mrb[3].mxu1  ;;  %v3990_v56 = vadd.f32 %v3970_v39, %v651_v46  ;;  %v652_v58 = vmul.f32 %v3960_v36, %v392_v54 }
  0xde   :  { %v3993_v57 = vadd.f32 %v3975_v41, %v1791_v47  ;;  %v1792_v59 = vmul.f32 %v3965_v37, %v1532_v55  ;;  %v788_v60 = vsub.f32 0.0, %v3982_v50  ;;  %v4000_v62 = vadd.f32 %v3970_v39, %v654_v52 }
  0xdf   :  { %v1928_v61 = vsub.f32 0.0, %v3985_v51  ;;  %v4003_v63 = vadd.f32 %v3975_v41, %v1794_v53  ;;  %v786_v0 = vsub.f32 0.0, %v3990_v56  ;;  %v4008_v2 = vadd.f32 %v3970_v39, %v652_v58 }
  0xe0   :  { %v1926_v1 = vsub.f32 0.0, %v3993_v57  ;;  %v4011_v3 = vadd.f32 %v3975_v41, %v1792_v59  ;;  %v854_v4 = vmul.f32 1.442695, %v788_v60  ;;  %v789_v6 = vsub.f32 0.0, %v4000_v62 }
  0xe1   :  { %v1994_v5 = vmul.f32 1.442695, %v1928_v61  ;;  %v1929_v7 = vsub.f32 0.0, %v4003_v63  ;;  %v850_v8 = vmul.f32 1.442695, %v786_v0  ;;  %v787_v10 = vsub.f32 0.0, %v4008_v2 }
  0xe2   :  { %v1990_v9 = vmul.f32 1.442695, %v1926_v1  ;;  %v1927_v11 = vsub.f32 0.0, %v4011_v3  ;;  %3226 = vpow2.f32 %v854_v4  ;;  %v856_v12 = vmul.f32 1.442695, %v789_v6  ;;  %v3068_v14 = vpop.f32.mrb[4].mxu0 }
  0xe3   :  { %v1996_v13 = vmul.f32 1.442695, %v1929_v7  ;;  %v3134_v15 = vpop.f32.mrb[4].mxu1  ;;  %3228 = vpow2.f32 %v1994_v5  ;;  %v852_v16 = vmul.f32 1.442695, %v787_v10  ;;  %v657_v18 = vmul.f32 %v3068_v14, %v3960_v36  ;;  %v405_v19 = vpop.f32.mrb[5].mxu0 }
  0xe4   :  { %v1992_v17 = vmul.f32 1.442695, %v1927_v11  ;;  %v1545_v20 = vpop.f32.mrb[5].mxu1  ;;  %3230 = vpow2.f32 %v850_v8  ;;  %v1797_v21 = vmul.f32 %v3134_v15, %v3965_v37  ;;  %v655_v22 = vmul.f32 %v3960_v36, %v405_v19  ;;  %v3069_v24 = vpop.f32.mrb[6].mxu0 }
  0xe5   :  { %v1795_v23 = vmul.f32 %v3965_v37, %v1545_v20  ;;  %v3135_v25 = vpop.f32.mrb[6].mxu1  ;;  %3232 = vpow2.f32 %v1990_v9  ;;  %v4022_v26 = vadd.f32 %v3970_v39, %v657_v18  ;;  %v658_v27 = vmul.f32 %v3069_v24, %v3960_v36  ;;  %v408_v29 = vpop.f32.mrb[7].mxu0 }
  0xe6   :  { %v1798_v28 = vmul.f32 %v3135_v25, %v3965_v37  ;;  %v1548_v30 = vpop.f32.mrb[7].mxu1  ;;  %3234 = vpow2.f32 %v856_v12  ;;  %v4027_v31 = vadd.f32 %v3975_v41, %v1797_v21  ;;  %v4030_v32 = vadd.f32 %v3970_v39, %v655_v22 }
  0xe7   :  { %v4033_v33 = vadd.f32 %v3975_v41, %v1795_v23  ;;  %3236 = vpow2.f32 %v1996_v13  ;;  %v792_v34 = vsub.f32 0.0, %v4022_v26  ;;  %v4037_v35 = vadd.f32 %v3970_v39, %v658_v27 }
  0xe8   :  { %v4040_v38 = vadd.f32 %v3975_v41, %v1798_v28  ;;  %3238 = vpow2.f32 %v852_v16  ;;  %v1932_v40 = vsub.f32 0.0, %v4027_v31  ;;  %v790_v42 = vsub.f32 0.0, %v4030_v32 }
  0xe9   :  { %v1930_v43 = vsub.f32 0.0, %v4033_v33  ;;  %3240 = vpow2.f32 %v1992_v17  ;;  %v862_v44 = vmul.f32 1.442695, %v792_v34  ;;  %v793_v45 = vsub.f32 0.0, %v4037_v35  ;;  %v3072_v47 = vpop.f32.mrb[8].mxu0 }
  0xea   :  { %v1933_v46 = vsub.f32 0.0, %v4040_v38  ;;  %v3138_v48 = vpop.f32.mrb[8].mxu1  ;;  %v2002_v49 = vmul.f32 1.442695, %v1932_v40  ;;  %v858_v52 = vmul.f32 1.442695, %v790_v42  ;;  %v656_v54 = vmul.f32 %v3960_v36, %v408_v29 }
  0xeb   :  { %v1998_v53 = vmul.f32 1.442695, %v1930_v43  ;;  %3242 = vpow2.f32 %v862_v44  ;;  %v4048_v55 = vmul.f32 1.442695, %v793_v45  ;;  %v1796_v59 = vmul.f32 %v3965_v37, %v1548_v30  ;;  %v421_v60 = vpop.f32.mrb[9].mxu0  ;;  %v1561_v61 = vpop.f32.mrb[9].mxu1 }
  0xec   :  { %v4050_v58 = vmul.f32 1.442695, %v1933_v46  ;;  %v3227_v0 = vpop.eup %3226  ;;  %3244 = vpow2.f32 %v2002_v49  ;;  %v4054_v1 = vadd.f32 %v3970_v39, %v656_v54  ;;  %v661_v4 = vmul.f32 %v3072_v47, %v3960_v36  ;;  %v3073_v6 = vpop.f32.mrb[10].mxu0 }
  0xed   :  { %v1801_v5 = vmul.f32 %v3138_v48, %v3965_v37  ;;  %v3139_v7 = vpop.f32.mrb[10].mxu1  ;;  %v3229_v8 = vpop.eup %3228  ;;  %v980_v9 = vadd.f32 1.0, %v3227_v0  ;;  %3246 = vpow2.f32 %v858_v52  ;;  %v4059_v10 = vadd.f32 %v3975_v41, %v1796_v59 }
  0xee   :  { %v659_v11 = vmul.f32 %v3960_v36, %v421_v60  ;;  %v424_v12 = vpop.f32.mrb[11].mxu0  ;;  %v4062_v13 = vpop.f32.mrb[11].mxu1  ;;  %v2120_v15 = vadd.f32 1.0, %v3229_v8  ;;  %3248 = vpow2.f32 %v1998_v53  ;;  %v791_v16 = vsub.f32 0.0, %v4054_v1 }
  0xef   :  { %v3231_v14 = vpop.eup %3230  ;;  %v4066_v17 = vadd.f32 %v3970_v39, %v661_v4  ;;  %3250 = vrcp.f32 %v980_v9  ;;  %v1931_v20 = vsub.f32 0.0, %v4059_v10  ;;  %v4070_v21 = vadd.f32 %v3975_v41, %v1801_v5 }
  0xf0   :  { %v3233_v18 = vpop.eup %3232  ;;  %v978_v19 = vadd.f32 1.0, %v3231_v14  ;;  %3252 = vrcp.f32 %v2120_v15  ;;  %v4072_v24 = vmul.f32 1.442695, %v791_v16  ;;  %v4085_v45 = vadd.f32 %v3970_v39, %v659_v11 }
  0xf1   :  { %v3235_v22 = vpop.eup %3234  ;;  %v2118_v23 = vadd.f32 1.0, %v3233_v18  ;;  %v796_v25 = vsub.f32 0.0, %v4066_v17  ;;  %v4075_v29 = vmul.f32 1.442695, %v1931_v20  ;;  %v1936_v30 = vsub.f32 0.0, %v4070_v21  ;;  %v4078_v34 = vpop.f32.mrb[12].mxu0 }
  0xf2   :  { %v3237_v27 = vpop.eup %3236  ;;  %3254 = vrcp.f32 %v978_v19  ;;  %v981_v28 = vadd.f32 1.0, %v3235_v22  ;;  %v4080_v40 = vpop.f32.mrb[12].mxu1  ;;  %v1799_v53 = vmul.f32 %v3965_v37, %v1561_v61  ;;  %v794_v0 = vsub.f32 0.0, %v4085_v45 }
  0xf3   :  { %v3239_v42 = vpop.eup %3238  ;;  %3256 = vrcp.f32 %v2118_v23  ;;  %v2121_v43 = vadd.f32 1.0, %v3237_v27  ;;  %v4082_v44 = vmul.f32 1.442695, %v796_v25  ;;  %v4087_v46 = vpop.f32.mrb[13].mxu0  ;;  %v4091_v52 = vmul.f32 1.442695, %v1936_v30 }
  0xf4   :  { %v4089_v47 = vpop.f32.mrb[13].mxu1  ;;  %v3241_v48 = vpop.eup %3240  ;;  %3258 = vrcp.f32 %v981_v28  ;;  %v979_v49 = vadd.f32 1.0, %v3239_v42  ;;  %v662_v4 = vmul.f32 %v3073_v6, %v3960_v36  ;;  %v4105_v11 = vadd.f32 %v3975_v41, %v1799_v53 }
  0xf5   :  { %v4094_v54 = vpop.f32.mrb[14].mxu0  ;;  %v4096_v59 = vpop.f32.mrb[14].mxu1  ;;  %3260 = vrcp.f32 %v2121_v43  ;;  %v2119_v60 = vadd.f32 1.0, %v3241_v48  ;;  %v1802_v61 = vmul.f32 %v3139_v7, %v3965_v37  ;;  %v660_v14 = vmul.f32 %v3960_v36, %v424_v12 }
  0xf6   :  { %v4100_v5 = vpop.f32.mrb[15].mxu0  ;;  %v4102_v8 = vpop.f32.mrb[15].mxu1  ;;  %3262 = vrcp.f32 %v979_v49  ;;  %v4109_v18 = vmul.f32 1.442695, %v794_v0  ;;  %v4112_v6 = vadd.f32 %v3970_v39, %v662_v4  ;;  %v1934_v22 = vsub.f32 0.0, %v4105_v11 }
  0xf7   :  { %v3243_v9 = vpop.eup %3242  ;;  %3264 = vrcp.f32 %v2119_v60  ;;  %v4117_v23 = vadd.f32 %v3975_v41, %v1802_v61  ;;  %v4121_v27 = vadd.f32 %v3970_v39, %v660_v14 }
  0xf8   :  { %v3245_v15 = vpop.eup %3244  ;;  %v984_v16 = vadd.f32 1.0, %v3243_v9  ;;  %3266 = vpow2.f32 %v4048_v55  ;;  %v797_v25 = vsub.f32 0.0, %v4112_v6  ;;  %v2006_v42 = vmul.f32 1.442695, %v1934_v22 }
  0xf9   :  { %v3247_v19 = vpop.eup %3246  ;;  %v2124_v20 = vadd.f32 1.0, %v3245_v15  ;;  %v1937_v43 = vsub.f32 0.0, %v4117_v23  ;;  %v4124_v55 = vpop.f32.mrb[16].mxu0  ;;  %v795_v0 = vsub.f32 0.0, %v4121_v27 }
  0xfa   :  { %v3249_v7 = vpop.eup %3248  ;;  %3268 = vrcp.f32 %v984_v16  ;;  %v982_v12 = vadd.f32 1.0, %v3247_v19  ;;  %v4126_v48 = vpop.f32.mrb[16].mxu1  ;;  %v4129_v60 = vmul.f32 1.442695, %v797_v25  ;;  %v1800_v16 = vmul.f32 %v3965_v37, %v4062_v13 }
  0xfb   :  { %v3251_v28 = vpop.eup %3250  ;;  %3270 = vrcp.f32 %v2124_v20  ;;  %v2122_v30 = vadd.f32 1.0, %v3249_v7  ;;  %v4132_v4 = vpop.f32.mrb[17].mxu0  ;;  %v4137_v15 = vmul.f32 1.442695, %v1937_v43 }
  0xfc   :  { %v3253_v49 = vpop.eup %3252  ;;  %v1108_v53 = vmul.f32 %v3251_v28, %v3982_v50  ;;  %3272 = vrcp.f32 %v982_v12  ;;  %v4134_v9 = vpop.f32.mrb[17].mxu1  ;;  %v4147_v12 = vmul.f32 1.442695, %v795_v0  ;;  %v4156_v43 = vadd.f32 %v3975_v41, %v1800_v16 }
  0xfd   :  { %v3255_v61 = vpop.eup %3254  ;;  %v2248_v14 = vmul.f32 %v3253_v49, %v3985_v51  ;;  %3274 = vrcp.f32 %v2122_v30  ;;  %v4141_v19 = vpop.f32.mrb[18].mxu0 }
  0xfe   :  { %v4143_v50 = vpop.f32.mrb[18].mxu1  ;;  %v3257_v20 = vpop.eup %3256  ;;  %v2868_v22 = vpack.c.bf16 %v1108_v53, %v1108_v53  ;;  %v1106_v7 = vmul.f32 %v3255_v61, %v3990_v56  ;;  %3276 = vpow2.f32 %v4050_v58  ;;  %v665_v53 = vmul.f32 %v4078_v34, %v3960_v36 }
  0xff   :  { %v4149_v25 = vpop.f32.mrb[19].mxu0  ;;  %v4151_v51 = vpop.f32.mrb[19].mxu1  ;;  %v2932_v30 = vpack.c.bf16 %v2248_v14, %v2248_v14  ;;  %v2246_v13 = vmul.f32 %v3257_v20, %v3993_v57  ;;  %3278 = vpow2.f32 %v4072_v24  ;;  %v1935_v61 = vsub.f32 0.0, %v4156_v43 }
 0x100   :  { %v3259_v28 = vpop.eup %3258  ;;  %1429 = vst.msk [vmem:[%s5652_s7 + $0x8] sm:$0xf] %vm1426_vm2, %v2868_v22  ;;  %v2866_v56 = vpack.c.bf16 %v1106_v7, %v1106_v7  ;;  %3280 = vpow2.f32 %v4075_v29  ;;  %v4180_v34 = vadd.f32 %v3970_v39, %v665_v53 }
 0x101   :  { %v3261_v49 = vpop.eup %3260  ;;  %v1109_v58 = vmul.f32 %v3259_v28, %v4000_v62  ;;  %2568 = vst.msk [vmem:[%s5653_s8 + $0x8] sm:$0xf] %vm1426_vm2, %v2932_v30  ;;  %v2930_v24 = vpack.c.bf16 %v2246_v13, %v2246_v13  ;;  %3282 = vpow2.f32 %v4082_v44  ;;  %v2008_v20 = vmul.f32 1.442695, %v1935_v61  ;;  %v4188_v22 = vpop.f32.mrb[20].mxu0 }
 0x102   :  { %v3263_v57 = vpop.eup %3262  ;;  %v2249_v0 = vmul.f32 %v3261_v49, %v4003_v63  ;;  %1427 = vst.msk [vmem:[%s5652_s7] sm:$0xf] %vm1426_vm2, %v2866_v56  ;;  %3284 = vpow2.f32 %v4091_v52  ;;  %v800_v30 = vsub.f32 0.0, %v4180_v34  ;;  %v4197_v13 = vpop.f32.mrb[21].mxu0 }
 0x103   :  { %v3265_v14 = vpop.eup %3264  ;;  %v2869_v62 = vpack.c.bf16 %v1109_v58, %v1109_v58  ;;  %v1107_v29 = vmul.f32 %v3263_v57, %v4008_v2  ;;  %2566 = vst.msk [vmem:[%s5653_s8] sm:$0xf] %vm1426_vm2, %v2930_v24  ;;  %3286 = vpow2.f32 %v4109_v18  ;;  %v4190_v2 = vpop.f32.mrb[20].mxu1 }
 0x104   :  { %v3267_v16 = vpop.eup %3266  ;;  %v2933_v63 = vpack.c.bf16 %v2249_v0, %v2249_v0  ;;  %v2247_v44 = vmul.f32 %v3265_v14, %v4011_v3  ;;  %3288 = vpow2.f32 %v2006_v42  ;;  %v4199_v3 = vpop.f32.mrb[21].mxu1  ;;  %v1805_v42 = vmul.f32 %v4080_v40, %v3965_v37 }
 0x105   :  { %v3269_v52 = vpop.eup %3268  ;;  %1430 = vst.msk [vmem:[%s5652_s7 + $0xc] sm:$0xf] %vm1426_vm2, %v2869_v62  ;;  %v2867_v7 = vpack.c.bf16 %v1107_v29, %v1107_v29  ;;  %v985_v28 = vadd.f32 1.0, %v3267_v16  ;;  %3290 = vpow2.f32 %v4129_v60  ;;  %v4209_v58 = vpop.f32.mrb[22].mxu0  ;;  %v878_v0 = vmul.f32 1.442695, %v800_v30 }
 0x106   :  { %v3271_v18 = vpop.eup %3270  ;;  %2569 = vst.msk [vmem:[%s5653_s8 + $0xc] sm:$0xf] %vm1426_vm2, %v2933_v63  ;;  %v2931_v49 = vpack.c.bf16 %v2247_v44, %v2247_v44  ;;  %v1112_v56 = vmul.f32 %v3269_v52, %v4022_v26  ;;  %v4211_v53 = vpop.f32.mrb[22].mxu1  ;;  %v663_v26 = vmul.f32 %v3960_v36, %v4087_v46 }
 0x107   :  { %v3273_v57 = vpop.eup %3272  ;;  %1428 = vst.msk [vmem:[%s5652_s7 + $0x4] sm:$0xf] %vm1426_vm2, %v2867_v7  ;;  %v2252_v24 = vmul.f32 %v3271_v18, %v4027_v31  ;;  %3292 = vrcp.f32 %v985_v28  ;;  %v4220_v60 = vpop.f32.mrb[23].mxu0  ;;  %v4231_v31 = vadd.f32 %v3975_v41, %v1805_v42 }
 0x108   :  { %v4222_v40 = vpop.f32.mrb[23].mxu1  ;;  %v3275_v61 = vpop.eup %3274  ;;  %2567 = vst.msk [vmem:[%s5653_s8 + $0x4] sm:$0xf] %vm1426_vm2, %v2931_v49  ;;  %v2872_v14 = vpack.c.bf16 %v1112_v56, %v1112_v56  ;;  %v1110_v62 = vmul.f32 %v3273_v57, %v4030_v32  ;;  %3294 = vpow2.f32 %v4137_v15  ;;  %v4236_v63 = vadd.f32 %v3970_v39, %v663_v26 }
 0x109   :  { %v3277_v29 = vpop.eup %3276  ;;  %v2936_v46 = vpack.c.bf16 %v2252_v24, %v2252_v24  ;;  %v2250_v16 = vmul.f32 %v3275_v61, %v4033_v33  ;;  %3296 = vpow2.f32 %v4147_v12  ;;  %v1940_v52 = vsub.f32 0.0, %v4231_v31  ;;  %v4254_v56 = vpop.f32.mrb[24].mxu0 }
 0x10a   :  { %v3279_v44 = vpop.eup %3278  ;;  %1433 = vst.msk [vmem:[%s5652_s7 + $0x18] sm:$0xf] %vm1426_vm2, %v2872_v14  ;;  %v2870_v32 = vpack.c.bf16 %v1110_v62, %v1110_v62  ;;  %v2125_v15 = vadd.f32 1.0, %v3277_v29  ;;  %3298 = vpow2.f32 %v2008_v20  ;;  %v798_v28 = vsub.f32 0.0, %v4236_v63  ;;  %v4256_v42 = vpop.f32.mrb[24].mxu1 }
 0x10b   :  { %v3281_v7 = vpop.eup %3280  ;;  %2572 = vst.msk [vmem:[%s5653_s8 + $0x18] sm:$0xf] %vm1426_vm2, %v2936_v46  ;;  %v2934_v33 = vpack.c.bf16 %v2250_v16, %v2250_v16  ;;  %v983_v12 = vadd.f32 1.0, %v3279_v44  ;;  %3300 = vpow2.f32 %v878_v0  ;;  %v2018_v18 = vmul.f32 1.442695, %v1940_v52  ;;  %v4266_v61 = vpop.f32.mrb[25].mxu0 }
 0x10c   :  { %v3283_v30 = vpop.eup %3282  ;;  %1431 = vst.msk [vmem:[%s5652_s7 + $0x10] sm:$0xf] %vm1426_vm2, %v2870_v32  ;;  %3302 = vrcp.f32 %v2125_v15  ;;  %v2123_v20 = vadd.f32 1.0, %v3281_v7  ;;  %v1803_v49 = vmul.f32 %v3965_v37, %v4089_v47  ;;  %v4262_v0 = vmul.f32 1.442695, %v798_v28  ;;  %v4268_v47 = vpop.f32.mrb[25].mxu1 }
 0x10d   :  { %v3285_v57 = vpop.eup %3284  ;;  %2570 = vst.msk [vmem:[%s5653_s8 + $0x10] sm:$0xf] %vm1426_vm2, %v2934_v33  ;;  %3304 = vrcp.f32 %v983_v12  ;;  %v988_v24 = vadd.f32 1.0, %v3283_v30  ;;  %v666_v26 = vmul.f32 %v4094_v54, %v3960_v36  ;;  %5654 = vst [vmem:[#allocation2_spill] sm:$0xff] %v4268_v47  ;;  %v1806_v46 = vmul.f32 %v4096_v59, %v3965_v37  ;;  %v4275_v16 = vpop.f32.mrb[26].mxu0 }
 0x10e   :  { %v3287_v14 = vpop.eup %3286  ;;  %3306 = vrcp.f32 %v2123_v20  ;;  %v2128_v62 = vadd.f32 1.0, %v3285_v57  ;;  %v4271_v29 = vadd.f32 %v3975_v41, %v1803_v49  ;;  %5655 = vst [vmem:[#allocation3_spill] sm:$0xff] %v4275_v16  ;;  %v4277_v44 = vpop.f32.mrb[26].mxu1  ;;  %v664_v52 = vmul.f32 %v3960_v36, %v4100_v5 }
 0x10f   :  { %5656 = vst [vmem:[#allocation4_spill] sm:$0xff] %v4277_v44  ;;  %v3289_v32 = vpop.eup %3288  ;;  %3308 = vrcp.f32 %v988_v24  ;;  %v986_v54 = vadd.f32 1.0, %v3287_v14  ;;  %v4280_v15 = vadd.f32 %v3970_v39, %v666_v26  ;;  %v4284_v7 = vpop.f32.mrb[27].mxu0  ;;  %v4290_v30 = vadd.f32 %v3975_v41, %v1806_v46 }
 0x110   :  { %5657 = vst [vmem:[#allocation5_spill] sm:$0xff] %v4284_v7  ;;  %v4286_v33 = vpop.f32.mrb[27].mxu1  ;;  %v3291_v12 = vpop.eup %3290  ;;  %3310 = vrcp.f32 %v2128_v62  ;;  %v2126_v59 = vadd.f32 1.0, %v3289_v32  ;;  %v1938_v28 = vsub.f32 0.0, %v4271_v29  ;;  %v4294_v24 = vadd.f32 %v3970_v39, %v664_v52 }
 0x111   :  { %5658 = vst [vmem:[#allocation6_spill] sm:$0xff] %v4286_v33  ;;  %v3293_v20 = vpop.eup %3292  ;;  %3312 = vrcp.f32 %v986_v54  ;;  %v989_v49 = vadd.f32 1.0, %v3291_v12  ;;  %v801_v57 = vsub.f32 0.0, %v4280_v15  ;;  %v1941_v62 = vsub.f32 0.0, %v4290_v30  ;;  %v4299_v52 = vpop.f32.mrb[28].mxu0 }
 0x112   :  { %v3295_v5 = vpop.eup %3294  ;;  %v1113_v26 = vmul.f32 %v3293_v20, %v4037_v35  ;;  %3314 = vrcp.f32 %v2126_v59  ;;  %v2014_v14 = vmul.f32 1.442695, %v1938_v28  ;;  %v799_v7 = vsub.f32 0.0, %v4294_v24  ;;  %v4301_v47 = vpop.f32.mrb[28].mxu1 }
 0x113   :  { %v3297_v32 = vpop.eup %3296  ;;  %3316 = vrcp.f32 %v989_v49  ;;  %v2129_v33 = vadd.f32 1.0, %v3295_v5  ;;  %v880_v46 = vmul.f32 1.442695, %v801_v57  ;;  %v2020_v16 = vmul.f32 1.442695, %v1941_v62  ;;  %v4305_v49 = vpop.f32.mrb[29].mxu0 }
 0x114   :  { %v3299_v54 = vpop.eup %3298  ;;  %v2873_v12 = vpack.c.bf16 %v1113_v26, %v1113_v26  ;;  %v987_v44 = vadd.f32 1.0, %v3297_v32  ;;  %3318 = vpow2.f32 %v2018_v18  ;;  %v876_v28 = vmul.f32 1.442695, %v799_v7  ;;  %v4307_v57 = vpop.f32.mrb[29].mxu1 }
 0x115   :  { %v3301_v35 = vpop.eup %3300  ;;  %3320 = vrcp.f32 %v2129_v33  ;;  %v2127_v59 = vadd.f32 1.0, %v3299_v54  ;;  %v1804_v20 = vmul.f32 %v3965_v37, %v4102_v8  ;;  %v669_v33 = vmul.f32 %v4124_v55, %v3960_v36  ;;  %v4317_v26 = vpop.f32.mrb[30].mxu0 }
 0x116   :  { %v3303_v5 = vpop.eup %3302  ;;  %1434 = vst.msk [vmem:[%s5652_s7 + $0x1c] sm:$0xf] %vm1426_vm2, %v2873_v12  ;;  %3322 = vrcp.f32 %v987_v44  ;;  %v992_v18 = vadd.f32 1.0, %v3301_v35  ;;  %v1809_v7 = vmul.f32 %v4126_v48, %v3965_v37  ;;  %5659 = vst [vmem:[#allocation7_spill] sm:$0xff] %v4317_v26  ;;  %v4319_v8 = vpop.f32.mrb[30].mxu1  ;;  %v667_v44 = vmul.f32 %v3960_v36, %v4132_v4 }
 0x117   :  { %5660 = vst [vmem:[#allocation8_spill] sm:$0xff] %v4319_v8  ;;  %v3305_v62 = vpop.eup %3304  ;;  %v2253_v32 = vmul.f32 %v3303_v5, %v4040_v38  ;;  %3324 = vrcp.f32 %v2127_v59  ;;  %v4323_v54 = vadd.f32 %v3975_v41, %v1804_v20  ;;  %v4327_v12 = vpop.f32.mrb[31].mxu0  ;;  %v4333_v8 = vadd.f32 %v3970_v39, %v669_v33 }
 0x118   :  { %5661 = vst [vmem:[#allocation9_spill] sm:$0xff] %v4327_v12  ;;  %v4329_v55 = vpop.f32.mrb[31].mxu1  ;;  %v3307_v35 = vpop.eup %3306  ;;  %v1111_v48 = vmul.f32 %v3305_v62, %v4054_v1  ;;  %3326 = vrcp.f32 %v992_v18  ;;  %v4336_v38 = vadd.f32 %v3975_v41, %v1809_v7 }
 0x119   :  { %5662 = vst [vmem:[#allocation10_spill] sm:$0xff] %v4329_v55  ;;  %v3309_v59 = vpop.eup %3308  ;;  %v2937_v20 = vpack.c.bf16 %v2253_v32, %v2253_v32  ;;  %v2251_v5 = vmul.f32 %v3307_v35, %v4059_v10  ;;  %3328 = vpow2.f32 %v4262_v0  ;;  %v1939_v4 = vsub.f32 0.0, %v4323_v54  ;;  %v4353_v32 = vpop.f32.mrb[32].mxu0 }
 0x11a   :  { %v3311_v12 = vpop.eup %3310  ;;  %v2871_v55 = vpack.c.bf16 %v1111_v48, %v1111_v48  ;;  %v1116_v26 = vmul.f32 %v3309_v59, %v4066_v17  ;;  %3330 = vpow2.f32 %v2014_v14  ;;  %v804_v1 = vsub.f32 0.0, %v4333_v8  ;;  %v4355_v35 = vpop.f32.mrb[32].mxu1 }
 0x11b   :  { %v3313_v18 = vpop.eup %3312  ;;  %2573 = vst.msk [vmem:[%s5653_s8 + $0x1c] sm:$0xf] %vm1426_vm2, %v2937_v20  ;;  %v2935_v33 = vpack.c.bf16 %v2251_v5, %v2251_v5  ;;  %v2256_v10 = vmul.f32 %v3311_v12, %v4070_v21  ;;  %3332 = vpow2.f32 %v880_v46  ;;  %v2016_v0 = vmul.f32 1.442695, %v1939_v4  ;;  %v4363_v12 = vpop.f32.mrb[33].mxu0 }
 0x11c   :  { %v3315_v7 = vpop.eup %3314  ;;  %1432 = vst.msk [vmem:[%s5652_s7 + $0x14] sm:$0xf] %vm1426_vm2, %v2871_v55  ;;  %v2876_v17 = vpack.c.bf16 %v1116_v26, %v1116_v26  ;;  %v1114_v14 = vmul.f32 %v3313_v18, %v4085_v45  ;;  %3334 = vpow2.f32 %v2020_v16  ;;  %v886_v62 = vmul.f32 1.442695, %v804_v1  ;;  %v4365_v45 = vpop.f32.mrb[33].mxu1 }
 0x11d   :  { %v3317_v48 = vpop.eup %3316  ;;  %2571 = vst.msk [vmem:[%s5653_s8 + $0x14] sm:$0xf] %vm1426_vm2, %v2935_v33  ;;  %v2940_v21 = vpack.c.bf16 %v2256_v10, %v2256_v10  ;;  %v2254_v46 = vmul.f32 %v3315_v7, %v4105_v11  ;;  %3336 = vpow2.f32 %v876_v28  ;;  %v1944_v26 = vsub.f32 0.0, %v4336_v38  ;;  %v4375_v11 = vpop.f32.mrb[34].mxu0 }
 0x11e   :  { %v3319_v16 = vpop.eup %3318  ;;  %1437 = vst.msk [vmem:[%s5652_s7 + $0x28] sm:$0xf] %vm1426_vm2, %v2876_v17  ;;  %v2874_v55 = vpack.c.bf16 %v1114_v14, %v1114_v14  ;;  %v1117_v59 = vmul.f32 %v3317_v48, %v4112_v6  ;;  %3338 = vpow2.f32 %v2016_v0  ;;  %v4373_v20 = vadd.f32 %v3970_v39, %v667_v44  ;;  %v4377_v28 = vpop.f32.mrb[34].mxu1 }
 0x11f   :  { %v3321_v5 = vpop.eup %3320  ;;  %2576 = vst.msk [vmem:[%s5653_s8 + $0x28] sm:$0xf] %vm1426_vm2, %v2940_v21  ;;  %v2938_v4 = vpack.c.bf16 %v2254_v46, %v2254_v46  ;;  %v2132_v1 = vadd.f32 1.0, %v3319_v16  ;;  %3340 = vpow2.f32 %v886_v62  ;;  %v2026_v18 = vmul.f32 1.442695, %v1944_v26  ;;  %v4383_v33 = vpop.f32.mrb[35].mxu0 }
 0x120   :  { %v4385_v6 = vpop.f32.mrb[35].mxu1  ;;  %v3323_v44 = vpop.eup %3322  ;;  %1435 = vst.msk [vmem:[%s5652_s7 + $0x20] sm:$0xf] %vm1426_vm2, %v2874_v55  ;;  %v2877_v10 = vpack.c.bf16 %v1117_v59, %v1117_v59  ;;  %v2257_v0 = vmul.f32 %v3321_v5, %v4117_v23  ;;  %v802_v7 = vsub.f32 0.0, %v4373_v20  ;;  %v1807_v17 = vmul.f32 %v3965_v37, %v4134_v9 }
 0x121   :  { %v3325_v14 = vpop.eup %3324  ;;  %2574 = vst.msk [vmem:[%s5653_s8 + $0x20] sm:$0xf] %vm1426_vm2, %v2938_v4  ;;  %v1115_v62 = vmul.f32 %v3323_v44, %v4121_v27  ;;  %3342 = vrcp.f32 %v2132_v1  ;;  %v670_v48 = vmul.f32 %v4141_v19, %v3960_v36  ;;  %v1810_v23 = vmul.f32 %v4143_v50, %v3965_v37  ;;  %v4423_v1 = vpop.f32.mrb[36].mxu0 }
 0x122   :  { %v3327_v21 = vpop.eup %3326  ;;  %1438 = vst.msk [vmem:[%s5652_s7 + $0x2c] sm:$0xf] %vm1426_vm2, %v2877_v10  ;;  %v2941_v9 = vpack.c.bf16 %v2257_v0, %v2257_v0  ;;  %v2255_v46 = vmul.f32 %v3325_v14, %v4156_v43  ;;  %3344 = vpow2.f32 %v2026_v18  ;;  %v882_v26 = vmul.f32 1.442695, %v802_v7 }
 0x123   :  { %v3329_v16 = vpop.eup %3328  ;;  %v2875_v27 = vpack.c.bf16 %v1115_v62, %v1115_v62  ;;  %v1120_v55 = vmul.f32 %v3327_v21, %v4180_v34  ;;  %v4411_v19 = vadd.f32 %v3975_v41, %v1807_v17  ;;  %v4414_v50 = vadd.f32 %v3970_v39, %v670_v48  ;;  %v4425_v34 = vpop.f32.mrb[36].mxu1 }
 0x124   :  { %v3331_v59 = vpop.eup %3330  ;;  %2577 = vst.msk [vmem:[%s5653_s8 + $0x2c] sm:$0xf] %vm1426_vm2, %v2941_v9  ;;  %v2939_v5 = vpack.c.bf16 %v2255_v46, %v2255_v46  ;;  %v990_v43 = vadd.f32 1.0, %v3329_v16  ;;  %3346 = vpow2.f32 %v882_v26  ;;  %v4421_v4 = vadd.f32 %v3975_v41, %v1810_v23  ;;  %v4433_v17 = vpop.f32.mrb[37].mxu0 }
 0x125   :  { %v3333_v18 = vpop.eup %3332  ;;  %1436 = vst.msk [vmem:[%s5652_s7 + $0x24] sm:$0xf] %vm1426_vm2, %v2875_v27  ;;  %v2880_v44 = vpack.c.bf16 %v1120_v55, %v1120_v55  ;;  %v2130_v10 = vadd.f32 1.0, %v3331_v59  ;;  %v1942_v0 = vsub.f32 0.0, %v4411_v19  ;;  %v805_v7 = vsub.f32 0.0, %v4414_v50  ;;  %v4435_v14 = vpop.f32.mrb[37].mxu1 }
 0x126   :  { %5663 = vst [vmem:[#allocation11_spill] sm:$0xff] %v4435_v14  ;;  %v3335_v62 = vpop.eup %3334  ;;  %2575 = vst.msk [vmem:[%s5653_s8 + $0x24] sm:$0xf] %vm1426_vm2, %v2939_v5  ;;  %3348 = vrcp.f32 %v990_v43  ;;  %v993_v48 = vadd.f32 1.0, %v3333_v18  ;;  %v1945_v23 = vsub.f32 0.0, %v4421_v4  ;;  %v668_v21 = vmul.f32 %v3960_v36, %v4149_v25  ;;  %v4444_v9 = vpop.f32.mrb[38].mxu0 }
 0x127   :  { %5664 = vst [vmem:[#allocation12_spill] sm:$0xff] %v4444_v9  ;;  %v4446_v46 = vpop.f32.mrb[38].mxu1  ;;  %v3337_v26 = vpop.eup %3336  ;;  %1441 = vst.msk [vmem:[%s5652_s7 + $0x38] sm:$0xf] %vm1426_vm2, %v2880_v44  ;;  %3350 = vrcp.f32 %v2130_v10  ;;  %v2133_v16 = vadd.f32 1.0, %v3335_v62  ;;  %v1808_v44 = vmul.f32 %v3965_v37, %v4151_v51  ;;  %v673_v10 = vmul.f32 %v4188_v22, %v3960_v36 }
 0x128   :  { %5665 = vst [vmem:[#allocation13_spill] sm:$0xff] %v4446_v46  ;;  %v2022_v27 = vmul.f32 1.442695, %v1942_v0  ;;  %v888_v55 = vmul.f32 1.442695, %v805_v7  ;;  %v4452_v59 = vpop.f32.mrb[39].mxu0  ;;  %v3339_v5 = vpop.eup %3338  ;;  %3352 = vrcp.f32 %v993_v48  ;;  %v4455_v18 = vadd.f32 %v3970_v39, %v668_v21 }
 0x129   :  { %v991_v43 = vadd.f32 1.0, %v3337_v26  ;;  %v2028_v25 = vmul.f32 1.442695, %v1945_v23  ;;  %v4457_v46 = vpop.f32.mrb[39].mxu1  ;;  %v3341_v9 = vpop.eup %3340  ;;  %3354 = vrcp.f32 %v2133_v16  ;;  %v2131_v14 = vadd.f32 1.0, %v3339_v5 }
 0x12a   :  { %v996_v0 = vadd.f32 1.0, %v3341_v9  ;;  %v803_v7 = vsub.f32 0.0, %v4455_v18  ;;  %v1813_v62 = vmul.f32 %v4190_v2, %v3965_v37  ;;  %v4467_v23 = vadd.f32 %v3975_v41, %v1808_v44  ;;  %v4478_v2 = vpop.f32.mrb[40].mxu0 }
 0x12b   :  { %3356 = vrcp.f32 %v991_v43  ;;  %v3343_v48 = vpop.eup %3342  ;;  %v4470_v21 = vadd.f32 %v3970_v39, %v673_v10  ;;  %v671_v51 = vmul.f32 %v3960_v36, %v4197_v13  ;;  %v4484_v10 = vpop.f32.mrb[41].mxu0 }
 0x12c   :  { %3358 = vrcp.f32 %v2131_v14  ;;  %v3345_v26 = vpop.eup %3344  ;;  %v2260_v22 = vmul.f32 %v3343_v48, %v4231_v31  ;;  %v884_v9 = vmul.f32 1.442695, %v803_v7  ;;  %v4476_v16 = vadd.f32 %v3975_v41, %v1813_v62  ;;  %v4480_v14 = vpop.f32.mrb[40].mxu1  ;;  %5667 = vst [vmem:[#allocation15_spill] sm:$0xff] %v4484_v10 }
 0x12d   :  { %3360 = vrcp.f32 %v996_v0  ;;  %5666 = vst [vmem:[#allocation14_spill] sm:$0xff] %v4480_v14  ;;  %v2136_v5 = vadd.f32 1.0, %v3345_v26  ;;  %v1943_v43 = vsub.f32 0.0, %v4467_v23  ;;  %v808_v44 = vsub.f32 0.0, %v4470_v21  ;;  %v4486_v36 = vpop.f32.mrb[41].mxu1  ;;  %v4492_v7 = vpop.f32.mrb[42].mxu0 }
 0x12e   :  { %3362 = vpow2.f32 %v2022_v27  ;;  %v3347_v13 = vpop.eup %3346  ;;  %v2944_v31 = vpack.c.bf16 %v2260_v22, %v2260_v22  ;;  %v1948_v41 = vsub.f32 0.0, %v4476_v16  ;;  %v4490_v0 = vadd.f32 %v3970_v39, %v671_v51  ;;  %v4494_v62 = vpop.f32.mrb[42].mxu1 }
 0x12f   :  { %3364 = vpow2.f32 %v888_v55  ;;  %v994_v27 = vadd.f32 1.0, %v3347_v13  ;;  %v2024_v48 = vmul.f32 1.442695, %v1943_v43  ;;  %v894_v26 = vmul.f32 1.442695, %v808_v44  ;;  %v4496_v14 = vpop.f32.mrb[43].mxu0 }
 0x130   :  { %3366 = vrcp.f32 %v2136_v5  ;;  %5668 = vst [vmem:[#allocation16_spill] sm:$0xff] %v4496_v14  ;;  %v3349_v10 = vpop.eup %3348  ;;  %2580 = vst.msk [vmem:[%s5653_s8 + $0x38] sm:$0xf] %vm1426_vm2, %v2944_v31  ;;  %v2034_v55 = vmul.f32 1.442695, %v1948_v41  ;;  %v806_v39 = vsub.f32 0.0, %v4490_v0  ;;  %v1811_v51 = vmul.f32 %v3965_v37, %v4199_v3 }
 0x131   :  { %3368 = vpow2.f32 %v2028_v25  ;;  %v4505_v22 = vpop.f32.mrb[43].mxu1  ;;  %v3351_v5 = vpop.eup %3350  ;;  %v1118_v43 = vmul.f32 %v3349_v10, %v4236_v63  ;;  %v4511_v44 = vld [vmem:[%s5648_s3] ss:$0 sm:$0xff] }
 0x132   :  { %5669 = vst [vmem:[#allocation17_spill] sm:$0xff] %v4505_v22  ;;  %3370 = vrcp.f32 %v994_v27  ;;  %v674_v25 = vmul.f32 %v4511_v44, %v4209_v58  ;;  %v4518_v13 = vld [vmem:[%s5649_s5] ss:$0 sm:$0xff]  ;;  %v3353_v3 = vpop.eup %3352  ;;  %v2258_v63 = vmul.f32 %v3351_v5, %v4271_v29  ;;  %v890_v10 = vmul.f32 1.442695, %v806_v39  ;;  %v4542_v14 = vpop.f32.mrb[44].mxu0 }
 0x133   :  { %v1814_v37 = vmul.f32 %v4518_v13, %v4211_v53  ;;  %3372 = vpow2.f32 %v884_v9  ;;  %v4526_v31 = vld [vmem:[%s5651_s6] ss:$0 sm:$0xff]  ;;  %v3355_v41 = vpop.eup %3354  ;;  %v2878_v27 = vpack.c.bf16 %v1118_v43, %v1118_v43  ;;  %v1121_v22 = vmul.f32 %v3353_v3, %v4280_v15  ;;  %v4544_v43 = vpop.f32.mrb[44].mxu1 }
 0x134   :  { %v4529_v58 = vadd.f32 %v4526_v31, %v1811_v51  ;;  %3374 = vpow2.f32 %v2024_v48  ;;  %v4535_v53 = vld [vmem:[%s5650_s4] ss:$0 sm:$0xff]  ;;  %v2942_v39 = vpack.c.bf16 %v2258_v63, %v2258_v63  ;;  %v2261_v5 = vmul.f32 %v3355_v41, %v4290_v30  ;;  %5670 = vst [vmem:[#allocation18_spill] sm:$0xff] %v4544_v43  ;;  %v4552_v30 = vpop.f32.mrb[45].mxu0 }
 0x135   :  { %v4538_v29 = vadd.f32 %v4535_v53, %v674_v25  ;;  %v3357_v9 = vpop.eup %3356  ;;  %3376 = vpow2.f32 %v894_v26  ;;  %1439 = vst.msk [vmem:[%s5652_s7 + $0x30] sm:$0xf] %vm1426_vm2, %v2878_v27  ;;  %v2881_v48 = vpack.c.bf16 %v1121_v22, %v1121_v22  ;;  %5671 = vst [vmem:[#allocation19_spill] sm:$0xff] %v4552_v30  ;;  %v4554_v26 = vpop.f32.mrb[45].mxu1 }
 0x136   :  { %v1946_v51 = vsub.f32 0.0, %v4529_v58  ;;  %v3359_v15 = vpop.eup %3358  ;;  %v1119_v25 = vmul.f32 %v3357_v9, %v4294_v24  ;;  %3378 = vpow2.f32 %v2034_v55  ;;  %5672 = vst [vmem:[#allocation20_spill] sm:$0xff] %v4554_v26  ;;  %2578 = vst.msk [vmem:[%s5653_s8 + $0x30] sm:$0xf] %vm1426_vm2, %v2942_v39  ;;  %v2945_v41 = vpack.c.bf16 %v2261_v5, %v2261_v5  ;;  %v4561_v27 = vpop.f32.mrb[46].mxu0 }
 0x137   :  { %v809_v3 = vsub.f32 0.0, %v4538_v29  ;;  %v3361_v63 = vpop.eup %3360  ;;  %v2259_v43 = vmul.f32 %v3359_v15, %v4323_v54  ;;  %3380 = vpow2.f32 %v890_v10  ;;  %v4563_v24 = vpop.f32.mrb[46].mxu1  ;;  %1442 = vst.msk [vmem:[%s5652_s7 + $0x3c] sm:$0xf] %vm1426_vm2, %v2881_v48  ;;  %v4571_v39 = vadd.f32 %v4526_v31, %v1814_v37 }
 0x138   :  { %v2030_v22 = vmul.f32 1.442695, %v1946_v51  ;;  %v3363_v55 = vpop.eup %3362  ;;  %v2879_v9 = vpack.c.bf16 %v1119_v25, %v1119_v25  ;;  %v1124_v26 = vmul.f32 %v3361_v63, %v4333_v8  ;;  %v4573_v54 = vpop.f32.mrb[47].mxu0  ;;  %2581 = vst.msk [vmem:[%s5653_s8 + $0x3c] sm:$0xf] %vm1426_vm2, %v2945_v41  ;;  %v672_v8 = vmul.f32 %v4511_v44, %v4220_v60 }
 0x139   :  { %v896_v30 = vmul.f32 1.442695, %v809_v3  ;;  %5673 = vst [vmem:[#allocation21_spill] sm:$0xff] %v4573_v54  ;;  %v4575_v10 = vpop.f32.mrb[47].mxu1  ;;  %v3365_v5 = vpop.eup %3364  ;;  %v2943_v51 = vpack.c.bf16 %v2259_v43, %v2259_v43  ;;  %v2134_v15 = vadd.f32 1.0, %v3363_v55  ;;  %v1949_v3 = vsub.f32 0.0, %v4571_v39 }
 0x13a   :  { %5674 = vst [vmem:[#allocation22_spill] sm:$0xff] %v4575_v10  ;;  %3382 = vpow2.f32 %v2030_v22  ;;  %v3367_v48 = vpop.eup %3366  ;;  %1440 = vst.msk [vmem:[%s5652_s7 + $0x34] sm:$0xf] %vm1426_vm2, %v2879_v9  ;;  %v2884_v37 = vpack.c.bf16 %v1124_v26, %v1124_v26  ;;  %v997_v25 = vadd.f32 1.0, %v3365_v5  ;;  %v4594_v60 = vadd.f32 %v4535_v53, %v672_v8  ;;  %v4611_v8 = vpop.f32.mrb[48].mxu1 }
 0x13b   :  { %3384 = vpow2.f32 %v896_v30  ;;  %v3369_v63 = vpop.eup %3368  ;;  %2579 = vst.msk [vmem:[%s5653_s8 + $0x34] sm:$0xf] %vm1426_vm2, %v2943_v51  ;;  %v2264_v43 = vmul.f32 %v3367_v48, %v4336_v38  ;;  %v1812_v41 = vmul.f32 %v4518_v13, %v4222_v40  ;;  %v2036_v22 = vmul.f32 1.442695, %v1949_v3  ;;  %5676 = vst [vmem:[#allocation24_spill] sm:$0xff] %v4611_v8 }
 0x13c   :  { %3386 = vrcp.f32 %v2134_v15  ;;  %v3371_v26 = vpop.eup %3370  ;;  %1445 = vst.msk [vmem:[%s5652_s7 + $0x48] sm:$0xf] %vm1426_vm2, %v2884_v37  ;;  %v2137_v30 = vadd.f32 1.0, %v3369_v63  ;;  %v677_v55 = vmul.f32 %v4511_v44, %v4254_v56  ;;  %v807_v51 = vsub.f32 0.0, %v4594_v60  ;;  %v4609_v15 = vpop.f32.mrb[48].mxu0 }
 0x13d   :  { %3388 = vrcp.f32 %v997_v25  ;;  %v3373_v38 = vpop.eup %3372  ;;  %v2948_v9 = vpack.c.bf16 %v2264_v43, %v2264_v43  ;;  %v1122_v5 = vmul.f32 %v3371_v26, %v4373_v20  ;;  %v4607_v40 = vadd.f32 %v4526_v31, %v1812_v41  ;;  %5675 = vst [vmem:[#allocation23_spill] sm:$0xff] %v4609_v15  ;;  %v4618_v3 = vpop.f32.mrb[49].mxu0 }
 0x13e   :  { %v3375_v48 = vpop.eup %3374  ;;  %3390 = vrcp.f32 %v2137_v30  ;;  %v995_v37 = vadd.f32 1.0, %v3373_v38  ;;  %v4614_v25 = vadd.f32 %v4535_v53, %v677_v55  ;;  %v1817_v56 = vmul.f32 %v4518_v13, %v4256_v42  ;;  %5677 = vst [vmem:[#allocation25_spill] sm:$0xff] %v4618_v3  ;;  %v4620_v20 = vpop.f32.mrb[49].mxu1 }
 0x13f   :  { %5678 = vst [vmem:[#allocation26_spill] sm:$0xff] %v4620_v20  ;;  %v3377_v63 = vpop.eup %3376  ;;  %2584 = vst.msk [vmem:[%s5653_s8 + $0x48] sm:$0xf] %vm1426_vm2, %v2948_v9  ;;  %v2882_v43 = vpack.c.bf16 %v1122_v5, %v1122_v5  ;;  %v2135_v41 = vadd.f32 1.0, %v3375_v48  ;;  %3392 = vpow2.f32 %v2036_v22  ;;  %v892_v26 = vmul.f32 1.442695, %v807_v51 }
 0x140   :  { %v4626_v30 = vpop.f32.mrb[50].mxu0  ;;  %v4628_v55 = vpop.f32.mrb[50].mxu1  ;;  %3394 = vrcp.f32 %v995_v37  ;;  %v1000_v42 = vadd.f32 1.0, %v3377_v63  ;;  %v1947_v3 = vsub.f32 0.0, %v4607_v40  ;;  %v812_v20 = vsub.f32 0.0, %v4614_v25 }
 0x141   :  { %5679 = vst [vmem:[#allocation27_spill] sm:$0xff] %v4626_v30  ;;  %5680 = vst [vmem:[#allocation28_spill] sm:$0xff] %v4628_v55  ;;  %v3379_v38 = vpop.eup %3378  ;;  %v4632_v8 = vpop.f32.mrb[51].mxu0  ;;  %3396 = vrcp.f32 %v2135_v41  ;;  %v4641_v5 = vadd.f32 %v4526_v31, %v1817_v56  ;;  %v675_v51 = vmul.f32 %v4511_v44, %v4266_v61  ;;  %v5684_v30 = vld [vmem:[#allocation3_spill] sm:$0xff] }
 0x142   :  { %5681 = vst [vmem:[#allocation29_spill] sm:$0xff] %v4632_v8  ;;  %v4634_v15 = vpop.f32.mrb[51].mxu1  ;;  %v3381_v9 = vpop.eup %3380  ;;  %1443 = vst.msk [vmem:[%s5652_s7 + $0x40] sm:$0xf] %vm1426_vm2, %v2882_v43  ;;  %v2140_v22 = vadd.f32 1.0, %v3379_v38  ;;  %3398 = vrcp.f32 %v1000_v42  ;;  %v5683_v43 = vld [vmem:[#allocation2_spill] sm:$0xff]  ;;  %v678_v61 = vmul.f32 %v4511_v44, %v5684_v30 }
 0x143   :  { %5682 = vst [vmem:[#allocation30_spill] sm:$0xff] %v4634_v15  ;;  %v998_v48 = vadd.f32 1.0, %v3381_v9  ;;  %v2032_v37 = vmul.f32 1.442695, %v1947_v3  ;;  %v902_v63 = vmul.f32 1.442695, %v812_v20  ;;  %v4647_v55 = vadd.f32 %v4535_v53, %v675_v51 }
 0x144   :  { %v3383_v8 = vpop.eup %3382  ;;  %3400 = vrcp.f32 %v2140_v22  ;;  %v1952_v15 = vsub.f32 0.0, %v4641_v5  ;;  %v1815_v41 = vmul.f32 %v4518_v13, %v5683_v43  ;;  %v5685_v42 = vld [vmem:[#allocation4_spill] sm:$0xff]  ;;  %v4656_v51 = vpop.f32.mrb[52].mxu0  ;;  %v4665_v30 = vadd.f32 %v4535_v53, %v678_v61 }
 0x145   :  { %v3385_v38 = vpop.eup %3384  ;;  %3402 = vrcp.f32 %v998_v48  ;;  %v2138_v56 = vadd.f32 1.0, %v3383_v8  ;;  %v1818_v3 = vmul.f32 %v4518_v13, %v5685_v42  ;;  %v810_v10 = vsub.f32 0.0, %v4647_v55  ;;  %5686 = vst [vmem:[#allocation2_spill] sm:$0xff] %v4656_v51  ;;  %v4658_v54 = vpop.f32.mrb[52].mxu1 }
 0x146   :  { %v3387_v20 = vpop.eup %3386  ;;  %v1001_v9 = vadd.f32 1.0, %v3385_v38  ;;  %3404 = vpow2.f32 %v892_v26  ;;  %v2042_v22 = vmul.f32 1.442695, %v1952_v15  ;;  %5687 = vst [vmem:[#allocation3_spill] sm:$0xff] %v4658_v54  ;;  %v4662_v8 = vadd.f32 %v4526_v31, %v1815_v41  ;;  %v4667_v42 = vpop.f32.mrb[53].mxu0 }
 0x147   :  { %v3389_v43 = vpop.eup %3388  ;;  %v2262_v48 = vmul.f32 %v3387_v20, %v4411_v19  ;;  %3406 = vrcp.f32 %v2138_v56  ;;  %5688 = vst [vmem:[#allocation4_spill] sm:$0xff] %v4667_v42  ;;  %v4669_v26 = vpop.f32.mrb[53].mxu1  ;;  %v898_v38 = vmul.f32 1.442695, %v810_v10  ;;  %v4673_v54 = vadd.f32 %v4526_v31, %v1818_v3 }
 0x148   :  { %5689 = vst [vmem:[#allocation31_spill] sm:$0xff] %v4669_v26  ;;  %v1125_v15 = vmul.f32 %v3389_v43, %v4414_v50  ;;  %3408 = vrcp.f32 %v1001_v9  ;;  %v3391_v51 = vpop.eup %3390  ;;  %v1950_v41 = vsub.f32 0.0, %v4662_v8  ;;  %v813_v56 = vsub.f32 0.0, %v4665_v30  ;;  %v4677_v61 = vpop.f32.mrb[54].mxu0 }
 0x149   :  { %v2946_v19 = vpack.c.bf16 %v2262_v48, %v2262_v48  ;;  %3410 = vpow2.f32 %v2032_v37  ;;  %5690 = vst [vmem:[#allocation32_spill] sm:$0xff] %v4677_v61  ;;  %v4679_v20 = vpop.f32.mrb[54].mxu1  ;;  %v3393_v42 = vpop.eup %3392  ;;  %v2265_v50 = vmul.f32 %v3391_v51, %v4421_v4  ;;  %v1953_v10 = vsub.f32 0.0, %v4673_v54 }
 0x14a   :  { %5691 = vst [vmem:[#allocation33_spill] sm:$0xff] %v4679_v20  ;;  %v2885_v26 = vpack.c.bf16 %v1125_v15, %v1125_v15  ;;  %3412 = vpow2.f32 %v902_v63  ;;  %v3395_v3 = vpop.eup %3394  ;;  %v2141_v37 = vadd.f32 1.0, %v3393_v42  ;;  %v2038_v9 = vmul.f32 1.442695, %v1950_v41  ;;  %v4687_v48 = vpop.f32.mrb[55].mxu0  ;;  %v5693_v42 = vld [vmem:[#allocation5_spill] sm:$0xff] }
 0x14b   :  { %2582 = vst.msk [vmem:[%s5653_s8 + $0x40] sm:$0xf] %vm1426_vm2, %v2946_v19  ;;  %3414 = vpow2.f32 %v2042_v22  ;;  %v904_v43 = vmul.f32 1.442695, %v813_v56  ;;  %5692 = vst [vmem:[#allocation34_spill] sm:$0xff] %v4687_v48  ;;  %v3397_v20 = vpop.eup %3396  ;;  %v2949_v4 = vpack.c.bf16 %v2265_v50, %v2265_v50  ;;  %v1123_v63 = vmul.f32 %v3395_v3, %v4455_v18  ;;  %v4694_v15 = vpop.f32.mrb[55].mxu1 }
 0x14c   :  { %1446 = vst.msk [vmem:[%s5652_s7 + $0x4c] sm:$0xf] %vm1426_vm2, %v2885_v26  ;;  %3416 = vpow2.f32 %v898_v38  ;;  %v2044_v51 = vmul.f32 1.442695, %v1953_v10  ;;  %v3399_v19 = vpop.eup %3398  ;;  %v2263_v22 = vmul.f32 %v3397_v20, %v4467_v23  ;;  %v676_v41 = vmul.f32 %v4511_v44, %v5693_v42  ;;  %v5694_v56 = vld [vmem:[#allocation6_spill] sm:$0xff] }
 0x14d   :  { %3418 = vrcp.f32 %v2141_v37  ;;  %v1816_v48 = vmul.f32 %v4518_v13, %v5694_v56  ;;  %2585 = vst.msk [vmem:[%s5653_s8 + $0x4c] sm:$0xf] %vm1426_vm2, %v2949_v4  ;;  %v2883_v18 = vpack.c.bf16 %v1123_v63, %v1123_v63  ;;  %v1128_v26 = vmul.f32 %v3399_v19, %v4470_v21  ;;  %v4728_v63 = vpop.f32.mrb[56].mxu0 }
 0x14e   :  { %v3401_v61 = vpop.eup %3400  ;;  %3420 = vpow2.f32 %v2038_v9  ;;  %v681_v23 = vmul.f32 %v4511_v44, %v4299_v52  ;;  %v2947_v20 = vpack.c.bf16 %v2263_v22, %v2263_v22  ;;  %v4710_v10 = vadd.f32 %v4535_v53, %v676_v41  ;;  %v4740_v41 = vpop.f32.mrb[57].mxu0 }
 0x14f   :  { %v3403_v38 = vpop.eup %3402  ;;  %v2268_v50 = vmul.f32 %v3401_v61, %v4476_v16  ;;  %3422 = vpow2.f32 %v904_v43  ;;  %1444 = vst.msk [vmem:[%s5652_s7 + $0x44] sm:$0xf] %vm1426_vm2, %v2883_v18  ;;  %v2888_v37 = vpack.c.bf16 %v1128_v26, %v1128_v26  ;;  %v4718_v52 = vadd.f32 %v4526_v31, %v1816_v48 }
 0x150   :  { %v3405_v3 = vpop.eup %3404  ;;  %v1126_v21 = vmul.f32 %v3403_v38, %v4490_v0  ;;  %3424 = vpow2.f32 %v2044_v51  ;;  %2583 = vst.msk [vmem:[%s5653_s8 + $0x44] sm:$0xf] %vm1426_vm2, %v2947_v20  ;;  %v811_v43 = vsub.f32 0.0, %v4710_v10  ;;  %v4726_v4 = vadd.f32 %v4535_v53, %v681_v23  ;;  %v4730_v0 = vpop.f32.mrb[56].mxu1 }
 0x151   :  { %v3407_v9 = vpop.eup %3406  ;;  %v2952_v16 = vpack.c.bf16 %v2268_v50, %v2268_v50  ;;  %v999_v61 = vadd.f32 1.0, %v3405_v3  ;;  %1449 = vst.msk [vmem:[%s5652_s7 + $0x58] sm:$0xf] %vm1426_vm2, %v2888_v37  ;;  %v1951_v22 = vsub.f32 0.0, %v4718_v52  ;;  %v1821_v42 = vmul.f32 %v4518_v13, %v4301_v47  ;;  %v4742_v56 = vpop.f32.mrb[57].mxu1 }
 0x152   :  { %v3409_v51 = vpop.eup %3408  ;;  %v2886_v48 = vpack.c.bf16 %v1126_v21, %v1126_v21  ;;  %v2266_v19 = vmul.f32 %v3407_v9, %v4529_v58  ;;  %5695 = vst [vmem:[#allocation5_spill] sm:$0xff] %v4742_v56  ;;  %v900_v23 = vmul.f32 1.442695, %v811_v43  ;;  %v816_v58 = vsub.f32 0.0, %v4726_v4 }
 0x153   :  { %v3411_v18 = vpop.eup %3410  ;;  %2588 = vst.msk [vmem:[%s5653_s8 + $0x58] sm:$0xf] %vm1426_vm2, %v2952_v16  ;;  %v1129_v26 = vmul.f32 %v3409_v51, %v4538_v29  ;;  %3426 = vrcp.f32 %v999_v61  ;;  %v2040_v50 = vmul.f32 1.442695, %v1951_v22  ;;  %v4755_v3 = vadd.f32 %v4526_v31, %v1821_v42  ;;  %v4757_v16 = vpop.f32.mrb[58].mxu0 }
 0x154   :  { %v3413_v38 = vpop.eup %3412  ;;  %1447 = vst.msk [vmem:[%s5652_s7 + $0x50] sm:$0xf] %vm1426_vm2, %v2886_v48  ;;  %v2950_v47 = vpack.c.bf16 %v2266_v19, %v2266_v19  ;;  %v2139_v20 = vadd.f32 1.0, %v3411_v18  ;;  %3428 = vpow2.f32 %v900_v23  ;;  %v910_v29 = vmul.f32 1.442695, %v816_v58  ;;  %5696 = vst [vmem:[#allocation6_spill] sm:$0xff] %v4757_v16 }
 0x155   :  { %v3415_v37 = vpop.eup %3414  ;;  %v2889_v21 = vpack.c.bf16 %v1129_v26, %v1129_v26  ;;  %v1004_v9 = vadd.f32 1.0, %v3413_v38  ;;  %v1956_v51 = vsub.f32 0.0, %v4755_v3  ;;  %v679_v48 = vmul.f32 %v4511_v44, %v4305_v49  ;;  %v5697_v18 = vld [vmem:[#allocation7_spill] sm:$0xff] }
 0x156   :  { %v3417_v61 = vpop.eup %3416  ;;  %2586 = vst.msk [vmem:[%s5653_s8 + $0x50] sm:$0xf] %vm1426_vm2, %v2950_v47  ;;  %3430 = vrcp.f32 %v2139_v20  ;;  %v2144_v43 = vadd.f32 1.0, %v3415_v37  ;;  %v1819_v42 = vmul.f32 %v4518_v13, %v4307_v57  ;;  %v682_v26 = vmul.f32 %v4511_v44, %v5697_v18  ;;  %v5699_v18 = vld [vmem:[#allocation9_spill] sm:$0xff] }
 0x157   :  { %v3419_v19 = vpop.eup %3418  ;;  %1450 = vst.msk [vmem:[%s5652_s7 + $0x5c] sm:$0xf] %vm1426_vm2, %v2889_v21  ;;  %3432 = vrcp.f32 %v1004_v9  ;;  %v1002_v22 = vadd.f32 1.0, %v3417_v61  ;;  %v2050_v38 = vmul.f32 1.442695, %v1956_v51  ;;  %v4776_v49 = vadd.f32 %v4535_v53, %v679_v48 }
 0x158   :  { %v3421_v23 = vpop.eup %3420  ;;  %v2269_v58 = vmul.f32 %v3419_v19, %v4571_v39  ;;  %3434 = vrcp.f32 %v2144_v43  ;;  %v4779_v37 = vadd.f32 %v4526_v31, %v1819_v42  ;;  %v4782_v21 = vadd.f32 %v4535_v53, %v682_v26  ;;  %v4795_v26 = vpop.f32.mrb[58].mxu1 }
 0x159   :  { %v3423_v47 = vpop.eup %3422  ;;  %3436 = vrcp.f32 %v1002_v22  ;;  %v2142_v20 = vadd.f32 1.0, %v3421_v23  ;;  %v814_v39 = vsub.f32 0.0, %v4776_v49  ;;  %v5698_v22 = vld [vmem:[#allocation8_spill] sm:$0xff]  ;;  %5700 = vst [vmem:[#allocation7_spill] sm:$0xff] %v4795_v26 }
 0x15a   :  { %v3425_v57 = vpop.eup %3424  ;;  %v2953_v9 = vpack.c.bf16 %v2269_v58, %v2269_v58  ;;  %v1005_v61 = vadd.f32 1.0, %v3423_v47  ;;  %3438 = vpow2.f32 %v2040_v50  ;;  %v1954_v51 = vsub.f32 0.0, %v4779_v37 }
 0x15b   :  { %3440 = vrcp.f32 %v2142_v20  ;;  %v2145_v43 = vadd.f32 1.0, %v3425_v57  ;;  %v817_v48 = vsub.f32 0.0, %v4782_v21  ;;  %v906_v19 = vmul.f32 1.442695, %v814_v39  ;;  %v5701_v20 = vld [vmem:[#allocation10_spill] sm:$0xff]  ;;  %v4806_v39 = vpop.f32.mrb[59].mxu0 }
 0x15c   :  { %2589 = vst.msk [vmem:[%s5653_s8 + $0x5c] sm:$0xf] %vm1426_vm2, %v2953_v9  ;;  %3442 = vrcp.f32 %v1005_v61  ;;  %v1822_v42 = vmul.f32 %v4518_v13, %v5698_v22  ;;  %v680_v50 = vmul.f32 %v4511_v44, %v5699_v18  ;;  %v2046_v58 = vmul.f32 1.442695, %v1954_v51  ;;  %5702 = vst [vmem:[#allocation8_spill] sm:$0xff] %v4806_v39 }
 0x15d   :  { %v3427_v23 = vpop.eup %3426  ;;  %3444 = vrcp.f32 %v2145_v43  ;;  %v912_v47 = vmul.f32 1.442695, %v817_v48  ;;  %v1820_v57 = vmul.f32 %v4518_v13, %v5701_v20  ;;  %v685_v51 = vmul.f32 %v4511_v44, %v4353_v32 }
 0x15e   :  { %v1127_v16 = vmul.f32 %v3427_v23, %v4594_v60  ;;  %3446 = vpow2.f32 %v910_v29  ;;  %v4801_v9 = vadd.f32 %v4526_v31, %v1822_v42  ;;  %v4804_v61 = vadd.f32 %v4535_v53, %v680_v50  ;;  %v3429_v22 = vpop.eup %3428  ;;  %v4815_v29 = vpop.f32.mrb[59].mxu1 }
 0x15f   :  { %3448 = vpow2.f32 %v2050_v38  ;;  %v4809_v43 = vadd.f32 %v4526_v31, %v1820_v57  ;;  %v1825_v60 = vmul.f32 %v4518_v13, %v4355_v35  ;;  %5703 = vst [vmem:[#allocation9_spill] sm:$0xff] %v4815_v29  ;;  %v1003_v18 = vadd.f32 1.0, %v3429_v22 }
 0x160   :  { %v3431_v48 = vpop.eup %3430  ;;  %v2887_v42 = vpack.c.bf16 %v1127_v16, %v1127_v16  ;;  %3450 = vpow2.f32 %v906_v19  ;;  %v1957_v50 = vsub.f32 0.0, %v4801_v9  ;;  %v815_v20 = vsub.f32 0.0, %v4804_v61 }
 0x161   :  { %v3433_v23 = vpop.eup %3432  ;;  %v2267_v38 = vmul.f32 %v3431_v48, %v4607_v40  ;;  %3452 = vpow2.f32 %v2046_v58  ;;  %v1955_v57 = vsub.f32 0.0, %v4809_v43  ;;  %v4827_v19 = vadd.f32 %v4535_v53, %v685_v51 }
 0x162   :  { %v3435_v32 = vpop.eup %3434  ;;  %1448 = vst.msk [vmem:[%s5652_s7 + $0x54] sm:$0xf] %vm1426_vm2, %v2887_v42  ;;  %v1132_v35 = vmul.f32 %v3433_v23, %v4614_v25  ;;  %3454 = vrcp.f32 %v1003_v18  ;;  %v2052_v16 = vmul.f32 1.442695, %v1957_v50  ;;  %v908_v48 = vmul.f32 1.442695, %v815_v20 }
 0x163   :  { %v3437_v22 = vpop.eup %3436  ;;  %v2951_v40 = vpack.c.bf16 %v2267_v38, %v2267_v38  ;;  %v2272_v58 = vmul.f32 %v3435_v32, %v4641_v5  ;;  %3456 = vpow2.f32 %v912_v47  ;;  %v2048_v56 = vmul.f32 1.442695, %v1955_v57  ;;  %v4836_v5 = vpop.f32.mrb[60].mxu0 }
 0x164   :  { %v3439_v29 = vpop.eup %3438  ;;  %v2892_v39 = vpack.c.bf16 %v1132_v35, %v1132_v35  ;;  %v1130_v26 = vmul.f32 %v3437_v22, %v4647_v55  ;;  %3458 = vpow2.f32 %v2052_v16  ;;  %v820_v18 = vsub.f32 0.0, %v4827_v19  ;;  %v4838_v47 = vpop.f32.mrb[60].mxu1 }
 0x165   :  { %v3441_v42 = vpop.eup %3440  ;;  %2587 = vst.msk [vmem:[%s5653_s8 + $0x54] sm:$0xf] %vm1426_vm2, %v2951_v40  ;;  %v2956_v25 = vpack.c.bf16 %v2272_v58, %v2272_v58  ;;  %v2143_v51 = vadd.f32 1.0, %v3439_v29  ;;  %3460 = vpow2.f32 %v908_v48  ;;  %v4846_v38 = vadd.f32 %v4526_v31, %v1825_v60  ;;  %v4848_v29 = vpop.f32.mrb[61].mxu0 }
 0x166   :  { %v3443_v50 = vpop.eup %3442  ;;  %1453 = vst.msk [vmem:[%s5652_s7 + $0x68] sm:$0xf] %vm1426_vm2, %v2892_v39  ;;  %v2890_v55 = vpack.c.bf16 %v1130_v26, %v1130_v26  ;;  %v2270_v23 = vmul.f32 %v3441_v42, %v4662_v8  ;;  %3462 = vpow2.f32 %v2048_v56  ;;  %v4850_v20 = vpop.f32.mrb[61].mxu1  ;;  %v918_v26 = vmul.f32 1.442695, %v820_v18 }
 0x167   :  { %v3445_v57 = vpop.eup %3444  ;;  %2592 = vst.msk [vmem:[%s5653_s8 + $0x68] sm:$0xf] %vm1426_vm2, %v2956_v25  ;;  %v1133_v32 = vmul.f32 %v3443_v50, %v4665_v30  ;;  %3464 = vrcp.f32 %v2143_v51  ;;  %v683_v8 = vmul.f32 %v4511_v44, %v4363_v12  ;;  %v4859_v56 = vpop.f32.mrb[62].mxu0  ;;  %v1960_v30 = vsub.f32 0.0, %v4846_v38 }
 0x168   :  { %v4861_v39 = vpop.f32.mrb[62].mxu1  ;;  %v3447_v60 = vpop.eup %3446  ;;  %1451 = vst.msk [vmem:[%s5652_s7 + $0x60] sm:$0xf] %vm1426_vm2, %v2890_v55  ;;  %v2954_v35 = vpack.c.bf16 %v2270_v23, %v2270_v23  ;;  %v2273_v16 = vmul.f32 %v3445_v57, %v4673_v54  ;;  %v1823_v22 = vmul.f32 %v4518_v13, %v4365_v45  ;;  %3466 = vpow2.f32 %v918_v26 }
 0x169   :  { %v3449_v40 = vpop.eup %3448  ;;  %v2893_v12 = vpack.c.bf16 %v1133_v32, %v1133_v32  ;;  %v1008_v58 = vadd.f32 1.0, %v3447_v60  ;;  %v4872_v48 = vadd.f32 %v4535_v53, %v683_v8  ;;  %v2058_v51 = vmul.f32 1.442695, %v1960_v30  ;;  %v4895_v60 = vpop.f32.mrb[63].mxu0 }
 0x16a   :  { %v3451_v42 = vpop.eup %3450  ;;  %2590 = vst.msk [vmem:[%s5653_s8 + $0x60] sm:$0xf] %vm1426_vm2, %v2954_v35  ;;  %v2957_v25 = vpack.c.bf16 %v2273_v16, %v2273_v16  ;;  %v2148_v54 = vadd.f32 1.0, %v3449_v40  ;;  %v4879_v18 = vadd.f32 %v4526_v31, %v1823_v22  ;;  %v686_v23 = vmul.f32 %v4511_v44, %v4375_v11 }
 0x16b   :  { %v3453_v45 = vpop.eup %3452  ;;  %1454 = vst.msk [vmem:[%s5652_s7 + $0x6c] sm:$0xf] %vm1426_vm2, %v2893_v12  ;;  %3468 = vrcp.f32 %v1008_v58  ;;  %v1006_v50 = vadd.f32 1.0, %v3451_v42  ;;  %v818_v55 = vsub.f32 0.0, %v4872_v48  ;;  %v1826_v8 = vmul.f32 %v4518_v13, %v4377_v28  ;;  %v4904_v42 = vpop.f32.mrb[63].mxu1 }
 0x16c   :  { %v3455_v57 = vpop.eup %3454  ;;  %2593 = vst.msk [vmem:[%s5653_s8 + $0x6c] sm:$0xf] %vm1426_vm2, %v2957_v25  ;;  %3470 = vrcp.f32 %v2148_v54  ;;  %v2146_v32 = vadd.f32 1.0, %v3453_v45  ;;  %v1958_v26 = vsub.f32 0.0, %v4879_v18  ;;  %v4899_v30 = vadd.f32 %v4535_v53, %v686_v23 }
 0x16d   :  { %v3457_v35 = vpop.eup %3456  ;;  %v1131_v16 = vmul.f32 %v3455_v57, %v4710_v10  ;;  %3472 = vrcp.f32 %v1006_v50  ;;  %v914_v11 = vmul.f32 1.442695, %v818_v55  ;;  %v4902_v58 = vadd.f32 %v4526_v31, %v1826_v8 }
 0x16e   :  { %v3459_v22 = vpop.eup %3458  ;;  %3474 = vrcp.f32 %v2146_v32  ;;  %v1009_v40 = vadd.f32 1.0, %v3457_v35  ;;  %v2054_v12 = vmul.f32 1.442695, %v1958_v26  ;;  %v821_v10 = vsub.f32 0.0, %v4899_v30 }
 0x16f   :  { %v3461_v28 = vpop.eup %3460  ;;  %v2891_v25 = vpack.c.bf16 %v1131_v16, %v1131_v16  ;;  %v2149_v54 = vadd.f32 1.0, %v3459_v22  ;;  %3476 = vpow2.f32 %v2058_v51  ;;  %v1961_v55 = vsub.f32 0.0, %v4902_v58 }
 0x170   :  { %v3463_v45 = vpop.eup %3462  ;;  %3478 = vrcp.f32 %v1009_v40  ;;  %v1007_v50 = vadd.f32 1.0, %v3461_v28  ;;  %v684_v23 = vmul.f32 %v4511_v44, %v4383_v33  ;;  %v920_v26 = vmul.f32 1.442695, %v821_v10 }
 0x171   :  { %v3465_v57 = vpop.eup %3464  ;;  %1452 = vst.msk [vmem:[%s5652_s7 + $0x64] sm:$0xf] %vm1426_vm2, %v2891_v25  ;;  %3480 = vrcp.f32 %v2149_v54  ;;  %v2147_v32 = vadd.f32 1.0, %v3463_v45  ;;  %v1824_v51 = vmul.f32 %v4518_v13, %v4385_v6  ;;  %v2060_v35 = vmul.f32 1.442695, %v1961_v55 }
 0x172   :  { %v2271_v8 = vmul.f32 %v3465_v57, %v4718_v52  ;;  %3482 = vrcp.f32 %v1007_v50  ;;  %v4918_v16 = vadd.f32 %v4535_v53, %v684_v23  ;;  %v3467_v33 = vpop.eup %3466  ;;  %v689_v40 = vmul.f32 %v4511_v44, %v4423_v1 }
 0x173   :  { %3484 = vrcp.f32 %v2147_v32  ;;  %v4921_v22 = vadd.f32 %v4526_v31, %v1824_v51  ;;  %v1829_v28 = vmul.f32 %v4518_v13, %v4425_v34  ;;  %v1012_v6 = vadd.f32 1.0, %v3467_v33 }
 0x174   :  { %v2955_v25 = vpack.c.bf16 %v2271_v8, %v2271_v8  ;;  %3486 = vpow2.f32 %v914_v11  ;;  %v819_v52 = vsub.f32 0.0, %v4918_v16  ;;  %v4930_v45 = vadd.f32 %v4535_v53, %v689_v40 }
 0x175   :  { %v3469_v54 = vpop.eup %3468  ;;  %3488 = vpow2.f32 %v2054_v12  ;;  %v1959_v10 = vsub.f32 0.0, %v4921_v22  ;;  %v4933_v50 = vadd.f32 %v4526_v31, %v1829_v28  ;;  %v687_v11 = vmul.f32 %v4511_v44, %v4433_v17 }
 0x176   :  { %v3471_v55 = vpop.eup %3470  ;;  %2591 = vst.msk [vmem:[%s5653_s8 + $0x64] sm:$0xf] %vm1426_vm2, %v2955_v25  ;;  %v1136_v1 = vmul.f32 %v3469_v54, %v4726_v4  ;;  %3490 = vrcp.f32 %v1012_v6  ;;  %v916_v34 = vmul.f32 1.442695, %v819_v52  ;;  %v824_v32 = vsub.f32 0.0, %v4930_v45 }
 0x177   :  { %v3473_v12 = vpop.eup %3472  ;;  %v2276_v23 = vmul.f32 %v3471_v55, %v4755_v3  ;;  %3492 = vpow2.f32 %v920_v26  ;;  %v2056_v57 = vmul.f32 1.442695, %v1959_v10  ;;  %v1964_v40 = vsub.f32 0.0, %v4933_v50 }
 0x178   :  { %v3475_v51 = vpop.eup %3474  ;;  %v2896_v8 = vpack.c.bf16 %v1136_v1, %v1136_v1  ;;  %v1134_v33 = vmul.f32 %v3473_v12, %v4776_v49  ;;  %3494 = vpow2.f32 %v2060_v35  ;;  %v926_v17 = vmul.f32 1.442695, %v824_v32  ;;  %v5704_v1 = vld [vmem:[#allocation11_spill] sm:$0xff]  ;;  %v5705_v12 = vld [vmem:[#allocation12_spill] sm:$0xff] }
 0x179   :  { %v3477_v4 = vpop.eup %3476  ;;  %v2960_v28 = vpack.c.bf16 %v2276_v23, %v2276_v23  ;;  %v2274_v25 = vmul.f32 %v3475_v51, %v4779_v37  ;;  %3496 = vpow2.f32 %v916_v34  ;;  %v2066_v52 = vmul.f32 1.442695, %v1964_v40 }
 0x17a   :  { %v3479_v6 = vpop.eup %3478  ;;  %1457 = vst.msk [vmem:[%s5652_s7 + $0x78] sm:$0xf] %vm1426_vm2, %v2896_v8  ;;  %v2894_v3 = vpack.c.bf16 %v1134_v33, %v1134_v33  ;;  %v2152_v26 = vadd.f32 1.0, %v3477_v4  ;;  %3498 = vpow2.f32 %v2056_v57  ;;  %v4957_v54 = vadd.f32 %v4535_v53, %v687_v11 }
 0x17b   :  { %v3481_v49 = vpop.eup %3480  ;;  %2596 = vst.msk [vmem:[%s5653_s8 + $0x78] sm:$0xf] %vm1426_vm2, %v2960_v28  ;;  %v2958_v35 = vpack.c.bf16 %v2274_v25, %v2274_v25  ;;  %v1137_v37 = vmul.f32 %v3479_v6, %v4782_v21  ;;  %3500 = vpow2.f32 %v926_v17  ;;  %v1827_v34 = vmul.f32 %v4518_v13, %v5704_v1  ;;  %v5706_v17 = vld [vmem:[#allocation13_spill] sm:$0xff] }
 0x17c   :  { %v3483_v10 = vpop.eup %3482  ;;  %1455 = vst.msk [vmem:[%s5652_s7 + $0x70] sm:$0xf] %vm1426_vm2, %v2894_v3  ;;  %v2277_v55 = vmul.f32 %v3481_v49, %v4801_v9  ;;  %3502 = vrcp.f32 %v2152_v26  ;;  %v690_v23 = vmul.f32 %v4511_v44, %v5705_v12  ;;  %v822_v32 = vsub.f32 0.0, %v4957_v54 }
 0x17d   :  { %v3485_v21 = vpop.eup %3484  ;;  %2594 = vst.msk [vmem:[%s5653_s8 + $0x70] sm:$0xf] %vm1426_vm2, %v2958_v35  ;;  %v2897_v11 = vpack.c.bf16 %v1137_v37, %v1137_v37  ;;  %v1135_v57 = vmul.f32 %v3483_v10, %v4804_v61  ;;  %3504 = vpow2.f32 %v2066_v52  ;;  %v4976_v33 = vadd.f32 %v4526_v31, %v1827_v34 }
 0x17e   :  { %v3487_v9 = vpop.eup %3486  ;;  %v2961_v51 = vpack.c.bf16 %v2277_v55, %v2277_v55  ;;  %v2275_v8 = vmul.f32 %v3485_v21, %v4809_v43  ;;  %v4979_v40 = vadd.f32 %v4535_v53, %v690_v23  ;;  %v922_v25 = vmul.f32 1.442695, %v822_v32 }
 0x17f   :  { %v3489_v4 = vpop.eup %3488  ;;  %1458 = vst.msk [vmem:[%s5652_s7 + $0x7c] sm:$0xf] %vm1426_vm2, %v2897_v11  ;;  %v2895_v61 = vpack.c.bf16 %v1135_v57, %v1135_v57  ;;  %v1010_v28 = vadd.f32 1.0, %v3487_v9  ;;  %v1830_v6 = vmul.f32 %v4518_v13, %v5706_v17  ;;  %v1962_v52 = vsub.f32 0.0, %v4976_v33 }
 0x180   :  { %v3491_v3 = vpop.eup %3490  ;;  %2597 = vst.msk [vmem:[%s5653_s8 + $0x7c] sm:$0xf] %vm1426_vm2, %v2961_v51  ;;  %v2959_v43 = vpack.c.bf16 %v2275_v8, %v2275_v8  ;;  %v2150_v26 = vadd.f32 1.0, %v3489_v4  ;;  %v825_v49 = vsub.f32 0.0, %v4979_v40  ;;  %v688_v55 = vmul.f32 %v4511_v44, %v4452_v59 }
 0x181   :  { %v3493_v35 = vpop.eup %3492  ;;  %1456 = vst.msk [vmem:[%s5652_s7 + $0x74] sm:$0xf] %vm1426_vm2, %v2895_v61  ;;  %v1140_v37 = vmul.f32 %v3491_v3, %v4827_v19  ;;  %3506 = vrcp.f32 %v1010_v28  ;;  %v4999_v10 = vadd.f32 %v4526_v31, %v1830_v6  ;;  %v2062_v12 = vmul.f32 1.442695, %v1962_v52  ;;  %v5707_v52 = vld [vmem:[#allocation14_spill] sm:$0xff] }
 0x182   :  { %v3495_v1 = vpop.eup %3494  ;;  %2595 = vst.msk [vmem:[%s5653_s8 + $0x74] sm:$0xf] %vm1426_vm2, %v2959_v43  ;;  %3508 = vrcp.f32 %v2150_v26  ;;  %v1013_v34 = vadd.f32 1.0, %v3493_v35  ;;  %v928_v23 = vmul.f32 1.442695, %v825_v49  ;;  %v5009_v59 = vadd.f32 %v4535_v53, %v688_v55 }
 0x183   :  { %v3497_v21 = vpop.eup %3496  ;;  %v2900_v11 = vpack.c.bf16 %v1140_v37, %v1140_v37  ;;  %v2153_v19 = vadd.f32 1.0, %v3495_v1  ;;  %3510 = vpow2.f32 %v922_v25  ;;  %v1965_v57 = vsub.f32 0.0, %v4999_v10 }
 0x184   :  { %v3499_v32 = vpop.eup %3498  ;;  %3512 = vrcp.f32 %v1013_v34  ;;  %v1011_v9 = vadd.f32 1.0, %v3497_v21  ;;  %v1828_v51 = vmul.f32 %v4518_v13, %v4457_v46  ;;  %v693_v28 = vmul.f32 %v4511_v44, %v4478_v2  ;;  %v5708_v21 = vld [vmem:[#allocation15_spill] sm:$0xff] }
 0x185   :  { %v3501_v8 = vpop.eup %3500  ;;  %1461 = vst.msk [vmem:[%s5652_s7 + $0x88] sm:$0xf] %vm1426_vm2, %v2900_v11  ;;  %3514 = vrcp.f32 %v2153_v19  ;;  %v2151_v4 = vadd.f32 1.0, %v3499_v32  ;;  %v2068_v61 = vmul.f32 1.442695, %v1965_v57  ;;  %v823_v6 = vsub.f32 0.0, %v5009_v59 }
 0x186   :  { %v3503_v25 = vpop.eup %3502  ;;  %3516 = vrcp.f32 %v1011_v9  ;;  %v1016_v17 = vadd.f32 1.0, %v3501_v8  ;;  %v5021_v3 = vadd.f32 %v4526_v31, %v1828_v51  ;;  %v5025_v26 = vadd.f32 %v4535_v53, %v693_v28 }
 0x187   :  { %v3505_v46 = vpop.eup %3504  ;;  %v2280_v43 = vmul.f32 %v3503_v25, %v4846_v38  ;;  %3518 = vrcp.f32 %v2151_v4  ;;  %v1833_v49 = vmul.f32 %v4518_v13, %v5707_v52  ;;  %v924_v35 = vmul.f32 1.442695, %v823_v6 }
 0x188   :  { %3520 = vrcp.f32 %v1016_v17  ;;  %v2156_v2 = vadd.f32 1.0, %v3505_v46  ;;  %v1963_v37 = vsub.f32 0.0, %v5021_v3  ;;  %v828_v1 = vsub.f32 0.0, %v5025_v26 }
 0x189   :  { %v2964_v55 = vpack.c.bf16 %v2280_v43, %v2280_v43  ;;  %3522 = vpow2.f32 %v2062_v12  ;;  %v5032_v34 = vadd.f32 %v4526_v31, %v1833_v49  ;;  %v691_v11 = vmul.f32 %v4511_v44, %v5708_v21 }
 0x18a   :  { %3524 = vrcp.f32 %v2156_v2  ;;  %v2064_v38 = vmul.f32 1.442695, %v1963_v37  ;;  %v1831_v19 = vmul.f32 %v4518_v13, %v4486_v36  ;;  %v934_v12 = vmul.f32 1.442695, %v828_v1 }
 0x18b   :  { %v3507_v57 = vpop.eup %3506  ;;  %2600 = vst.msk [vmem:[%s5653_s8 + $0x88] sm:$0xf] %vm1426_vm2, %v2964_v55  ;;  %3526 = vpow2.f32 %v928_v23  ;;  %v1968_v32 = vsub.f32 0.0, %v5032_v34  ;;  %v694_v9 = vmul.f32 %v4511_v44, %v4492_v7  ;;  %v5047_v4 = vadd.f32 %v4535_v53, %v691_v11 }
 0x18c   :  { %v3509_v51 = vpop.eup %3508  ;;  %v1138_v8 = vmul.f32 %v3507_v57, %v4872_v48  ;;  %3528 = vpow2.f32 %v2068_v61  ;;  %v5050_v36 = vadd.f32 %v4526_v31, %v1831_v19 }
 0x18d   :  { %v3511_v13 = vpop.eup %3510  ;;  %v2278_v28 = vmul.f32 %v3509_v51, %v4879_v18  ;;  %3530 = vpow2.f32 %v924_v35  ;;  %v2074_v23 = vmul.f32 1.442695, %v1968_v32  ;;  %v5054_v25 = vadd.f32 %v4535_v53, %v694_v9  ;;  %v5709_v32 = vld [vmem:[#allocation16_spill] sm:$0xff] }
 0x18e   :  { %v3513_v17 = vpop.eup %3512  ;;  %v2898_v7 = vpack.c.bf16 %v1138_v8, %v1138_v8  ;;  %v1014_v44 = vadd.f32 1.0, %v3511_v13  ;;  %3532 = vpow2.f32 %v2064_v38  ;;  %v826_v48 = vsub.f32 0.0, %v5047_v4  ;;  %v5102_v13 = vld [vmem:[%s5651_s6] ss:$0 sm:$0xff] }
 0x18f   :  { %v3515_v61 = vpop.eup %3514  ;;  %v2962_v6 = vpack.c.bf16 %v2278_v28, %v2278_v28  ;;  %v1141_v46 = vmul.f32 %v3513_v17, %v4899_v30  ;;  %3534 = vpow2.f32 %v934_v12  ;;  %v1966_v31 = vsub.f32 0.0, %v5050_v36 }
 0x190   :  { %v3517_v43 = vpop.eup %3516  ;;  %1459 = vst.msk [vmem:[%s5652_s7 + $0x80] sm:$0xf] %vm1426_vm2, %v2898_v7  ;;  %v2281_v53 = vmul.f32 %v3515_v61, %v4902_v58  ;;  %3536 = vrcp.f32 %v1014_v44  ;;  %v930_v18 = vmul.f32 1.442695, %v826_v48  ;;  %v829_v52 = vsub.f32 0.0, %v5054_v25 }
 0x191   :  { %v3519_v49 = vpop.eup %3518  ;;  %2598 = vst.msk [vmem:[%s5653_s8 + $0x80] sm:$0xf] %vm1426_vm2, %v2962_v6  ;;  %v2901_v30 = vpack.c.bf16 %v1141_v46, %v1141_v46  ;;  %v1139_v2 = vmul.f32 %v3517_v43, %v4918_v16  ;;  %3538 = vpow2.f32 %v2074_v23  ;;  %v2070_v35 = vmul.f32 1.442695, %v1966_v31  ;;  %v5079_v16 = vld [vmem:[%s5649_s5] ss:$0 sm:$0xff] }
 0x192   :  { %v3521_v37 = vpop.eup %3520  ;;  %v2965_v55 = vpack.c.bf16 %v2281_v53, %v2281_v53  ;;  %v2279_v1 = vmul.f32 %v3519_v49, %v4921_v22  ;;  %3540 = vpow2.f32 %v930_v18  ;;  %v936_v58 = vmul.f32 1.442695, %v829_v52  ;;  %v5710_v23 = vld [vmem:[#allocation17_spill] sm:$0xff] }
 0x193   :  { %v3523_v38 = vpop.eup %3522  ;;  %1462 = vst.msk [vmem:[%s5652_s7 + $0x8c] sm:$0xf] %vm1426_vm2, %v2901_v30  ;;  %v2899_v21 = vpack.c.bf16 %v1139_v2, %v1139_v2  ;;  %v1144_v11 = vmul.f32 %v3521_v37, %v4930_v45  ;;  %3542 = vpow2.f32 %v2070_v35  ;;  %v1834_v22 = vmul.f32 %v5079_v16, %v4494_v62  ;;  %v5090_v45 = vld [vmem:[%s5648_s3] ss:$0 sm:$0xff] }
 0x194   :  { %v3525_v19 = vpop.eup %3524  ;;  %2601 = vst.msk [vmem:[%s5653_s8 + $0x8c] sm:$0xf] %vm1426_vm2, %v2965_v55  ;;  %v2963_v57 = vpack.c.bf16 %v2279_v1, %v2279_v1  ;;  %v2154_v12 = vadd.f32 1.0, %v3523_v38  ;;  %3544 = vpow2.f32 %v936_v58  ;;  %v692_v9 = vmul.f32 %v5090_v45, %v5709_v32 }
 0x195   :  { %v3527_v51 = vpop.eup %3526  ;;  %1460 = vst.msk [vmem:[%s5652_s7 + $0x84] sm:$0xf] %vm1426_vm2, %v2899_v21  ;;  %v2904_v62 = vpack.c.bf16 %v1144_v11, %v1144_v11  ;;  %v2284_v8 = vmul.f32 %v3525_v19, %v4933_v50  ;;  %v5105_v28 = vadd.f32 %v5102_v13, %v1834_v22  ;;  %v1832_v17 = vmul.f32 %v5079_v16, %v5710_v23  ;;  %v5116_v50 = vld [vmem:[%s5650_s4] ss:$0 sm:$0xff] }
 0x196   :  { %v3529_v7 = vpop.eup %3528  ;;  %2599 = vst.msk [vmem:[%s5653_s8 + $0x84] sm:$0xf] %vm1426_vm2, %v2963_v57  ;;  %3546 = vrcp.f32 %v2154_v12  ;;  %v1017_v44 = vadd.f32 1.0, %v3527_v51  ;;  %v5119_v48 = vadd.f32 %v5116_v50, %v692_v9  ;;  %v697_v61 = vmul.f32 %v5090_v45, %v4542_v14  ;;  %v5711_v19 = vld [vmem:[#allocation18_spill] sm:$0xff]  ;;  %v5712_v51 = vld [vmem:[#allocation19_spill] sm:$0xff] }
 0x197   :  { %v3531_v6 = vpop.eup %3530  ;;  %1465 = vst.msk [vmem:[%s5652_s7 + $0x98] sm:$0xf] %vm1426_vm2, %v2904_v62  ;;  %v2968_v46 = vpack.c.bf16 %v2284_v8, %v2284_v8  ;;  %v2157_v31 = vadd.f32 1.0, %v3529_v7  ;;  %v1969_v43 = vsub.f32 0.0, %v5105_v28  ;;  %v5129_v53 = vadd.f32 %v5102_v13, %v1832_v17 }
 0x198   :  { %v3533_v18 = vpop.eup %3532  ;;  %3548 = vrcp.f32 %v1017_v44  ;;  %v1015_v52 = vadd.f32 1.0, %v3531_v6  ;;  %v827_v49 = vsub.f32 0.0, %v5119_v48  ;;  %v5133_v14 = vadd.f32 %v5116_v50, %v697_v61  ;;  %v5713_v6 = vld [vmem:[#allocation20_spill] sm:$0xff] }
 0x199   :  { %v3535_v30 = vpop.eup %3534  ;;  %2604 = vst.msk [vmem:[%s5653_s8 + $0x98] sm:$0xf] %vm1426_vm2, %v2968_v46  ;;  %3550 = vrcp.f32 %v2157_v31  ;;  %v2155_v2 = vadd.f32 1.0, %v3533_v18  ;;  %v2076_v35 = vmul.f32 1.442695, %v1969_v43  ;;  %v1967_v37 = vsub.f32 0.0, %v5129_v53 }
 0x19a   :  { %v3537_v55 = vpop.eup %3536  ;;  %3552 = vrcp.f32 %v1015_v52  ;;  %v1020_v1 = vadd.f32 1.0, %v3535_v30  ;;  %v932_v58 = vmul.f32 1.442695, %v827_v49  ;;  %v832_v38 = vsub.f32 0.0, %v5133_v14 }
 0x19b   :  { %v3539_v21 = vpop.eup %3538  ;;  %v1142_v11 = vmul.f32 %v3537_v55, %v4957_v54  ;;  %3554 = vrcp.f32 %v2155_v2  ;;  %v2072_v22 = vmul.f32 1.442695, %v1967_v37  ;;  %v1837_v57 = vmul.f32 %v5079_v16, %v5711_v19 }
 0x19c   :  { %v3541_v12 = vpop.eup %3540  ;;  %3556 = vrcp.f32 %v1020_v1  ;;  %v2160_v32 = vadd.f32 1.0, %v3539_v21  ;;  %v942_v9 = vmul.f32 1.442695, %v832_v38  ;;  %v695_v62 = vmul.f32 %v5090_v45, %v5712_v51 }
 0x19d   :  { %v3543_v8 = vpop.eup %3542  ;;  %v2902_v23 = vpack.c.bf16 %v1142_v11, %v1142_v11  ;;  %v1018_v17 = vadd.f32 1.0, %v3541_v12  ;;  %3558 = vpow2.f32 %v2076_v35  ;;  %v5147_v7 = vadd.f32 %v5102_v13, %v1837_v57 }
 0x19e   :  { %v3545_v54 = vpop.eup %3544  ;;  %3560 = vrcp.f32 %v2160_v32  ;;  %v2158_v44 = vadd.f32 1.0, %v3543_v8  ;;  %v5150_v61 = vadd.f32 %v5116_v50, %v695_v62  ;;  %v1835_v46 = vmul.f32 %v5079_v16, %v5713_v6  ;;  %v5714_v6 = vld [vmem:[#allocation21_spill] sm:$0xff] }
 0x19f   :  { %1463 = vst.msk [vmem:[%s5652_s7 + $0x90] sm:$0xf] %vm1426_vm2, %v2902_v23  ;;  %3562 = vrcp.f32 %v1018_v17  ;;  %v1021_v31 = vadd.f32 1.0, %v3545_v54  ;;  %v1972_v43 = vsub.f32 0.0, %v5147_v7  ;;  %v698_v18 = vmul.f32 %v5090_v45, %v4561_v27 }
 0x1a0   :  { %v3547_v52 = vpop.eup %3546  ;;  %3564 = vrcp.f32 %v2158_v44  ;;  %v830_v49 = vsub.f32 0.0, %v5150_v61  ;;  %v5163_v30 = vadd.f32 %v5102_v13, %v1835_v46  ;;  %v1838_v2 = vmul.f32 %v5079_v16, %v4563_v24 }
 0x1a1   :  { %v2282_v35 = vmul.f32 %v3547_v52, %v4976_v33  ;;  %3566 = vrcp.f32 %v1021_v31  ;;  %v2082_v37 = vmul.f32 1.442695, %v1972_v43  ;;  %v5169_v55 = vadd.f32 %v5116_v50, %v698_v18  ;;  %v5715_v43 = vld [vmem:[#allocation22_spill] sm:$0xff] }
 0x1a2   :  { %v3549_v1 = vpop.eup %3548  ;;  %3568 = vpow2.f32 %v932_v58  ;;  %v938_v27 = vmul.f32 1.442695, %v830_v49  ;;  %v1970_v38 = vsub.f32 0.0, %v5163_v30  ;;  %v5173_v21 = vadd.f32 %v5102_v13, %v1838_v2 }
 0x1a3   :  { %v3551_v11 = vpop.eup %3550  ;;  %v2966_v19 = vpack.c.bf16 %v2282_v35, %v2282_v35  ;;  %v1145_v57 = vmul.f32 %v3549_v1, %v4979_v40  ;;  %3570 = vpow2.f32 %v2072_v22  ;;  %v833_v24 = vsub.f32 0.0, %v5169_v55 }
 0x1a4   :  { %v3553_v33 = vpop.eup %3552  ;;  %v2285_v12 = vmul.f32 %v3551_v11, %v4999_v10  ;;  %3572 = vpow2.f32 %v942_v9  ;;  %v2078_v32 = vmul.f32 1.442695, %v1970_v38  ;;  %v1973_v58 = vsub.f32 0.0, %v5173_v21 }
 0x1a5   :  { %v3555_v51 = vpop.eup %3554  ;;  %2602 = vst.msk [vmem:[%s5653_s8 + $0x90] sm:$0xf] %vm1426_vm2, %v2966_v19  ;;  %v2905_v62 = vpack.c.bf16 %v1145_v57, %v1145_v57  ;;  %v1143_v8 = vmul.f32 %v3553_v33, %v5009_v59  ;;  %3574 = vpow2.f32 %v2082_v37  ;;  %v944_v40 = vmul.f32 1.442695, %v833_v24  ;;  %v5717_v24 = vld [vmem:[#allocation24_spill] sm:$0xff] }
 0x1a6   :  { %v3557_v22 = vpop.eup %3556  ;;  %v2969_v23 = vpack.c.bf16 %v2285_v12, %v2285_v12  ;;  %v2283_v17 = vmul.f32 %v3555_v51, %v5021_v3  ;;  %3576 = vpow2.f32 %v938_v27  ;;  %v2084_v10 = vmul.f32 1.442695, %v1973_v58  ;;  %v5716_v27 = vld [vmem:[#allocation23_spill] sm:$0xff] }
 0x1a7   :  { %v3559_v9 = vpop.eup %3558  ;;  %1466 = vst.msk [vmem:[%s5652_s7 + $0x9c] sm:$0xf] %vm1426_vm2, %v2905_v62  ;;  %v2903_v54 = vpack.c.bf16 %v1143_v8, %v1143_v8  ;;  %v1148_v44 = vmul.f32 %v3557_v22, %v5025_v26  ;;  %3578 = vpow2.f32 %v2078_v32  ;;  %v696_v59 = vmul.f32 %v5090_v45, %v5714_v6 }
 0x1a8   :  { %v3561_v46 = vpop.eup %3560  ;;  %2605 = vst.msk [vmem:[%s5653_s8 + $0x9c] sm:$0xf] %vm1426_vm2, %v2969_v23  ;;  %v2967_v3 = vpack.c.bf16 %v2283_v17, %v2283_v17  ;;  %v2161_v31 = vadd.f32 1.0, %v3559_v9  ;;  %3580 = vpow2.f32 %v944_v40  ;;  %v1836_v18 = vmul.f32 %v5079_v16, %v5715_v43 }
 0x1a9   :  { %v3563_v52 = vpop.eup %3562  ;;  %1464 = vst.msk [vmem:[%s5652_s7 + $0x94] sm:$0xf] %vm1426_vm2, %v2903_v54  ;;  %v2908_v26 = vpack.c.bf16 %v1148_v44, %v1148_v44  ;;  %v2288_v49 = vmul.f32 %v3561_v46, %v5032_v34  ;;  %3582 = vpow2.f32 %v2084_v10  ;;  %v5204_v2 = vadd.f32 %v5116_v50, %v696_v59  ;;  %v5718_v59 = vld [vmem:[#allocation25_spill] sm:$0xff] }
 0x1aa   :  { %v3565_v35 = vpop.eup %3564  ;;  %2603 = vst.msk [vmem:[%s5653_s8 + $0x94] sm:$0xf] %vm1426_vm2, %v2967_v3  ;;  %v1146_v37 = vmul.f32 %v3563_v52, %v5047_v4  ;;  %3584 = vrcp.f32 %v2161_v31  ;;  %v5212_v1 = vadd.f32 %v5102_v13, %v1836_v18  ;;  %v701_v38 = vmul.f32 %v5090_v45, %v5716_v27  ;;  %v5719_v18 = vld [vmem:[#allocation26_spill] sm:$0xff] }
 0x1ab   :  { %v3567_v34 = vpop.eup %3566  ;;  %1469 = vst.msk [vmem:[%s5652_s7 + $0xa8] sm:$0xf] %vm1426_vm2, %v2908_v26  ;;  %v2972_v11 = vpack.c.bf16 %v2288_v49, %v2288_v49  ;;  %v2286_v19 = vmul.f32 %v3565_v35, %v5050_v36  ;;  %v831_v57 = vsub.f32 0.0, %v5204_v2  ;;  %v1841_v4 = vmul.f32 %v5079_v16, %v5717_v24 }
 0x1ac   :  { %v3569_v33 = vpop.eup %3568  ;;  %v2906_v12 = vpack.c.bf16 %v1146_v37, %v1146_v37  ;;  %v1149_v32 = vmul.f32 %v3567_v34, %v5054_v25  ;;  %v1971_v58 = vsub.f32 0.0, %v5212_v1  ;;  %v5227_v51 = vadd.f32 %v5116_v50, %v701_v38 }
 0x1ad   :  { %v3571_v62 = vpop.eup %3570  ;;  %2608 = vst.msk [vmem:[%s5653_s8 + $0xa8] sm:$0xf] %vm1426_vm2, %v2972_v11  ;;  %v2970_v36 = vpack.c.bf16 %v2286_v19, %v2286_v19  ;;  %v1019_v8 = vadd.f32 1.0, %v3569_v33  ;;  %v940_v40 = vmul.f32 1.442695, %v831_v57  ;;  %v5234_v22 = vadd.f32 %v5102_v13, %v1841_v4  ;;  %v5720_v11 = vld [vmem:[#allocation27_spill] sm:$0xff] }
 0x1ae   :  { %v3573_v23 = vpop.eup %3572  ;;  %1467 = vst.msk [vmem:[%s5652_s7 + $0xa0] sm:$0xf] %vm1426_vm2, %v2906_v12  ;;  %v2909_v25 = vpack.c.bf16 %v1149_v32, %v1149_v32  ;;  %v2159_v17 = vadd.f32 1.0, %v3571_v62  ;;  %v2080_v10 = vmul.f32 1.442695, %v1971_v58  ;;  %v836_v9 = vsub.f32 0.0, %v5227_v51 }
 0x1af   :  { %v3575_v54 = vpop.eup %3574  ;;  %2606 = vst.msk [vmem:[%s5653_s8 + $0xa0] sm:$0xf] %vm1426_vm2, %v2970_v36  ;;  %3586 = vrcp.f32 %v1019_v8  ;;  %v1024_v44 = vadd.f32 1.0, %v3573_v23  ;;  %v1976_v6 = vsub.f32 0.0, %v5234_v22  ;;  %v699_v46 = vmul.f32 %v5090_v45, %v5718_v59  ;;  %v5721_v33 = vld [vmem:[#allocation28_spill] sm:$0xff] }
 0x1b0   :  { %v3577_v3 = vpop.eup %3576  ;;  %1470 = vst.msk [vmem:[%s5652_s7 + $0xac] sm:$0xf] %vm1426_vm2, %v2909_v25  ;;  %3588 = vrcp.f32 %v2159_v17  ;;  %v2164_v31 = vadd.f32 1.0, %v3575_v54  ;;  %v950_v43 = vmul.f32 1.442695, %v836_v9  ;;  %v1839_v52 = vmul.f32 %v5079_v16, %v5719_v18  ;;  %v5722_v54 = vld [vmem:[#allocation29_spill] sm:$0xff] }
 0x1b1   :  { %v3579_v26 = vpop.eup %3578  ;;  %3590 = vrcp.f32 %v1024_v44  ;;  %v1022_v49 = vadd.f32 1.0, %v3577_v3  ;;  %v2090_v35 = vmul.f32 1.442695, %v1976_v6  ;;  %v5255_v37 = vadd.f32 %v5116_v50, %v699_v46  ;;  %v5723_v46 = vld [vmem:[#allocation30_spill] sm:$0xff] }
 0x1b2   :  { %v3581_v27 = vpop.eup %3580  ;;  %3592 = vrcp.f32 %v2164_v31  ;;  %v2162_v38 = vadd.f32 1.0, %v3579_v26  ;;  %v5258_v34 = vadd.f32 %v5102_v13, %v1839_v52  ;;  %v702_v19 = vmul.f32 %v5090_v45, %v5720_v11  ;;  %v5724_v18 = vld [vmem:[#allocation2_spill] sm:$0xff] }
 0x1b3   :  { %v3583_v57 = vpop.eup %3582  ;;  %3594 = vrcp.f32 %v1022_v49  ;;  %v1025_v24 = vadd.f32 1.0, %v3581_v27  ;;  %v834_v4 = vsub.f32 0.0, %v5255_v37  ;;  %v1842_v12 = vmul.f32 %v5079_v16, %v5721_v33  ;;  %v5725_v27 = vld [vmem:[#allocation3_spill] sm:$0xff] }
 0x1b4   :  { %v3585_v32 = vpop.eup %3584  ;;  %3596 = vrcp.f32 %v2162_v38  ;;  %v2165_v58 = vadd.f32 1.0, %v3583_v57  ;;  %v1974_v62 = vsub.f32 0.0, %v5258_v34  ;;  %v5267_v36 = vadd.f32 %v5116_v50, %v702_v19 }
 0x1b5   :  { %v2289_v8 = vmul.f32 %v3585_v32, %v5105_v28  ;;  %3598 = vrcp.f32 %v1025_v24  ;;  %v946_v23 = vmul.f32 1.442695, %v834_v4  ;;  %v5271_v25 = vadd.f32 %v5102_v13, %v1842_v12 }
 0x1b6   :  { %3600 = vrcp.f32 %v2165_v58  ;;  %v2086_v17 = vmul.f32 1.442695, %v1974_v62  ;;  %v837_v9 = vsub.f32 0.0, %v5267_v36  ;;  %v700_v44 = vmul.f32 %v5090_v45, %v5722_v54 }
 0x1b7   :  { %v2973_v6 = vpack.c.bf16 %v2289_v8, %v2289_v8  ;;  %3602 = vpow2.f32 %v940_v40  ;;  %v1977_v59 = vsub.f32 0.0, %v5271_v25  ;;  %v1840_v3 = vmul.f32 %v5079_v16, %v5723_v46 }
 0x1b8   :  { %3604 = vpow2.f32 %v2080_v10  ;;  %v952_v28 = vmul.f32 1.442695, %v837_v9  ;;  %v5280_v31 = vadd.f32 %v5116_v50, %v700_v44  ;;  %v705_v52 = vmul.f32 %v5090_v45, %v5724_v18 }
 0x1b9   :  { %v3587_v26 = vpop.eup %3586  ;;  %2609 = vst.msk [vmem:[%s5653_s8 + $0xac] sm:$0xf] %vm1426_vm2, %v2973_v6  ;;  %3606 = vpow2.f32 %v950_v43  ;;  %v2092_v40 = vmul.f32 1.442695, %v1977_v59  ;;  %v5289_v49 = vadd.f32 %v5102_v13, %v1840_v3  ;;  %v1845_v10 = vmul.f32 %v5079_v16, %v5725_v27 }
 0x1ba   :  { %v3589_v38 = vpop.eup %3588  ;;  %v1147_v11 = vmul.f32 %v3587_v26, %v5119_v48  ;;  %3608 = vpow2.f32 %v2090_v35  ;;  %v835_v19 = vsub.f32 0.0, %v5280_v31  ;;  %v5296_v57 = vadd.f32 %v5116_v50, %v705_v52  ;;  %v5726_v26 = vld [vmem:[#allocation4_spill] sm:$0xff] }
 0x1bb   :  { %v3591_v24 = vpop.eup %3590  ;;  %v2287_v4 = vmul.f32 %v3589_v38, %v5129_v53  ;;  %3610 = vpow2.f32 %v946_v23  ;;  %v1975_v43 = vsub.f32 0.0, %v5289_v49  ;;  %v5301_v33 = vadd.f32 %v5102_v13, %v1845_v10  ;;  %v5727_v38 = vld [vmem:[#allocation31_spill] sm:$0xff] }
 0x1bc   :  { %v3593_v12 = vpop.eup %3592  ;;  %v2907_v32 = vpack.c.bf16 %v1147_v11, %v1147_v11  ;;  %v1152_v58 = vmul.f32 %v3591_v24, %v5133_v14  ;;  %3612 = vpow2.f32 %v2086_v17  ;;  %v948_v48 = vmul.f32 1.442695, %v835_v19 }
 0x1bd   :  { %v3595_v35 = vpop.eup %3594  ;;  %v2971_v62 = vpack.c.bf16 %v2287_v4, %v2287_v4  ;;  %v2292_v8 = vmul.f32 %v3593_v12, %v5147_v7  ;;  %3614 = vpow2.f32 %v952_v28  ;;  %v2088_v9 = vmul.f32 1.442695, %v1975_v43 }
 0x1be   :  { %v3597_v54 = vpop.eup %3596  ;;  %1468 = vst.msk [vmem:[%s5652_s7 + $0xa4] sm:$0xf] %vm1426_vm2, %v2907_v32  ;;  %v2912_v53 = vpack.c.bf16 %v1152_v58, %v1152_v58  ;;  %v1150_v23 = vmul.f32 %v3595_v35, %v5150_v61  ;;  %3616 = vpow2.f32 %v2092_v40  ;;  %v840_v14 = vsub.f32 0.0, %v5296_v57  ;;  %v5728_v58 = vld [vmem:[#allocation32_spill] sm:$0xff] }
 0x1bf   :  { %v3599_v17 = vpop.eup %3598  ;;  %2607 = vst.msk [vmem:[%s5653_s8 + $0xa4] sm:$0xf] %vm1426_vm2, %v2971_v62  ;;  %v2976_v7 = vpack.c.bf16 %v2292_v8, %v2292_v8  ;;  %v2290_v44 = vmul.f32 %v3597_v54, %v5163_v30  ;;  %3618 = vpow2.f32 %v948_v48  ;;  %v1980_v6 = vsub.f32 0.0, %v5301_v33 }
 0x1c0   :  { %v3601_v59 = vpop.eup %3600  ;;  %1473 = vst.msk [vmem:[%s5652_s7 + $0xb8] sm:$0xf] %vm1426_vm2, %v2912_v53  ;;  %v2910_v61 = vpack.c.bf16 %v1150_v23, %v1150_v23  ;;  %v1153_v46 = vmul.f32 %v3599_v17, %v5169_v55  ;;  %3620 = vpow2.f32 %v2088_v9  ;;  %v958_v3 = vmul.f32 1.442695, %v840_v14  ;;  %v5729_v9 = vld [vmem:[#allocation33_spill] sm:$0xff] }
 0x1c1   :  { %v3603_v28 = vpop.eup %3602  ;;  %2612 = vst.msk [vmem:[%s5653_s8 + $0xb8] sm:$0xf] %vm1426_vm2, %v2976_v7  ;;  %v2974_v30 = vpack.c.bf16 %v2290_v44, %v2290_v44  ;;  %v2293_v18 = vmul.f32 %v3601_v59, %v5173_v21  ;;  %v2098_v52 = vmul.f32 1.442695, %v1980_v6  ;;  %v703_v40 = vmul.f32 %v5090_v45, %v5726_v26  ;;  %v5730_v26 = vld [vmem:[#allocation34_spill] sm:$0xff] }
 0x1c2   :  { %v3605_v27 = vpop.eup %3604  ;;  %1471 = vst.msk [vmem:[%s5652_s7 + $0xb0] sm:$0xf] %vm1426_vm2, %v2910_v61  ;;  %v2913_v55 = vpack.c.bf16 %v1153_v46, %v1153_v46  ;;  %v1023_v10 = vadd.f32 1.0, %v3603_v28  ;;  %3622 = vpow2.f32 %v958_v3  ;;  %v1843_v11 = vmul.f32 %v5079_v16, %v5727_v38 }
 0x1c3   :  { %v3607_v19 = vpop.eup %3606  ;;  %2610 = vst.msk [vmem:[%s5653_s8 + $0xb0] sm:$0xf] %vm1426_vm2, %v2974_v30  ;;  %v2977_v21 = vpack.c.bf16 %v2293_v18, %v2293_v18  ;;  %v2163_v24 = vadd.f32 1.0, %v3605_v27  ;;  %3624 = vpow2.f32 %v2098_v52  ;;  %v5340_v4 = vadd.f32 %v5116_v50, %v703_v40 }
 0x1c4   :  { %v3609_v43 = vpop.eup %3608  ;;  %1474 = vst.msk [vmem:[%s5652_s7 + $0xbc] sm:$0xf] %vm1426_vm2, %v2913_v55  ;;  %3626 = vrcp.f32 %v1023_v10  ;;  %v1028_v12 = vadd.f32 1.0, %v3607_v19  ;;  %v5347_v32 = vadd.f32 %v5102_v13, %v1843_v11  ;;  %v706_v48 = vmul.f32 %v5090_v45, %v5728_v58 }
 0x1c5   :  { %v3611_v35 = vpop.eup %3610  ;;  %2613 = vst.msk [vmem:[%s5653_s8 + $0xbc] sm:$0xf] %vm1426_vm2, %v2977_v21  ;;  %3628 = vrcp.f32 %v2163_v24  ;;  %v2168_v62 = vadd.f32 1.0, %v3609_v43  ;;  %v838_v8 = vsub.f32 0.0, %v5340_v4  ;;  %v1846_v54 = vmul.f32 %v5079_v16, %v5729_v9 }
 0x1c6   :  { %v3613_v53 = vpop.eup %3612  ;;  %3630 = vrcp.f32 %v1028_v12  ;;  %v1026_v23 = vadd.f32 1.0, %v3611_v35  ;;  %v1978_v14 = vsub.f32 0.0, %v5347_v32  ;;  %v5360_v17 = vadd.f32 %v5116_v50, %v706_v48 }
 0x1c7   :  { %v3615_v7 = vpop.eup %3614  ;;  %3632 = vrcp.f32 %v2168_v62  ;;  %v2166_v44 = vadd.f32 1.0, %v3613_v53  ;;  %v954_v6 = vmul.f32 1.442695, %v838_v8  ;;  %v5363_v59 = vadd.f32 %v5102_v13, %v1846_v54 }
 0x1c8   :  { %v3617_v61 = vpop.eup %3616  ;;  %3634 = vrcp.f32 %v1026_v23  ;;  %v1029_v46 = vadd.f32 1.0, %v3615_v7  ;;  %v2094_v3 = vmul.f32 1.442695, %v1978_v14  ;;  %v841_v28 = vsub.f32 0.0, %v5360_v17 }
 0x1c9   :  { %v3619_v30 = vpop.eup %3618  ;;  %3636 = vrcp.f32 %v2166_v44  ;;  %v2169_v18 = vadd.f32 1.0, %v3617_v61  ;;  %v1981_v52 = vsub.f32 0.0, %v5363_v59  ;;  %v704_v40 = vmul.f32 %v5090_v45, %v5730_v26 }
 0x1ca   :  { %v3621_v27 = vpop.eup %3620  ;;  %3638 = vrcp.f32 %v1029_v46  ;;  %v1027_v55 = vadd.f32 1.0, %v3619_v30  ;;  %v960_v10 = vmul.f32 1.442695, %v841_v28  ;;  %v1844_v38 = vmul.f32 %v5079_v16, %v4694_v15 }
 0x1cb   :  { %3640 = vrcp.f32 %v2169_v18  ;;  %v2167_v11 = vadd.f32 1.0, %v3621_v27  ;;  %v2100_v19 = vmul.f32 1.442695, %v1981_v52  ;;  %v5372_v21 = vadd.f32 %v5116_v50, %v704_v40 }
 0x1cc   :  { %v3623_v24 = vpop.eup %3622  ;;  %3642 = vrcp.f32 %v1027_v55  ;;  %v5375_v43 = vadd.f32 %v5102_v13, %v1844_v38  ;;  %v709_v12 = vmul.f32 %v5090_v45, %v4728_v63  ;;  %v1849_v58 = vmul.f32 %v5079_v16, %v4730_v0 }
 0x1cd   :  { %v3625_v48 = vpop.eup %3624  ;;  %3644 = vrcp.f32 %v2167_v11  ;;  %v1032_v15 = vadd.f32 1.0, %v3623_v24  ;;  %v839_v35 = vsub.f32 0.0, %v5372_v21  ;;  %v707_v62 = vmul.f32 %v5090_v45, %v4740_v41 }
 0x1ce   :  { %v3627_v8 = vpop.eup %3626  ;;  %v2172_v9 = vadd.f32 1.0, %v3625_v48  ;;  %3646 = vpow2.f32 %v954_v6  ;;  %v1979_v54 = vsub.f32 0.0, %v5375_v43  ;;  %v5386_v53 = vadd.f32 %v5116_v50, %v709_v12 }
 0x1cf   :  { %v3629_v63 = vpop.eup %3628  ;;  %v1151_v23 = vmul.f32 %v3627_v8, %v5204_v2  ;;  %3648 = vrcp.f32 %v1032_v15  ;;  %v956_v0 = vmul.f32 1.442695, %v839_v35  ;;  %v5390_v14 = vadd.f32 %v5102_v13, %v1849_v58 }
 0x1d0   :  { %v3631_v7 = vpop.eup %3630  ;;  %v2291_v44 = vmul.f32 %v3629_v63, %v5212_v1  ;;  %3650 = vrcp.f32 %v2172_v9  ;;  %v2096_v41 = vmul.f32 1.442695, %v1979_v54  ;;  %v844_v6 = vsub.f32 0.0, %v5386_v53  ;;  %v5732_v63 = vld [vmem:[#allocation6_spill] sm:$0xff] }
 0x1d1   :  { %v3633_v61 = vpop.eup %3632  ;;  %v2911_v46 = vpack.c.bf16 %v1151_v23, %v1151_v23  ;;  %v1156_v28 = vmul.f32 %v3631_v7, %v5227_v51  ;;  %3652 = vpow2.f32 %v2094_v3  ;;  %v1984_v30 = vsub.f32 0.0, %v5390_v14 }
 0x1d2   :  { %v3635_v2 = vpop.eup %3634  ;;  %v2975_v18 = vpack.c.bf16 %v2291_v44, %v2291_v44  ;;  %v2296_v52 = vmul.f32 %v3633_v61, %v5234_v22  ;;  %3654 = vpow2.f32 %v960_v10  ;;  %v966_v26 = vmul.f32 1.442695, %v844_v6 }
 0x1d3   :  { %v3637_v40 = vpop.eup %3636  ;;  %1472 = vst.msk [vmem:[%s5652_s7 + $0xb4] sm:$0xf] %vm1426_vm2, %v2911_v46  ;;  %v2916_v1 = vpack.c.bf16 %v1156_v28, %v1156_v28  ;;  %v1154_v27 = vmul.f32 %v3635_v2, %v5255_v37  ;;  %3656 = vpow2.f32 %v2100_v19  ;;  %v2106_v51 = vmul.f32 1.442695, %v1984_v30  ;;  %v5731_v19 = vld [vmem:[#allocation5_spill] sm:$0xff] }
 0x1d4   :  { %v3639_v3 = vpop.eup %3638  ;;  %2611 = vst.msk [vmem:[%s5653_s8 + $0xb4] sm:$0xf] %vm1426_vm2, %v2975_v18  ;;  %v2980_v22 = vpack.c.bf16 %v2296_v52, %v2296_v52  ;;  %v2294_v55 = vmul.f32 %v3637_v40, %v5258_v34  ;;  %3658 = vpow2.f32 %v956_v0  ;;  %v5408_v10 = vadd.f32 %v5116_v50, %v707_v62 }
 0x1d5   :  { %v3641_v38 = vpop.eup %3640  ;;  %1477 = vst.msk [vmem:[%s5652_s7 + $0xc8] sm:$0xf] %vm1426_vm2, %v2916_v1  ;;  %v2914_v37 = vpack.c.bf16 %v1154_v27, %v1154_v27  ;;  %v1157_v11 = vmul.f32 %v3639_v3, %v5267_v36  ;;  %3660 = vpow2.f32 %v2096_v41  ;;  %v1847_v24 = vmul.f32 %v5079_v16, %v5731_v19  ;;  %v5733_v41 = vld [vmem:[#allocation7_spill] sm:$0xff]  ;;  %v5734_v27 = vld [vmem:[#allocation8_spill] sm:$0xff] }
 0x1d6   :  { %v3643_v12 = vpop.eup %3642  ;;  %2616 = vst.msk [vmem:[%s5653_s8 + $0xc8] sm:$0xf] %vm1426_vm2, %v2980_v22  ;;  %v2978_v34 = vpack.c.bf16 %v2294_v55, %v2294_v55  ;;  %v2297_v58 = vmul.f32 %v3641_v38, %v5271_v25  ;;  %3662 = vpow2.f32 %v966_v26  ;;  %v842_v48 = vsub.f32 0.0, %v5408_v10 }
 0x1d7   :  { %v3645_v15 = vpop.eup %3644  ;;  %1475 = vst.msk [vmem:[%s5652_s7 + $0xc0] sm:$0xf] %vm1426_vm2, %v2914_v37  ;;  %v2917_v36 = vpack.c.bf16 %v1157_v11, %v1157_v11  ;;  %v1155_v35 = vmul.f32 %v3643_v12, %v5280_v31  ;;  %3664 = vpow2.f32 %v2106_v51  ;;  %v5429_v62 = vadd.f32 %v5102_v13, %v1847_v24 }
 0x1d8   :  { %v3647_v8 = vpop.eup %3646  ;;  %2614 = vst.msk [vmem:[%s5653_s8 + $0xc0] sm:$0xf] %vm1426_vm2, %v2978_v34  ;;  %v2981_v25 = vpack.c.bf16 %v2297_v58, %v2297_v58  ;;  %v2295_v9 = vmul.f32 %v3645_v15, %v5289_v49  ;;  %v962_v54 = vmul.f32 1.442695, %v842_v48  ;;  %v710_v23 = vmul.f32 %v5090_v45, %v5732_v63  ;;  %v5735_v58 = vld [vmem:[#allocation9_spill] sm:$0xff] }
 0x1d9   :  { %v3649_v0 = vpop.eup %3648  ;;  %1478 = vst.msk [vmem:[%s5652_s7 + $0xcc] sm:$0xf] %vm1426_vm2, %v2917_v36  ;;  %v2915_v31 = vpack.c.bf16 %v1155_v35, %v1155_v35  ;;  %v1030_v7 = vadd.f32 1.0, %v3647_v8  ;;  %v1982_v44 = vsub.f32 0.0, %v5429_v62  ;;  %v1850_v6 = vmul.f32 %v5079_v16, %v5733_v41 }
 0x1da   :  { %v3651_v61 = vpop.eup %3650  ;;  %2617 = vst.msk [vmem:[%s5653_s8 + $0xcc] sm:$0xf] %vm1426_vm2, %v2981_v25  ;;  %v2979_v49 = vpack.c.bf16 %v2295_v9, %v2295_v9  ;;  %v1160_v46 = vmul.f32 %v3649_v0, %v5296_v57  ;;  %3666 = vpow2.f32 %v962_v54  ;;  %v5451_v28 = vadd.f32 %v5116_v50, %v710_v23 }
 0x1db   :  { %v3653_v30 = vpop.eup %3652  ;;  %1476 = vst.msk [vmem:[%s5652_s7 + $0xc4] sm:$0xf] %vm1426_vm2, %v2915_v31  ;;  %v2300_v2 = vmul.f32 %v3651_v61, %v5301_v33  ;;  %3668 = vrcp.f32 %v1030_v7  ;;  %v2102_v18 = vmul.f32 1.442695, %v1982_v44  ;;  %v5459_v52 = vadd.f32 %v5102_v13, %v1850_v6 }
 0x1dc   :  { %v3655_v26 = vpop.eup %3654  ;;  %2615 = vst.msk [vmem:[%s5653_s8 + $0xc4] sm:$0xf] %vm1426_vm2, %v2979_v49  ;;  %v2920_v57 = vpack.c.bf16 %v1160_v46, %v1160_v46  ;;  %v2170_v40 = vadd.f32 1.0, %v3653_v30  ;;  %v845_v1 = vsub.f32 0.0, %v5451_v28  ;;  %v708_v51 = vmul.f32 %v5090_v45, %v5734_v27 }
 0x1dd   :  { %v3657_v3 = vpop.eup %3656  ;;  %v2984_v33 = vpack.c.bf16 %v2300_v2, %v2300_v2  ;;  %v1033_v22 = vadd.f32 1.0, %v3655_v26  ;;  %3670 = vpow2.f32 %v2102_v18  ;;  %v1985_v55 = vsub.f32 0.0, %v5459_v52 }
 0x1de   :  { %v3659_v38 = vpop.eup %3658  ;;  %1481 = vst.msk [vmem:[%s5652_s7 + $0xd8] sm:$0xf] %vm1426_vm2, %v2920_v57  ;;  %3672 = vrcp.f32 %v2170_v40  ;;  %v2173_v37 = vadd.f32 1.0, %v3657_v3  ;;  %v968_v11 = vmul.f32 1.442695, %v845_v1  ;;  %v5474_v19 = vadd.f32 %v5116_v50, %v708_v51 }
 0x1df   :  { %v3661_v24 = vpop.eup %3660  ;;  %2620 = vst.msk [vmem:[%s5653_s8 + $0xd8] sm:$0xf] %vm1426_vm2, %v2984_v33  ;;  %3674 = vrcp.f32 %v1033_v22  ;;  %v1031_v12 = vadd.f32 1.0, %v3659_v38  ;;  %v2108_v34 = vmul.f32 1.442695, %v1985_v55  ;;  %v1848_v48 = vmul.f32 %v5079_v16, %v5735_v58 }
 0x1e0   :  { %v3663_v15 = vpop.eup %3662  ;;  %3676 = vrcp.f32 %v2173_v37  ;;  %v2171_v36 = vadd.f32 1.0, %v3661_v24  ;;  %v843_v35 = vsub.f32 0.0, %v5474_v19  ;;  %v713_v8 = vmul.f32 %v5090_v45, %v4836_v5 }
 0x1e1   :  { %v3665_v25 = vpop.eup %3664  ;;  %3678 = vrcp.f32 %v1031_v12  ;;  %v1036_v9 = vadd.f32 1.0, %v3663_v15  ;;  %v5486_v54 = vadd.f32 %v5102_v13, %v1848_v48  ;;  %v1853_v63 = vmul.f32 %v5079_v16, %v4838_v47 }
 0x1e2   :  { %3680 = vrcp.f32 %v2171_v36  ;;  %v2176_v23 = vadd.f32 1.0, %v3665_v25  ;;  %v964_v0 = vmul.f32 1.442695, %v843_v35  ;;  %v5491_v31 = vadd.f32 %v5116_v50, %v713_v8 }
 0x1e3   :  { %3682 = vrcp.f32 %v1036_v9  ;;  %v1983_v7 = vsub.f32 0.0, %v5486_v54  ;;  %v5495_v5 = vadd.f32 %v5102_v13, %v1853_v63  ;;  %v711_v44 = vmul.f32 %v5090_v45, %v4848_v29 }
 0x1e4   :  { %v3667_v41 = vpop.eup %3666  ;;  %3684 = vrcp.f32 %v2176_v23  ;;  %v848_v6 = vsub.f32 0.0, %v5491_v31  ;;  %v1851_v47 = vmul.f32 %v5079_v16, %v4850_v20  ;;  %v714_v61 = vmul.f32 %v5090_v45, %v4859_v56 }
 0x1e5   :  { %v3669_v49 = vpop.eup %3668  ;;  %v1034_v46 = vadd.f32 1.0, %v3667_v41  ;;  %3686 = vpow2.f32 %v968_v11  ;;  %v2104_v30 = vmul.f32 1.442695, %v1983_v7  ;;  %v1988_v2 = vsub.f32 0.0, %v5495_v5 }
 0x1e6   :  { %v1158_v18 = vmul.f32 %v3669_v49, %v5340_v4  ;;  %3688 = vpow2.f32 %v2108_v34  ;;  %v974_v29 = vmul.f32 1.442695, %v848_v6  ;;  %v5507_v26 = vadd.f32 %v5116_v50, %v711_v44 }
 0x1e7   :  { %v3671_v57 = vpop.eup %3670  ;;  %3690 = vrcp.f32 %v1034_v46  ;;  %v2114_v40 = vmul.f32 1.442695, %v1988_v2  ;;  %v5510_v20 = vadd.f32 %v5102_v13, %v1851_v47  ;;  %v5513_v56 = vadd.f32 %v5116_v50, %v714_v61 }
 0x1e8   :  { %v3673_v1 = vpop.eup %3672  ;;  %v2918_v27 = vpack.c.bf16 %v1158_v18, %v1158_v18  ;;  %v2174_v51 = vadd.f32 1.0, %v3671_v57  ;;  %3692 = vpow2.f32 %v964_v0  ;;  %v846_v4 = vsub.f32 0.0, %v5507_v26 }
 0x1e9   :  { %v3675_v3 = vpop.eup %3674  ;;  %v2298_v33 = vmul.f32 %v3673_v1, %v5347_v32  ;;  %3694 = vpow2.f32 %v2104_v30  ;;  %v1986_v22 = vsub.f32 0.0, %v5510_v20  ;;  %v849_v55 = vsub.f32 0.0, %v5513_v56 }
 0x1ea   :  { %v3677_v38 = vpop.eup %3676  ;;  %1479 = vst.msk [vmem:[%s5652_s7 + $0xd0] sm:$0xf] %vm1426_vm2, %v2918_v27  ;;  %v1161_v37 = vmul.f32 %v3675_v3, %v5360_v17  ;;  %3696 = vrcp.f32 %v2174_v51  ;;  %v970_v11 = vmul.f32 1.442695, %v846_v4  ;;  %v1854_v24 = vmul.f32 %v5079_v16, %v4861_v39 }
 0x1eb   :  { %v3679_v12 = vpop.eup %3678  ;;  %v2982_v32 = vpack.c.bf16 %v2298_v33, %v2298_v33  ;;  %v2301_v34 = vmul.f32 %v3677_v38, %v5363_v59  ;;  %3698 = vpow2.f32 %v974_v29  ;;  %v2110_v58 = vmul.f32 1.442695, %v1986_v22 }
 0x1ec   :  { %v3681_v48 = vpop.eup %3680  ;;  %v2921_v15 = vpack.c.bf16 %v1161_v37, %v1161_v37  ;;  %v1159_v36 = vmul.f32 %v3679_v12, %v5372_v21  ;;  %3700 = vpow2.f32 %v2114_v40  ;;  %v976_v35 = vmul.f32 1.442695, %v849_v55 }
 0x1ed   :  { %v3683_v8 = vpop.eup %3682  ;;  %2618 = vst.msk [vmem:[%s5653_s8 + $0xd0] sm:$0xf] %vm1426_vm2, %v2982_v32  ;;  %v2985_v17 = vpack.c.bf16 %v2301_v34, %v2301_v34  ;;  %v2299_v39 = vmul.f32 %v3681_v48, %v5375_v43  ;;  %3702 = vpow2.f32 %v970_v11  ;;  %v5534_v59 = vadd.f32 %v5102_v13, %v1854_v24 }
 0x1ee   :  { %v3685_v25 = vpop.eup %3684  ;;  %1482 = vst.msk [vmem:[%s5652_s7 + $0xdc] sm:$0xf] %vm1426_vm2, %v2921_v15  ;;  %v2919_v21 = vpack.c.bf16 %v1159_v36, %v1159_v36  ;;  %v1164_v9 = vmul.f32 %v3683_v8, %v5386_v53  ;;  %3704 = vpow2.f32 %v2110_v58  ;;  %v712_v63 = vmul.f32 %v5090_v45, %v4895_v60 }
 0x1ef   :  { %v3687_v23 = vpop.eup %3686  ;;  %2621 = vst.msk [vmem:[%s5653_s8 + $0xdc] sm:$0xf] %vm1426_vm2, %v2985_v17  ;;  %v2983_v43 = vpack.c.bf16 %v2299_v39, %v2299_v39  ;;  %v2304_v0 = vmul.f32 %v3685_v25, %v5390_v14  ;;  %3706 = vpow2.f32 %v976_v35  ;;  %v1989_v7 = vsub.f32 0.0, %v5534_v59 }
 0x1f0   :  { %v3689_v44 = vpop.eup %3688  ;;  %1480 = vst.msk [vmem:[%s5652_s7 + $0xd4] sm:$0xf] %vm1426_vm2, %v2919_v21  ;;  %v2924_v53 = vpack.c.bf16 %v1164_v9, %v1164_v9  ;;  %v1037_v60 = vadd.f32 1.0, %v3687_v23  ;;  %v5554_v45 = vadd.f32 %v5116_v50, %v712_v63  ;;  %v1852_v41 = vmul.f32 %v5079_v16, %v4904_v42 }
 0x1f1   :  { %v3691_v6 = vpop.eup %3690  ;;  %2619 = vst.msk [vmem:[%s5653_s8 + $0xd4] sm:$0xf] %vm1426_vm2, %v2983_v43  ;;  %v2988_v14 = vpack.c.bf16 %v2304_v0, %v2304_v0  ;;  %v2177_v47 = vadd.f32 1.0, %v3689_v44  ;;  %v2116_v61 = vmul.f32 1.442695, %v1989_v7 }
 0x1f2   :  { %v3693_v49 = vpop.eup %3692  ;;  %1485 = vst.msk [vmem:[%s5652_s7 + $0xe8] sm:$0xf] %vm1426_vm2, %v2924_v53  ;;  %v1162_v50 = vmul.f32 %v3691_v6, %v5408_v10  ;;  %3708 = vrcp.f32 %v1037_v60  ;;  %v847_v42 = vsub.f32 0.0, %v5554_v45  ;;  %v5569_v16 = vadd.f32 %v5102_v13, %v1852_v41 }
 0x1f3   :  { %v3695_v46 = vpop.eup %3694  ;;  %2624 = vst.msk [vmem:[%s5653_s8 + $0xe8] sm:$0xf] %vm1426_vm2, %v2988_v14  ;;  %3710 = vrcp.f32 %v2177_v47  ;;  %v1035_v30 = vadd.f32 1.0, %v3693_v49 }
 0x1f4   :  { %v3697_v2 = vpop.eup %3696  ;;  %v2922_v18 = vpack.c.bf16 %v1162_v50, %v1162_v50  ;;  %v2175_v29 = vadd.f32 1.0, %v3695_v46  ;;  %3712 = vpow2.f32 %v2116_v61  ;;  %v972_v57 = vmul.f32 1.442695, %v847_v42 }
 0x1f5   :  { %v3699_v10 = vpop.eup %3698  ;;  %v2302_v40 = vmul.f32 %v3697_v2, %v5429_v62  ;;  %3714 = vrcp.f32 %v1035_v30  ;;  %v1987_v13 = vsub.f32 0.0, %v5569_v16 }
 0x1f6   :  { %v3701_v1 = vpop.eup %3700  ;;  %1483 = vst.msk [vmem:[%s5652_s7 + $0xe0] sm:$0xf] %vm1426_vm2, %v2922_v18  ;;  %3716 = vrcp.f32 %v2175_v29  ;;  %v1040_v27 = vadd.f32 1.0, %v3699_v10 }
 0x1f7   :  { %v3703_v51 = vpop.eup %3702  ;;  %v2986_v4 = vpack.c.bf16 %v2302_v40, %v2302_v40  ;;  %v2180_v3 = vadd.f32 1.0, %v3701_v1  ;;  %3718 = vpow2.f32 %v972_v57  ;;  %v2112_v38 = vmul.f32 1.442695, %v1987_v13 }
 0x1f8   :  { %v3705_v33 = vpop.eup %3704  ;;  %3720 = vrcp.f32 %v1040_v27  ;;  %v1038_v22 = vadd.f32 1.0, %v3703_v51 }
 0x1f9   :  { %v3707_v55 = vpop.eup %3706  ;;  %2622 = vst.msk [vmem:[%s5653_s8 + $0xe0] sm:$0xf] %vm1426_vm2, %v2986_v4  ;;  %3722 = vrcp.f32 %v2180_v3  ;;  %v2178_v62 = vadd.f32 1.0, %v3705_v33 }
 0x1fa   :  { %3724 = vrcp.f32 %v1038_v22  ;;  %v1041_v37 = vadd.f32 1.0, %v3707_v55 }
 0x1fb   :  { %3726 = vrcp.f32 %v2178_v62 }
 0x1fc   :  { %v3709_v11 = vpop.eup %3708  ;;  %3728 = vrcp.f32 %v1041_v37 }
 0x1fd   :  { %v3711_v24 = vpop.eup %3710  ;;  %v1165_v12 = vmul.f32 %v3709_v11, %v5451_v28  ;;  %3730 = vpow2.f32 %v2112_v38 }
 0x1fe   :  { %v3713_v32 = vpop.eup %3712  ;;  %v2305_v34 = vmul.f32 %v3711_v24, %v5459_v52 }
 0x1ff   :  { %v3715_v58 = vpop.eup %3714  ;;  %v2925_v48 = vpack.c.bf16 %v1165_v12, %v1165_v12  ;;  %v2181_v15 = vadd.f32 1.0, %v3713_v32 }
 0x200   :  { %v3717_v36 = vpop.eup %3716  ;;  %v2989_v35 = vpack.c.bf16 %v2305_v34, %v2305_v34  ;;  %v1163_v8 = vmul.f32 %v3715_v58, %v5474_v19 }
 0x201   :  { %v3719_v17 = vpop.eup %3718  ;;  %1486 = vst.msk [vmem:[%s5652_s7 + $0xec] sm:$0xf] %vm1426_vm2, %v2925_v48  ;;  %v2303_v39 = vmul.f32 %v3717_v36, %v5486_v54  ;;  %3732 = vrcp.f32 %v2181_v15 }
 0x202   :  { %v3721_v28 = vpop.eup %3720  ;;  %2625 = vst.msk [vmem:[%s5653_s8 + $0xec] sm:$0xf] %vm1426_vm2, %v2989_v35  ;;  %v2923_v52 = vpack.c.bf16 %v1163_v8, %v1163_v8  ;;  %v1039_v25 = vadd.f32 1.0, %v3719_v17 }
 0x203   :  { %v3723_v21 = vpop.eup %3722  ;;  %v2987_v9 = vpack.c.bf16 %v2303_v39, %v2303_v39  ;;  %v1168_v19 = vmul.f32 %v3721_v28, %v5491_v31 }
 0x204   :  { %v3725_v63 = vpop.eup %3724  ;;  %1484 = vst.msk [vmem:[%s5652_s7 + $0xe4] sm:$0xf] %vm1426_vm2, %v2923_v52  ;;  %v2308_v54 = vmul.f32 %v3723_v21, %v5495_v5  ;;  %3734 = vrcp.f32 %v1039_v25 }
 0x205   :  { %v3727_v23 = vpop.eup %3726  ;;  %2623 = vst.msk [vmem:[%s5653_s8 + $0xe4] sm:$0xf] %vm1426_vm2, %v2987_v9  ;;  %v2928_v43 = vpack.c.bf16 %v1168_v19, %v1168_v19  ;;  %v1166_v0 = vmul.f32 %v3725_v63, %v5507_v26 }
 0x206   :  { %v3729_v7 = vpop.eup %3728  ;;  %v2992_v31 = vpack.c.bf16 %v2308_v54, %v2308_v54  ;;  %v2306_v44 = vmul.f32 %v3727_v23, %v5510_v20 }
 0x207   :  { %v3731_v53 = vpop.eup %3730  ;;  %1489 = vst.msk [vmem:[%s5652_s7 + $0xf8] sm:$0xf] %vm1426_vm2, %v2928_v43  ;;  %v2926_v5 = vpack.c.bf16 %v1166_v0, %v1166_v0  ;;  %v1169_v60 = vmul.f32 %v3729_v7, %v5513_v56 }
 0x208   :  { %2628 = vst.msk [vmem:[%s5653_s8 + $0xf8] sm:$0xf] %vm1426_vm2, %v2992_v31  ;;  %v2990_v41 = vpack.c.bf16 %v2306_v44, %v2306_v44  ;;  %v2179_v26 = vadd.f32 1.0, %v3731_v53 }
 0x209   :  { %1487 = vst.msk [vmem:[%s5652_s7 + $0xf0] sm:$0xf] %vm1426_vm2, %v2926_v5  ;;  %v2929_v20 = vpack.c.bf16 %v1169_v60, %v1169_v60 }
 0x20a   :  { %2626 = vst.msk [vmem:[%s5653_s8 + $0xf0] sm:$0xf] %vm1426_vm2, %v2990_v41  ;;  %3736 = vrcp.f32 %v2179_v26 }
 0x20b   :  { %v3733_v56 = vpop.eup %3732  ;;  %1490 = vst.msk [vmem:[%s5652_s7 + $0xfc] sm:$0xf] %vm1426_vm2, %v2929_v20 }
 0x20c   :  { %v2309_v6 = vmul.f32 %v3733_v56, %v5534_v59 }
 0x20e   :  { %v3735_v14 = vpop.eup %3734  ;;  %v2993_v47 = vpack.c.bf16 %v2309_v6, %v2309_v6 }
 0x20f   :  { %v1167_v61 = vmul.f32 %v3735_v14, %v5554_v45 }
 0x210   :  { %2629 = vst.msk [vmem:[%s5653_s8 + $0xfc] sm:$0xf] %vm1426_vm2, %v2993_v47 }
 0x211   :  { %v2927_v49 = vpack.c.bf16 %v1167_v61, %v1167_v61 }
 0x213   :  { %1488 = vst.msk [vmem:[%s5652_s7 + $0xf4] sm:$0xf] %vm1426_vm2, %v2927_v49 }
 0x214   :  { %v3737_v50 = vpop.eup %3736 }
 0x215   :  { %v2307_v42 = vmul.f32 %v3737_v50, %v5569_v16 }
 0x217   :  { %v2991_v46 = vpack.c.bf16 %v2307_v42, %v2307_v42 }
 0x219   :  { %2627 = vst.msk [vmem:[%s5653_s8 + $0xf4] sm:$0xf] %vm1426_vm2, %v2991_v46 }

// kernel: c2f_forward.7
= control target key start
LH: loop header
LB: loop body
LE: loop exit
PB: predicated region body
PF: predicated region fallthrough
CT: control target
= control target key end

     0   :  { %vm417_vm0 = vcmask 1041408   ;;  %vm320_vm1 = vcmask 31744   ;;  %vm2461_vm2 = vcmask 64512   ;;  %s4812_s4 = inlined_call_operand.vmem [shape: bf16[4,8], index: 4, kind: input, shape index: {}]   ;;  %s4813_s3 = inlined_call_operand.vmem [shape: bf16[4,8], index: 3, kind: input, shape index: {}]   ;;  %s4814_s1 = inlined_call_operand.vmem [shape: bf16[512,4], index: 1, kind: input, shape index: {}]   ;;  %s4815_s0 = inlined_call_operand.vmem [shape: bf16[512,4], index: 0, kind: input, shape index: {}]   ;;  %s4816_s5 = inlined_call_operand.vmem [shape: bf16[4,8], index: 5, kind: input, shape index: {}]   ;;  %s4817_s2 = inlined_call_operand.vmem [shape: bf16[512,4], index: 2, kind: input, shape index: {}]   ;;  %s4818_s6 = inlined_call_operand.vmem [shape: f32[1,8], index: 6, kind: input, shape index: {}]   ;;  %s4819_s7 = inlined_call_operand.vmem [shape: f32[1,8], index: 7, kind: input, shape index: {}]   ;;  %s4820_s8 = inlined_call_operand.vmem [shape: f32[512,8], index: 8, kind: output, shape index: {}]  }
   0x1   :  { %v159_v0 = vld [vmem:[%s4812_s4] sm:$0x3]  ;;  %v3157_v6 = vld [vmem:[%s4814_s1 + $0x8] sm:$0xff]   ;;  %v3159_v10 = vld [vmem:[%s4814_s1 + $0x10] sm:$0xff]  }
   0x2   :  { %v94_v1 = vld [vmem:[%s4813_s3] sm:$0x3]  ;;  %3151 = vmatprep.subr.msk.bf16.mxu1 %vm417_vm0, %v159_v0  ;;  %v419_v2 = vsel %vm417_vm0, %v159_v0, 0  ;;  %v3158_v7 = vld [vmem:[%s4815_s0 + $0x8] sm:$0xff]   ;;  %v3160_v11 = vld [vmem:[%s4815_s0 + $0x10] sm:$0xff]  }
   0x3   :  { %3152 = vmatprep.subr.msk.bf16.mxu0 %vm417_vm0, %v94_v1  ;;  %v967_v3 = vsel %vm417_vm0, %v94_v1, 0  ;;  %v3155_v4 = vld [vmem:[%s4814_s1] sm:$0xff]   ;;  %2824 = vmatpush3.bf16.msra.mxu1 %v419_v2  ;;  %v3161_v12 = vld [vmem:[%s4814_s1 + $0x18] sm:$0xff]   ;;  %v3165_v16 = vld [vmem:[%s4814_s1 + $0x28] sm:$0xff]  }
   0x4   :  { %v3156_v5 = vld [vmem:[%s4815_s0] sm:$0xff]   ;;  %2890 = vmatpush3.bf16.msra.mxu0 %v967_v3  ;;  %2825 = vmatprep.mubr.msk.bf16.mxu1 %vm320_vm1, %v3155_v4  ;;  %v3162_v13 = vld [vmem:[%s4815_s0 + $0x18] sm:$0xff]   ;;  %v3166_v17 = vld [vmem:[%s4815_s0 + $0x28] sm:$0xff]  }
   0x5   :  { %2891 = vmatprep.mubr.msk.bf16.mxu0 %vm320_vm1, %v3156_v5  ;;  %3153 = vmatprep.subr.msk.bf16.mxu1 %vm417_vm0, %v94_v1  ;;  %v1322_v8 = vld [vmem:[%s4816_s5] sm:$0x3]  ;;  %v3167_v18 = vld [vmem:[%s4814_s1 + $0x30] sm:$0xff]   ;;  %v3169_v20 = vld [vmem:[%s4814_s1 + $0x38] sm:$0xff]  }
   0x6   :  { %2826 = vmatmul.mubr.msk.bf16.vlgmr.msra.gmra.mrb[0].mxu1 %vm320_vm1, %v3157_v6  ;;  %3154 = vmatprep.subr.msk.bf16.mxu0 %vm417_vm0, %v1322_v8  ;;  %v1580_v9 = vsel %vm417_vm0, %v1322_v8, 0  ;;  %v3163_v14 = vld [vmem:[%s4814_s1 + $0x20] sm:$0xff]   ;;  %v3168_v19 = vld [vmem:[%s4815_s0 + $0x30] sm:$0xff]   ;;  %v3170_v21 = vld [vmem:[%s4815_s0 + $0x38] sm:$0xff]  }
   0x7   :  { %2892 = vmatmul.mubr.msk.bf16.vlgmr.msra.gmra.mrb[0].mxu0 %vm320_vm1, %v3158_v7  ;;  %3022 = vmatpush3.bf16.msra.mxu1 %v967_v3  ;;  %v3164_v15 = vld [vmem:[%s4815_s0 + $0x20] sm:$0xff]   ;;  %v3173_v24 = vld [vmem:[%s4814_s1 + $0x48] sm:$0xff]   ;;  %v3175_v26 = vld [vmem:[%s4814_s1 + $0x50] sm:$0xff]  }
   0x8   :  { %2956 = vmatpush3.bf16.msra.mxu0 %v1580_v9  ;;  %2829 = vmatprep.mubr.msk.bf16.mxu1 %vm320_vm1, %v3159_v10  ;;  %v3171_v22 = vld [vmem:[%s4814_s1 + $0x40] sm:$0xff]   ;;  %v3174_v25 = vld [vmem:[%s4815_s0 + $0x48] sm:$0xff]   ;;  %v3176_v27 = vld [vmem:[%s4815_s0 + $0x50] sm:$0xff]  }
   0x9   :  { %2895 = vmatprep.mubr.msk.bf16.mxu0 %vm320_vm1, %v3160_v11  ;;  %v3172_v23 = vld [vmem:[%s4815_s0 + $0x40] sm:$0xff]   ;;  %v3177_v28 = vld [vmem:[%s4814_s1 + $0x58] sm:$0xff]   ;;  %v3181_v32 = vld [vmem:[%s4814_s1 + $0x68] sm:$0xff]  }
   0xa   :  { %v3178_v29 = vld [vmem:[%s4815_s0 + $0x58] sm:$0xff]   ;;  %v3179_v30 = vld [vmem:[%s4814_s1 + $0x60] sm:$0xff]   ;;  %v3182_v33 = vld [vmem:[%s4815_s0 + $0x68] sm:$0xff]  }
   0xb   :  { %v3180_v31 = vld [vmem:[%s4815_s0 + $0x60] sm:$0xff]   ;;  %v3183_v34 = vld [vmem:[%s4814_s1 + $0x70] sm:$0xff]   ;;  %v3185_v36 = vld [vmem:[%s4814_s1 + $0x78] sm:$0xff]  }
   0xc   :  { %v3184_v35 = vld [vmem:[%s4815_s0 + $0x70] sm:$0xff]   ;;  %v3186_v37 = vld [vmem:[%s4815_s0 + $0x78] sm:$0xff]   ;;  %v3187_v38 = vld [vmem:[%s4814_s1 + $0x80] sm:$0xff]  }
   0xd   :  { %v3188_v39 = vld [vmem:[%s4817_s2] sm:$0xff]   ;;  %v3189_v40 = vld [vmem:[%s4814_s1 + $0x88] sm:$0xff]   ;;  %v3191_v42 = vld [vmem:[%s4814_s1 + $0x90] sm:$0xff]  }
   0xe   :  { %2830 = vmatmul.mubr.msk.bf16.gmra.mrb[4].mxu1 %vm320_vm1, %v3161_v12  ;;  %v3190_v41 = vld [vmem:[%s4817_s2 + $0x8] sm:$0xff]   ;;  %v3192_v43 = vld [vmem:[%s4817_s2 + $0x10] sm:$0xff]   ;;  %v3193_v44 = vld [vmem:[%s4814_s1 + $0x98] sm:$0xff]  }
   0xf   :  { %2896 = vmatmul.mubr.msk.bf16.gmra.mrb[4].mxu0 %vm320_vm1, %v3162_v13  ;;  %2833 = vmatprep.mubr.msk.bf16.mxu1 %vm320_vm1, %v3163_v14  ;;  %v3194_v45 = vld [vmem:[%s4817_s2 + $0x18] sm:$0xff]   ;;  %v3195_v46 = vld [vmem:[%s4814_s1 + $0xa0] sm:$0xff]   ;;  %v3197_v48 = vld [vmem:[%s4814_s1 + $0xa8] sm:$0xff]  }
  0x10   :  { %2899 = vmatprep.mubr.msk.bf16.mxu0 %vm320_vm1, %v3164_v15  ;;  %v3196_v47 = vld [vmem:[%s4817_s2 + $0x20] sm:$0xff]   ;;  %v3198_v49 = vld [vmem:[%s4817_s2 + $0x28] sm:$0xff]   ;;  %v3199_v50 = vld [vmem:[%s4814_s1 + $0xb0] sm:$0xff]  }
  0x11   :  { %v3200_v51 = vld [vmem:[%s4817_s2 + $0x30] sm:$0xff]   ;;  %v3201_v52 = vld [vmem:[%s4814_s1 + $0xb8] sm:$0xff]   ;;  %v3203_v54 = vld [vmem:[%s4814_s1 + $0xc0] sm:$0xff]  }
  0x12   :  { %v3202_v53 = vld [vmem:[%s4817_s2 + $0x38] sm:$0xff]   ;;  %v3204_v55 = vld [vmem:[%s4817_s2 + $0x40] sm:$0xff]   ;;  %v3205_v56 = vld [vmem:[%s4814_s1 + $0xc8] sm:$0xff]  }
  0x13   :  { %v3206_v57 = vld [vmem:[%s4817_s2 + $0x48] sm:$0xff]   ;;  %v3207_v58 = vld [vmem:[%s4814_s1 + $0xd0] sm:$0xff]   ;;  %v3209_v60 = vld [vmem:[%s4814_s1 + $0xd8] sm:$0xff]  }
  0x14   :  { %v3208_v59 = vld [vmem:[%s4817_s2 + $0x50] sm:$0xff]   ;;  %v3210_v61 = vld [vmem:[%s4817_s2 + $0x58] sm:$0xff]   ;;  %v3211_v62 = vld [vmem:[%s4814_s1 + $0xe0] sm:$0xff]  }
  0x15   :  { %v3212_v63 = vld [vmem:[%s4817_s2 + $0x60] sm:$0xff]   ;;  %v3213_v0 = vld [vmem:[%s4814_s1 + $0xe8] sm:$0xff]   ;;  %v3215_v2 = vld [vmem:[%s4814_s1 + $0xf0] sm:$0xff]  }
  0x16   :  { %2834 = vmatmul.mubr.msk.bf16.gmra.mrb[8].mxu1 %vm320_vm1, %v3165_v16  ;;  %v3214_v1 = vld [vmem:[%s4817_s2 + $0x68] sm:$0xff]   ;;  %v3216_v3 = vld [vmem:[%s4817_s2 + $0x70] sm:$0xff]   ;;  %v3217_v4 = vld [vmem:[%s4814_s1 + $0xf8] sm:$0xff]  }
  0x17   :  { %2900 = vmatmul.mubr.msk.bf16.gmra.mrb[8].mxu0 %vm320_vm1, %v3166_v17  ;;  %2837 = vmatprep.mubr.msk.bf16.mxu1 %vm320_vm1, %v3167_v18  ;;  %v3218_v5 = vld [vmem:[%s4817_s2 + $0x78] sm:$0xff]   ;;  %v3219_v6 = vld [vmem:[%s4815_s0 + $0x80] sm:$0xff]   ;;  %v3221_v8 = vld [vmem:[%s4815_s0 + $0x88] sm:$0xff]  }
  0x18   :  { %2903 = vmatprep.mubr.msk.bf16.mxu0 %vm320_vm1, %v3168_v19  ;;  %v3220_v7 = vld [vmem:[%s4817_s2 + $0x80] sm:$0xff]   ;;  %v3222_v9 = vld [vmem:[%s4817_s2 + $0x88] sm:$0xff]   ;;  %v3223_v10 = vld [vmem:[%s4815_s0 + $0x90] sm:$0xff]  }
  0x19   :  { %v3224_v11 = vld [vmem:[%s4817_s2 + $0x90] sm:$0xff]   ;;  %v3225_v12 = vld [vmem:[%s4815_s0 + $0x98] sm:$0xff]   ;;  %v3227_v14 = vld [vmem:[%s4815_s0 + $0xa0] sm:$0xff]  }
  0x1a   :  { %v3226_v13 = vld [vmem:[%s4817_s2 + $0x98] sm:$0xff]   ;;  %v3228_v15 = vld [vmem:[%s4817_s2 + $0xa0] sm:$0xff]   ;;  %v3229_v16 = vld [vmem:[%s4815_s0 + $0xa8] sm:$0xff]  }
  0x1b   :  { %v3230_v17 = vld [vmem:[%s4817_s2 + $0xa8] sm:$0xff]   ;;  %v3231_v18 = vld [vmem:[%s4815_s0 + $0xb0] sm:$0xff]  }
  0x1c   :  { %v3232_v19 = vld [vmem:[%s4817_s2 + $0xb0] sm:$0xff]  }
  0x1e   :  { %2838 = vmatmul.mubr.msk.bf16.gmra.mrb[12].mxu1 %vm320_vm1, %v3169_v20  ;;  %v3233_v20 = vld [vmem:[%s4815_s0 + $0xb8] sm:$0xff]  }
  0x1f   :  { %2904 = vmatmul.mubr.msk.bf16.gmra.mrb[12].mxu0 %vm320_vm1, %v3170_v21  ;;  %2841 = vmatprep.mubr.msk.bf16.mxu1 %vm320_vm1, %v3171_v22  ;;  %v3234_v21 = vld [vmem:[%s4817_s2 + $0xb8] sm:$0xff]   ;;  %v3235_v22 = vld [vmem:[%s4815_s0 + $0xc0] sm:$0xff]  }
  0x20   :  { %2907 = vmatprep.mubr.msk.bf16.mxu0 %vm320_vm1, %v3172_v23  ;;  %v3236_v23 = vld [vmem:[%s4817_s2 + $0xc0] sm:$0xff]  }
  0x26   :  { %2842 = vmatmul.mubr.msk.bf16.gmra.mrb[16].mxu1 %vm320_vm1, %v3173_v24  ;;  %v3237_v24 = vld [vmem:[%s4815_s0 + $0xc8] sm:$0xff]  }
  0x27   :  { %2908 = vmatmul.mubr.msk.bf16.gmra.mrb[16].mxu0 %vm320_vm1, %v3174_v25  ;;  %2845 = vmatprep.mubr.msk.bf16.mxu1 %vm320_vm1, %v3175_v26  ;;  %v3238_v25 = vld [vmem:[%s4817_s2 + $0xc8] sm:$0xff]   ;;  %v3239_v26 = vld [vmem:[%s4815_s0 + $0xd0] sm:$0xff]  }
  0x28   :  { %2911 = vmatprep.mubr.msk.bf16.mxu0 %vm320_vm1, %v3176_v27  ;;  %v3240_v27 = vld [vmem:[%s4817_s2 + $0xd0] sm:$0xff]  }
  0x2e   :  { %2846 = vmatmul.mubr.msk.bf16.gmra.mrb[20].mxu1 %vm320_vm1, %v3177_v28  ;;  %v3241_v28 = vld [vmem:[%s4815_s0 + $0xd8] sm:$0xff]  }
  0x2f   :  { %2912 = vmatmul.mubr.msk.bf16.gmra.mrb[20].mxu0 %vm320_vm1, %v3178_v29  ;;  %2849 = vmatprep.mubr.msk.bf16.mxu1 %vm320_vm1, %v3179_v30  ;;  %v3242_v29 = vld [vmem:[%s4817_s2 + $0xd8] sm:$0xff]   ;;  %v3243_v30 = vld [vmem:[%s4815_s0 + $0xe0] sm:$0xff]  }
  0x30   :  { %2915 = vmatprep.mubr.msk.bf16.mxu0 %vm320_vm1, %v3180_v31  ;;  %v3244_v31 = vld [vmem:[%s4817_s2 + $0xe0] sm:$0xff]  }
  0x36   :  { %2850 = vmatmul.mubr.msk.bf16.gmra.mrb[24].mxu1 %vm320_vm1, %v3181_v32  ;;  %v3245_v32 = vld [vmem:[%s4815_s0 + $0xe8] sm:$0xff]  }
  0x37   :  { %2916 = vmatmul.mubr.msk.bf16.gmra.mrb[24].mxu0 %vm320_vm1, %v3182_v33  ;;  %2853 = vmatprep.mubr.msk.bf16.mxu1 %vm320_vm1, %v3183_v34  ;;  %v3246_v33 = vld [vmem:[%s4817_s2 + $0xe8] sm:$0xff]   ;;  %v3247_v34 = vld [vmem:[%s4815_s0 + $0xf0] sm:$0xff]  }
  0x38   :  { %2919 = vmatprep.mubr.msk.bf16.mxu0 %vm320_vm1, %v3184_v35  ;;  %v3248_v35 = vld [vmem:[%s4817_s2 + $0xf0] sm:$0xff]  }
  0x3e   :  { %2854 = vmatmul.mubr.msk.bf16.gmra.mrb[28].mxu1 %vm320_vm1, %v3185_v36  ;;  %v3249_v36 = vld [vmem:[%s4815_s0 + $0xf8] sm:$0xff]  }
  0x3f   :  { %2920 = vmatmul.mubr.msk.bf16.gmra.mrb[28].mxu0 %vm320_vm1, %v3186_v37  ;;  %2857 = vmatprep.mubr.msk.bf16.mxu1 %vm320_vm1, %v3187_v38  ;;  %v3250_v37 = vld [vmem:[%s4817_s2 + $0xf8] sm:$0xff]  }
  0x40   :  { %2957 = vmatprep.mubr.msk.bf16.mxu0 %vm320_vm1, %v3188_v39 }
  0x46   :  { %2858 = vmatmul.mubr.msk.bf16.gmra.mrb[32].mxu1 %vm320_vm1, %v3189_v40 }
  0x47   :  { %2958 = vmatmul.mubr.msk.bf16.vlgmr.msra.gmra.mrb[0].mxu0 %vm320_vm1, %v3190_v41  ;;  %2861 = vmatprep.mubr.msk.bf16.mxu1 %vm320_vm1, %v3191_v42 }
  0x48   :  { %2961 = vmatprep.mubr.msk.bf16.mxu0 %vm320_vm1, %v3192_v43 }
  0x4e   :  { %2862 = vmatmul.mubr.msk.bf16.gmra.mrb[36].mxu1 %vm320_vm1, %v3193_v44 }
  0x4f   :  { %2962 = vmatmul.mubr.msk.bf16.gmra.mrb[4].mxu0 %vm320_vm1, %v3194_v45  ;;  %2865 = vmatprep.mubr.msk.bf16.mxu1 %vm320_vm1, %v3195_v46 }
  0x50   :  { %2965 = vmatprep.mubr.msk.bf16.mxu0 %vm320_vm1, %v3196_v47 }
  0x56   :  { %2866 = vmatmul.mubr.msk.bf16.gmra.mrb[40].mxu1 %vm320_vm1, %v3197_v48 }
  0x57   :  { %2966 = vmatmul.mubr.msk.bf16.gmra.mrb[8].mxu0 %vm320_vm1, %v3198_v49  ;;  %2869 = vmatprep.mubr.msk.bf16.mxu1 %vm320_vm1, %v3199_v50 }
  0x58   :  { %2969 = vmatprep.mubr.msk.bf16.mxu0 %vm320_vm1, %v3200_v51 }
  0x5e   :  { %2870 = vmatmul.mubr.msk.bf16.gmra.mrb[44].mxu1 %vm320_vm1, %v3201_v52 }
  0x5f   :  { %2970 = vmatmul.mubr.msk.bf16.gmra.mrb[12].mxu0 %vm320_vm1, %v3202_v53  ;;  %2873 = vmatprep.mubr.msk.bf16.mxu1 %vm320_vm1, %v3203_v54 }
  0x60   :  { %2973 = vmatprep.mubr.msk.bf16.mxu0 %vm320_vm1, %v3204_v55 }
  0x66   :  { %2874 = vmatmul.mubr.msk.bf16.gmra.mrb[48].mxu1 %vm320_vm1, %v3205_v56 }
  0x67   :  { %2974 = vmatmul.mubr.msk.bf16.gmra.mrb[16].mxu0 %vm320_vm1, %v3206_v57  ;;  %2877 = vmatprep.mubr.msk.bf16.mxu1 %vm320_vm1, %v3207_v58 }
  0x68   :  { %2977 = vmatprep.mubr.msk.bf16.mxu0 %vm320_vm1, %v3208_v59 }
  0x6e   :  { %2878 = vmatmul.mubr.msk.bf16.gmra.mrb[52].mxu1 %vm320_vm1, %v3209_v60 }
  0x6f   :  { %2978 = vmatmul.mubr.msk.bf16.gmra.mrb[20].mxu0 %vm320_vm1, %v3210_v61  ;;  %2881 = vmatprep.mubr.msk.bf16.mxu1 %vm320_vm1, %v3211_v62 }
  0x70   :  { %2981 = vmatprep.mubr.msk.bf16.mxu0 %vm320_vm1, %v3212_v63 }
  0x76   :  { %2882 = vmatmul.mubr.msk.bf16.gmra.mrb[56].mxu1 %vm320_vm1, %v3213_v0 }
  0x77   :  { %2982 = vmatmul.mubr.msk.bf16.gmra.mrb[24].mxu0 %vm320_vm1, %v3214_v1  ;;  %2885 = vmatprep.mubr.msk.bf16.mxu1 %vm320_vm1, %v3215_v2 }
  0x78   :  { %2985 = vmatprep.mubr.msk.bf16.mxu0 %vm320_vm1, %v3216_v3 }
  0x7e   :  { %2886 = vmatmul.mubr.msk.bf16.gmra.mrb[60].mxu1 %vm320_vm1, %v3217_v4 }
  0x7f   :  { %2986 = vmatmul.mubr.msk.bf16.gmra.mrb[28].mxu0 %vm320_vm1, %v3218_v5  ;;  %2923 = vmatprep.mubr.msk.bf16.mxu1 %vm320_vm1, %v3219_v6 }
  0x80   :  { %2989 = vmatprep.mubr.msk.bf16.mxu0 %vm320_vm1, %v3220_v7  ;;  %v4007_v7 = vld [vmem:[%s4818_s6] ss:$0 sm:$0xff] }
  0x86   :  { %2924 = vmatmul.mubr.msk.bf16.vlgmr.msra.gmra.mrb[32].mxu1 %vm320_vm1, %v3221_v8 }
  0x87   :  { %2990 = vmatmul.mubr.msk.bf16.gmra.mrb[32].mxu0 %vm320_vm1, %v3222_v9  ;;  %2927 = vmatprep.mubr.msk.bf16.mxu1 %vm320_vm1, %v3223_v10  ;;  %v4012_v10 = vld [vmem:[%s4819_s7] ss:$0 sm:$0xff] }
  0x88   :  { %2993 = vmatprep.mubr.msk.bf16.mxu0 %vm320_vm1, %v3224_v11 }
  0x8e   :  { %2928 = vmatmul.mubr.msk.bf16.gmra.mrb[36].mxu1 %vm320_vm1, %v3225_v12 }
  0x8f   :  { %2994 = vmatmul.mubr.msk.bf16.gmra.mrb[36].mxu0 %vm320_vm1, %v3226_v13  ;;  %2931 = vmatprep.mubr.msk.bf16.mxu1 %vm320_vm1, %v3227_v14 }
  0x90   :  { %2997 = vmatprep.mubr.msk.bf16.mxu0 %vm320_vm1, %v3228_v15 }
  0x96   :  { %2932 = vmatmul.mubr.msk.bf16.gmra.mrb[40].mxu1 %vm320_vm1, %v3229_v16 }
  0x97   :  { %2998 = vmatmul.mubr.msk.bf16.gmra.mrb[40].mxu0 %vm320_vm1, %v3230_v17  ;;  %2935 = vmatprep.mubr.msk.bf16.mxu1 %vm320_vm1, %v3231_v18 }
  0x98   :  { %3001 = vmatprep.mubr.msk.bf16.mxu0 %vm320_vm1, %v3232_v19 }
  0x9e   :  { %2936 = vmatmul.mubr.msk.bf16.gmra.mrb[44].mxu1 %vm320_vm1, %v3233_v20 }
  0x9f   :  { %3002 = vmatmul.mubr.msk.bf16.gmra.mrb[44].mxu0 %vm320_vm1, %v3234_v21  ;;  %2939 = vmatprep.mubr.msk.bf16.mxu1 %vm320_vm1, %v3235_v22 }
  0xa0   :  { %3005 = vmatprep.mubr.msk.bf16.mxu0 %vm320_vm1, %v3236_v23 }
  0xa6   :  { %2940 = vmatmul.mubr.msk.bf16.gmra.mrb[48].mxu1 %vm320_vm1, %v3237_v24 }
  0xa7   :  { %3006 = vmatmul.mubr.msk.bf16.gmra.mrb[48].mxu0 %vm320_vm1, %v3238_v25  ;;  %2943 = vmatprep.mubr.msk.bf16.mxu1 %vm320_vm1, %v3239_v26 }
  0xa8   :  { %3009 = vmatprep.mubr.msk.bf16.mxu0 %vm320_vm1, %v3240_v27 }
  0xae   :  { %2944 = vmatmul.mubr.msk.bf16.gmra.mrb[52].mxu1 %vm320_vm1, %v3241_v28 }
  0xaf   :  { %3010 = vmatmul.mubr.msk.bf16.gmra.mrb[52].mxu0 %vm320_vm1, %v3242_v29  ;;  %2947 = vmatprep.mubr.msk.bf16.mxu1 %vm320_vm1, %v3243_v30 }
  0xb0   :  { %3013 = vmatprep.mubr.msk.bf16.mxu0 %vm320_vm1, %v3244_v31 }
  0xb6   :  { %2948 = vmatmul.mubr.msk.bf16.gmra.mrb[56].mxu1 %vm320_vm1, %v3245_v32 }
  0xb7   :  { %3014 = vmatmul.mubr.msk.bf16.gmra.mrb[56].mxu0 %vm320_vm1, %v3246_v33  ;;  %2951 = vmatprep.mubr.msk.bf16.mxu1 %vm320_vm1, %v3247_v34 }
  0xb8   :  { %3017 = vmatprep.mubr.msk.bf16.mxu0 %vm320_vm1, %v3248_v35 }
  0xbe   :  { %2952 = vmatmul.mubr.msk.bf16.gmra.mrb[60].mxu1 %vm320_vm1, %v3249_v36 }
  0xbf   :  { %3018 = vmatmul.mubr.msk.bf16.gmra.mrb[60].mxu0 %vm320_vm1, %v3250_v37 }
  0xd9   :  { %v2827_v38 = vpop.f32.mrb[0].mxu1 }
  0xda   :  { %v455_v39 = vpop.f32.mrb[1].mxu1 }
  0xdb   :  { %v2828_v40 = vpop.f32.mrb[2].mxu1 }
  0xdc   :  { %v458_v41 = vpop.f32.mrb[3].mxu1 }
  0xe1   :  { %v2831_v42 = vpop.f32.mrb[4].mxu1 }
  0xe2   :  { %v471_v43 = vpop.f32.mrb[5].mxu1 }
  0xe3   :  { %v2832_v44 = vpop.f32.mrb[6].mxu1 }
  0xe4   :  { %v3954_v45 = vpop.f32.mrb[7].mxu1 }
  0xe9   :  { %v3956_v46 = vpop.f32.mrb[8].mxu1 }
  0xea   :  { %v3958_v47 = vpop.f32.mrb[9].mxu1 }
  0xeb   :  { %v3960_v48 = vpop.f32.mrb[10].mxu1 }
  0xec   :  { %v3962_v49 = vpop.f32.mrb[11].mxu1 }
  0xf1   :  { %v3964_v50 = vpop.f32.mrb[12].mxu1 }
  0xf2   :  { %v3966_v51 = vpop.f32.mrb[13].mxu1 }
  0xf3   :  { %v3968_v52 = vpop.f32.mrb[14].mxu1 }
  0xf4   :  { %v3970_v53 = vpop.f32.mrb[15].mxu1 }
  0xf9   :  { %v3972_v54 = vpop.f32.mrb[16].mxu1 }
  0xfa   :  { %v3974_v55 = vpop.f32.mrb[17].mxu1 }
  0xfb   :  { %v3976_v56 = vpop.f32.mrb[18].mxu1 }
  0xfc   :  { %v3978_v57 = vpop.f32.mrb[19].mxu1 }
 0x101   :  { %v3980_v58 = vpop.f32.mrb[20].mxu1 }
 0x102   :  { %v3982_v59 = vpop.f32.mrb[21].mxu1 }
 0x103   :  { %v3984_v60 = vpop.f32.mrb[22].mxu1 }
 0x104   :  { %v3986_v61 = vpop.f32.mrb[23].mxu1 }
 0x109   :  { %v3988_v62 = vpop.f32.mrb[24].mxu1 }
 0x10a   :  { %v3990_v63 = vpop.f32.mrb[25].mxu1 }
 0x10b   :  { %v3992_v0 = vpop.f32.mrb[26].mxu1 }
 0x10c   :  { %v3994_v1 = vpop.f32.mrb[27].mxu1 }
 0x111   :  { %v3996_v2 = vpop.f32.mrb[28].mxu1 }
 0x112   :  { %v3998_v3 = vpop.f32.mrb[29].mxu1 }
 0x113   :  { %v4000_v4 = vpop.f32.mrb[30].mxu1 }
 0x114   :  { %v4002_v5 = vpop.f32.mrb[31].mxu1 }
 0x11a   :  { %v2959_v6 = vpop.f32.mrb[0].mxu0 }
 0x11b   :  { %v3023_v8 = vadd.f32 %v2959_v6, %v2827_v38  ;;  %v1616_v9 = vpop.f32.mrb[1].mxu0 }
 0x11c   :  { %v3024_v11 = vadd.f32 %v1616_v9, %v455_v39  ;;  %v2960_v12 = vpop.f32.mrb[2].mxu0 }
 0x11d   :  { %v1944_v13 = vmul.f32 %v3023_v8, %v4007_v7  ;;  %v3025_v14 = vadd.f32 %v2960_v12, %v2828_v40  ;;  %v1619_v15 = vpop.f32.mrb[3].mxu0 }
 0x11e   :  { %v1942_v16 = vmul.f32 %v3024_v11, %v4007_v7  ;;  %v3026_v17 = vadd.f32 %v1619_v15, %v458_v41 }
 0x11f   :  { %v4017_v18 = vadd.f32 %v4012_v10, %v1944_v13  ;;  %v1945_v19 = vmul.f32 %v3025_v14, %v4007_v7 }
 0x120   :  { %v4021_v20 = vadd.f32 %v4012_v10, %v1942_v16  ;;  %v1943_v21 = vmul.f32 %v3026_v17, %v4007_v7 }
 0x121   :  { %v2079_v22 = vsub.f32 0.0, %v4017_v18  ;;  %v4026_v23 = vadd.f32 %v4012_v10, %v1945_v19 }
 0x122   :  { %v2077_v24 = vsub.f32 0.0, %v4021_v20  ;;  %v4030_v25 = vadd.f32 %v4012_v10, %v1943_v21  ;;  %v2963_v26 = vpop.f32.mrb[4].mxu0 }
 0x123   :  { %v2145_v27 = vmul.f32 1.442695, %v2079_v22  ;;  %v2080_v28 = vsub.f32 0.0, %v4026_v23  ;;  %v3027_v29 = vadd.f32 %v2963_v26, %v2831_v42  ;;  %v1632_v30 = vpop.f32.mrb[5].mxu0 }
 0x124   :  { %v2141_v31 = vmul.f32 1.442695, %v2077_v24  ;;  %v2078_v32 = vsub.f32 0.0, %v4030_v25  ;;  %v3028_v33 = vadd.f32 %v1632_v30, %v471_v43  ;;  %v2964_v34 = vpop.f32.mrb[6].mxu0 }
 0x125   :  { %3251 = vpow2.f32 %v2145_v27  ;;  %v2147_v35 = vmul.f32 1.442695, %v2080_v28  ;;  %v1948_v36 = vmul.f32 %v3027_v29, %v4007_v7  ;;  %v3029_v37 = vadd.f32 %v2964_v34, %v2832_v44  ;;  %v1635_v38 = vpop.f32.mrb[7].mxu0 }
 0x126   :  { %3253 = vpow2.f32 %v2141_v31  ;;  %v2143_v39 = vmul.f32 1.442695, %v2078_v32  ;;  %v1946_v40 = vmul.f32 %v3028_v33, %v4007_v7  ;;  %v3030_v41 = vadd.f32 %v1635_v38, %v3954_v45 }
 0x127   :  { %3255 = vpow2.f32 %v2147_v35  ;;  %v4038_v42 = vadd.f32 %v4012_v10, %v1948_v36  ;;  %v1949_v6 = vmul.f32 %v3029_v37, %v4007_v7 }
 0x128   :  { %3257 = vpow2.f32 %v2143_v39  ;;  %v4042_v43 = vadd.f32 %v4012_v10, %v1946_v40  ;;  %v1947_v8 = vmul.f32 %v3030_v41, %v4007_v7 }
 0x129   :  { %v2083_v44 = vsub.f32 0.0, %v4038_v42  ;;  %v4047_v9 = vadd.f32 %v4012_v10, %v1949_v6 }
 0x12a   :  { %v2081_v11 = vsub.f32 0.0, %v4042_v43  ;;  %v4051_v45 = vadd.f32 %v4012_v10, %v1947_v8  ;;  %v2967_v12 = vpop.f32.mrb[8].mxu0 }
 0x12b   :  { %v2153_v13 = vmul.f32 1.442695, %v2083_v44  ;;  %v2084_v14 = vsub.f32 0.0, %v4047_v9  ;;  %v3031_v15 = vadd.f32 %v2967_v12, %v3956_v46  ;;  %v1648_v16 = vpop.f32.mrb[9].mxu0 }
 0x12c   :  { %v2149_v17 = vmul.f32 1.442695, %v2081_v11  ;;  %v2082_v19 = vsub.f32 0.0, %v4051_v45  ;;  %v3032_v21 = vadd.f32 %v1648_v16, %v3958_v47  ;;  %v2968_v22 = vpop.f32.mrb[10].mxu0 }
 0x12d   :  { %3259 = vpow2.f32 %v2153_v13  ;;  %v2155_v24 = vmul.f32 1.442695, %v2084_v14  ;;  %v1952_v26 = vmul.f32 %v3031_v15, %v4007_v7  ;;  %v3033_v27 = vadd.f32 %v2968_v22, %v3960_v48  ;;  %v1651_v28 = vpop.f32.mrb[11].mxu0 }
 0x12e   :  { %3261 = vpow2.f32 %v2149_v17  ;;  %v2151_v29 = vmul.f32 1.442695, %v2082_v19  ;;  %v1950_v30 = vmul.f32 %v3032_v21, %v4007_v7  ;;  %v3034_v46 = vadd.f32 %v1651_v28, %v3962_v49 }
 0x12f   :  { %v3252_v31 = vpop.eup %3251  ;;  %3263 = vpow2.f32 %v2155_v24  ;;  %v4062_v32 = vadd.f32 %v4012_v10, %v1952_v26  ;;  %v1953_v47 = vmul.f32 %v3033_v27, %v4007_v7 }
 0x130   :  { %v3254_v33 = vpop.eup %3253  ;;  %v2271_v34 = vadd.f32 1.0, %v3252_v31  ;;  %3265 = vpow2.f32 %v2151_v29  ;;  %v4066_v35 = vadd.f32 %v4012_v10, %v1950_v30  ;;  %v1951_v48 = vmul.f32 %v3034_v46, %v4007_v7 }
 0x131   :  { %v3256_v36 = vpop.eup %3255  ;;  %v2269_v37 = vadd.f32 1.0, %v3254_v33  ;;  %v2087_v38 = vsub.f32 0.0, %v4062_v32  ;;  %v4071_v49 = vadd.f32 %v4012_v10, %v1953_v47 }
 0x132   :  { %v3258_v39 = vpop.eup %3257  ;;  %3267 = vrcp.f32 %v2271_v34  ;;  %v2272_v40 = vadd.f32 1.0, %v3256_v36  ;;  %v2085_v41 = vsub.f32 0.0, %v4066_v35  ;;  %v4075_v6 = vadd.f32 %v4012_v10, %v1951_v48  ;;  %v2971_v8 = vpop.f32.mrb[12].mxu0 }
 0x133   :  { %3269 = vrcp.f32 %v2269_v37  ;;  %v2270_v44 = vadd.f32 1.0, %v3258_v39  ;;  %v2161_v11 = vmul.f32 1.442695, %v2087_v38  ;;  %v2088_v12 = vsub.f32 0.0, %v4071_v49  ;;  %v1664_v13 = vpop.f32.mrb[13].mxu0 }
 0x134   :  { %3271 = vrcp.f32 %v2272_v40  ;;  %v2157_v14 = vmul.f32 1.442695, %v2085_v41  ;;  %v2086_v15 = vsub.f32 0.0, %v4075_v6  ;;  %v3035_v16 = vadd.f32 %v2971_v8, %v3964_v50  ;;  %v2972_v17 = vpop.f32.mrb[14].mxu0 }
 0x135   :  { %3273 = vrcp.f32 %v2270_v44  ;;  %v2163_v19 = vmul.f32 1.442695, %v2088_v12  ;;  %v3036_v21 = vadd.f32 %v1664_v13, %v3966_v51  ;;  %v3037_v22 = vadd.f32 %v2972_v17, %v3968_v52  ;;  %v1667_v24 = vpop.f32.mrb[15].mxu0 }
 0x136   :  { %3275 = vpow2.f32 %v2161_v11  ;;  %v2159_v26 = vmul.f32 1.442695, %v2086_v15  ;;  %v1956_v27 = vmul.f32 %v3035_v16, %v4007_v7  ;;  %v3038_v28 = vadd.f32 %v1667_v24, %v3970_v53 }
 0x137   :  { %v3260_v29 = vpop.eup %3259  ;;  %3277 = vpow2.f32 %v2157_v14  ;;  %v1954_v30 = vmul.f32 %v3036_v21, %v4007_v7  ;;  %v1957_v50 = vmul.f32 %v3037_v22, %v4007_v7 }
 0x138   :  { %v3262_v46 = vpop.eup %3261  ;;  %v2275_v31 = vadd.f32 1.0, %v3260_v29  ;;  %3279 = vpow2.f32 %v2163_v19  ;;  %v4087_v51 = vadd.f32 %v4012_v10, %v1956_v27  ;;  %v1955_v52 = vmul.f32 %v3038_v28, %v4007_v7 }
 0x139   :  { %v3264_v47 = vpop.eup %3263  ;;  %v2273_v33 = vadd.f32 1.0, %v3262_v46  ;;  %3281 = vpow2.f32 %v2159_v26  ;;  %v4091_v53 = vadd.f32 %v4012_v10, %v1954_v30  ;;  %v4094_v34 = vadd.f32 %v4012_v10, %v1957_v50 }
 0x13a   :  { %v3266_v48 = vpop.eup %3265  ;;  %3283 = vrcp.f32 %v2275_v31  ;;  %v2276_v36 = vadd.f32 1.0, %v3264_v47  ;;  %v2091_v37 = vsub.f32 0.0, %v4087_v51  ;;  %v4098_v38 = vadd.f32 %v4012_v10, %v1955_v52  ;;  %v2975_v39 = vpop.f32.mrb[16].mxu0 }
 0x13b   :  { %3285 = vrcp.f32 %v2273_v33  ;;  %v2274_v40 = vadd.f32 1.0, %v3266_v48  ;;  %v2089_v41 = vsub.f32 0.0, %v4091_v53  ;;  %v2092_v8 = vsub.f32 0.0, %v4094_v34  ;;  %v1680_v44 = vpop.f32.mrb[17].mxu0 }
 0x13c   :  { %v3268_v11 = vpop.eup %3267  ;;  %3287 = vrcp.f32 %v2276_v36  ;;  %v2169_v12 = vmul.f32 1.442695, %v2091_v37  ;;  %v2090_v13 = vsub.f32 0.0, %v4098_v38  ;;  %v3039_v14 = vadd.f32 %v2975_v39, %v3972_v54  ;;  %v2976_v15 = vpop.f32.mrb[18].mxu0 }
 0x13d   :  { %v3270_v16 = vpop.eup %3269  ;;  %v2399_v17 = vmul.f32 %v3268_v11, %v4017_v18  ;;  %3289 = vrcp.f32 %v2274_v40  ;;  %v2165_v19 = vmul.f32 1.442695, %v2089_v41  ;;  %v2171_v21 = vmul.f32 1.442695, %v2092_v8  ;;  %v1683_v22 = vpop.f32.mrb[19].mxu0 }
 0x13e   :  { %v3272_v24 = vpop.eup %3271  ;;  %v2397_v26 = vmul.f32 %v3270_v16, %v4021_v20  ;;  %3291 = vpow2.f32 %v2169_v12  ;;  %v2167_v27 = vmul.f32 1.442695, %v2090_v13  ;;  %v1960_v28 = vmul.f32 %v3039_v14, %v4007_v7 }
 0x13f   :  { %v3274_v29 = vpop.eup %3273  ;;  %2464 = vst.msk [vmem:[%s4820_s8 + $0x10] sm:$0xff] %vm2461_vm2, %v2399_v17  ;;  %v2400_v54 = vmul.f32 %v3272_v24, %v4026_v23  ;;  %3293 = vpow2.f32 %v2165_v19  ;;  %v3040_v18 = vadd.f32 %v1680_v44, %v3974_v55  ;;  %v3041_v30 = vadd.f32 %v2976_v15, %v3976_v56 }
 0x140   :  { %v3276_v50 = vpop.eup %3275  ;;  %2462 = vst.msk [vmem:[%s4820_s8] sm:$0xff] %vm2461_vm2, %v2397_v26  ;;  %v2398_v20 = vmul.f32 %v3274_v29, %v4030_v25  ;;  %3295 = vpow2.f32 %v2171_v21  ;;  %v4120_v46 = vadd.f32 %v4012_v10, %v1960_v28  ;;  %v3042_v31 = vadd.f32 %v1683_v22, %v3978_v57 }
 0x141   :  { %v3278_v23 = vpop.eup %3277  ;;  %2465 = vst.msk [vmem:[%s4820_s8 + $0x18] sm:$0xff] %vm2461_vm2, %v2400_v54  ;;  %v2279_v55 = vadd.f32 1.0, %v3276_v50  ;;  %3297 = vpow2.f32 %v2167_v27  ;;  %v1958_v56 = vmul.f32 %v3040_v18, %v4007_v7  ;;  %v1961_v52 = vmul.f32 %v3041_v30, %v4007_v7 }
 0x142   :  { %v3280_v47 = vpop.eup %3279  ;;  %2463 = vst.msk [vmem:[%s4820_s8 + $0x8] sm:$0xff] %vm2461_vm2, %v2398_v20  ;;  %v2277_v25 = vadd.f32 1.0, %v3278_v23  ;;  %v2095_v57 = vsub.f32 0.0, %v4120_v46  ;;  %v1959_v33 = vmul.f32 %v3042_v31, %v4007_v7  ;;  %v2979_v48 = vpop.f32.mrb[20].mxu0 }
 0x143   :  { %v3282_v36 = vpop.eup %3281  ;;  %3299 = vrcp.f32 %v2279_v55  ;;  %v2280_v37 = vadd.f32 1.0, %v3280_v47  ;;  %v4136_v39 = vadd.f32 %v4012_v10, %v1958_v56  ;;  %v4139_v40 = vadd.f32 %v4012_v10, %v1961_v52  ;;  %v1696_v41 = vpop.f32.mrb[21].mxu0 }
 0x144   :  { %v3284_v8 = vpop.eup %3283  ;;  %3301 = vrcp.f32 %v2277_v25  ;;  %v2278_v44 = vadd.f32 1.0, %v3282_v36  ;;  %v2177_v11 = vmul.f32 1.442695, %v2095_v57  ;;  %v4142_v12 = vadd.f32 %v4012_v10, %v1959_v33  ;;  %v2980_v13 = vpop.f32.mrb[22].mxu0 }
 0x145   :  { %v3286_v14 = vpop.eup %3285  ;;  %v2403_v15 = vmul.f32 %v3284_v8, %v4038_v42  ;;  %3303 = vrcp.f32 %v2280_v37  ;;  %v2093_v16 = vsub.f32 0.0, %v4136_v39  ;;  %v2096_v17 = vsub.f32 0.0, %v4139_v40  ;;  %v1699_v19 = vpop.f32.mrb[23].mxu0 }
 0x146   :  { %v3288_v21 = vpop.eup %3287  ;;  %v2401_v22 = vmul.f32 %v3286_v14, %v4042_v43  ;;  %3305 = vrcp.f32 %v2278_v44  ;;  %v2094_v24 = vsub.f32 0.0, %v4142_v12  ;;  %v3043_v26 = vadd.f32 %v2979_v48, %v3980_v58 }
 0x147   :  { %v3290_v27 = vpop.eup %3289  ;;  %2468 = vst.msk [vmem:[%s4820_s8 + $0x30] sm:$0xff] %vm2461_vm2, %v2403_v15  ;;  %v2404_v42 = vmul.f32 %v3288_v21, %v4047_v9  ;;  %3307 = vpow2.f32 %v2177_v11  ;;  %v2173_v28 = vmul.f32 1.442695, %v2093_v16  ;;  %v2179_v29 = vmul.f32 1.442695, %v2096_v17 }
 0x148   :  { %v3292_v54 = vpop.eup %3291  ;;  %2466 = vst.msk [vmem:[%s4820_s8 + $0x20] sm:$0xff] %vm2461_vm2, %v2401_v22  ;;  %v2402_v43 = vmul.f32 %v3290_v27, %v4051_v45  ;;  %v2175_v58 = vmul.f32 1.442695, %v2094_v24  ;;  %v1964_v18 = vmul.f32 %v3043_v26, %v4007_v7  ;;  %v3044_v30 = vadd.f32 %v1696_v41, %v3982_v59 }
 0x149   :  { %v3294_v50 = vpop.eup %3293  ;;  %2469 = vst.msk [vmem:[%s4820_s8 + $0x38] sm:$0xff] %vm2461_vm2, %v2404_v42  ;;  %v2283_v9 = vadd.f32 1.0, %v3292_v54  ;;  %3309 = vpow2.f32 %v2173_v28  ;;  %v3045_v20 = vadd.f32 %v2980_v13, %v3984_v60  ;;  %v3046_v31 = vadd.f32 %v1699_v19, %v3986_v61 }
 0x14a   :  { %v3296_v23 = vpop.eup %3295  ;;  %2467 = vst.msk [vmem:[%s4820_s8 + $0x28] sm:$0xff] %vm2461_vm2, %v2402_v43  ;;  %v2281_v45 = vadd.f32 1.0, %v3294_v50  ;;  %3311 = vpow2.f32 %v2179_v29  ;;  %v4173_v59 = vadd.f32 %v4012_v10, %v1964_v18  ;;  %v1962_v55 = vmul.f32 %v3044_v30, %v4007_v7  ;;  %v2983_v56 = vpop.f32.mrb[24].mxu0 }
 0x14b   :  { %v3298_v52 = vpop.eup %3297  ;;  %3313 = vrcp.f32 %v2283_v9  ;;  %v2284_v47 = vadd.f32 1.0, %v3296_v23  ;;  %v1965_v60 = vmul.f32 %v3045_v20, %v4007_v7  ;;  %v1963_v61 = vmul.f32 %v3046_v31, %v4007_v7  ;;  %v1712_v25 = vpop.f32.mrb[25].mxu0 }
 0x14c   :  { %3315 = vrcp.f32 %v2281_v45  ;;  %v2282_v57 = vadd.f32 1.0, %v3298_v52  ;;  %v2099_v33 = vsub.f32 0.0, %v4173_v59  ;;  %v4180_v48 = vadd.f32 %v4012_v10, %v1962_v55  ;;  %v2984_v36 = vpop.f32.mrb[26].mxu0 }
 0x14d   :  { %v3300_v37 = vpop.eup %3299  ;;  %3317 = vrcp.f32 %v2284_v47  ;;  %v4183_v41 = vadd.f32 %v4012_v10, %v1965_v60  ;;  %v4186_v8 = vadd.f32 %v4012_v10, %v1963_v61  ;;  %v3047_v44 = vadd.f32 %v2983_v56, %v3988_v62  ;;  %v1715_v11 = vpop.f32.mrb[27].mxu0 }
 0x14e   :  { %v3302_v13 = vpop.eup %3301  ;;  %v2407_v14 = vmul.f32 %v3300_v37, %v4062_v32  ;;  %3319 = vrcp.f32 %v2282_v57  ;;  %v2185_v15 = vmul.f32 1.442695, %v2099_v33  ;;  %v2097_v16 = vsub.f32 0.0, %v4180_v48 }
 0x14f   :  { %v3304_v17 = vpop.eup %3303  ;;  %v2405_v19 = vmul.f32 %v3302_v13, %v4066_v35  ;;  %3321 = vpow2.f32 %v2175_v58  ;;  %v2100_v21 = vsub.f32 0.0, %v4183_v41  ;;  %v2098_v22 = vsub.f32 0.0, %v4186_v8 }
 0x150   :  { %v3306_v24 = vpop.eup %3305  ;;  %2472 = vst.msk [vmem:[%s4820_s8 + $0x50] sm:$0xff] %vm2461_vm2, %v2407_v14  ;;  %v2408_v62 = vmul.f32 %v3304_v17, %v4071_v49  ;;  %3323 = vpow2.f32 %v2185_v15  ;;  %v2181_v32 = vmul.f32 1.442695, %v2097_v16  ;;  %v1968_v26 = vmul.f32 %v3047_v44, %v4007_v7 }
 0x151   :  { %v3308_v27 = vpop.eup %3307  ;;  %2470 = vst.msk [vmem:[%s4820_s8 + $0x40] sm:$0xff] %vm2461_vm2, %v2405_v19  ;;  %v2406_v35 = vmul.f32 %v3306_v24, %v4075_v6  ;;  %v2187_v42 = vmul.f32 1.442695, %v2100_v21  ;;  %v2183_v28 = vmul.f32 1.442695, %v2098_v22  ;;  %v3048_v29 = vadd.f32 %v1712_v25, %v3990_v63 }
 0x152   :  { %2473 = vst.msk [vmem:[%s4820_s8 + $0x58] sm:$0xff] %vm2461_vm2, %v2408_v62  ;;  %v2287_v49 = vadd.f32 1.0, %v3308_v27  ;;  %3325 = vpow2.f32 %v2181_v32  ;;  %v4211_v54 = vadd.f32 %v4012_v10, %v1968_v26  ;;  %v3049_v43 = vadd.f32 %v2984_v36, %v3992_v0  ;;  %v2987_v58 = vpop.f32.mrb[28].mxu0 }
 0x153   :  { %v3310_v18 = vpop.eup %3309  ;;  %2471 = vst.msk [vmem:[%s4820_s8 + $0x48] sm:$0xff] %vm2461_vm2, %v2406_v35  ;;  %3327 = vpow2.f32 %v2187_v42  ;;  %v1966_v63 = vmul.f32 %v3048_v29, %v4007_v7  ;;  %v3050_v6 = vadd.f32 %v1715_v11, %v3994_v1  ;;  %v3051_v30 = vadd.f32 %v2987_v58, %v3996_v2  ;;  %v1728_v50 = vpop.f32.mrb[29].mxu0 }
 0x154   :  { %v3312_v9 = vpop.eup %3311  ;;  %3329 = vrcp.f32 %v2287_v49  ;;  %v2285_v20 = vadd.f32 1.0, %v3310_v18  ;;  %v2103_v0 = vsub.f32 0.0, %v4211_v54  ;;  %v1969_v31 = vmul.f32 %v3049_v43, %v4007_v7  ;;  %v2988_v23 = vpop.f32.mrb[30].mxu0 }
 0x155   :  { %v3314_v45 = vpop.eup %3313  ;;  %v2288_v55 = vadd.f32 1.0, %v3312_v9  ;;  %3331 = vpow2.f32 %v2183_v28  ;;  %v4224_v56 = vadd.f32 %v4012_v10, %v1966_v63  ;;  %v1967_v52 = vmul.f32 %v3050_v6, %v4007_v7  ;;  %v1731_v1 = vpop.f32.mrb[31].mxu0 }
 0x156   :  { %v3316_v47 = vpop.eup %3315  ;;  %v2411_v2 = vmul.f32 %v3314_v45, %v4087_v51  ;;  %3333 = vrcp.f32 %v2285_v20  ;;  %v2193_v60 = vmul.f32 1.442695, %v2103_v0  ;;  %v4229_v61 = vadd.f32 %v4012_v10, %v1969_v31 }
 0x157   :  { %v3318_v25 = vpop.eup %3317  ;;  %v2409_v57 = vmul.f32 %v3316_v47, %v4091_v53  ;;  %3335 = vrcp.f32 %v2288_v55  ;;  %v2101_v33 = vsub.f32 0.0, %v4224_v56  ;;  %v4234_v36 = vadd.f32 %v4012_v10, %v1967_v52 }
 0x158   :  { %v3320_v37 = vpop.eup %3319  ;;  %2476 = vst.msk [vmem:[%s4820_s8 + $0x70] sm:$0xff] %vm2461_vm2, %v2411_v2  ;;  %v2412_v51 = vmul.f32 %v3318_v25, %v4094_v34  ;;  %3337 = vpow2.f32 %v2193_v60  ;;  %v2104_v44 = vsub.f32 0.0, %v4229_v61  ;;  %v1972_v11 = vmul.f32 %v3051_v30, %v4007_v7 }
 0x159   :  { %v3322_v53 = vpop.eup %3321  ;;  %2474 = vst.msk [vmem:[%s4820_s8 + $0x60] sm:$0xff] %vm2461_vm2, %v2409_v57  ;;  %v2410_v13 = vmul.f32 %v3320_v37, %v4098_v38  ;;  %v2189_v14 = vmul.f32 1.442695, %v2101_v33  ;;  %v2102_v15 = vsub.f32 0.0, %v4234_v36  ;;  %v3052_v16 = vadd.f32 %v1728_v50, %v3998_v3  ;;  %v2925_v17 = vpop.f32.mrb[32].mxu1 }
 0x15a   :  { %v3324_v34 = vpop.eup %3323  ;;  %2477 = vst.msk [vmem:[%s4820_s8 + $0x78] sm:$0xff] %vm2461_vm2, %v2412_v51  ;;  %v2286_v19 = vadd.f32 1.0, %v3322_v53  ;;  %v2195_v21 = vmul.f32 1.442695, %v2104_v44  ;;  %v4255_v22 = vadd.f32 %v4012_v10, %v1972_v11  ;;  %v3053_v24 = vadd.f32 %v2988_v23, %v4000_v4  ;;  %v2991_v38 = vpop.f32.mrb[32].mxu0 }
 0x15b   :  { %v1131_v62 = vpop.f32.mrb[33].mxu1  ;;  %2475 = vst.msk [vmem:[%s4820_s8 + $0x68] sm:$0xff] %vm2461_vm2, %v2410_v13  ;;  %v2291_v3 = vadd.f32 1.0, %v3324_v34  ;;  %3339 = vpow2.f32 %v2189_v14  ;;  %v2191_v32 = vmul.f32 1.442695, %v2102_v15  ;;  %v1970_v26 = vmul.f32 %v3052_v16, %v4007_v7  ;;  %v1744_v27 = vpop.f32.mrb[33].mxu0 }
 0x15c   :  { %v2926_v35 = vpop.f32.mrb[34].mxu1  ;;  %v3326_v42 = vpop.eup %3325  ;;  %3341 = vrcp.f32 %v2286_v19  ;;  %v2107_v28 = vsub.f32 0.0, %v4255_v22  ;;  %v1973_v4 = vmul.f32 %v3053_v24, %v4007_v7  ;;  %v3054_v29 = vadd.f32 %v1731_v1, %v4002_v5 }
 0x15d   :  { %v2992_v49 = vpop.f32.mrb[34].mxu0  ;;  %v1134_v43 = vpop.f32.mrb[35].mxu1  ;;  %3343 = vrcp.f32 %v2291_v3  ;;  %v2289_v18 = vadd.f32 1.0, %v3326_v42  ;;  %v4267_v63 = vadd.f32 %v4012_v10, %v1970_v26  ;;  %v3055_v6 = vadd.f32 %v2991_v38, %v2925_v17 }
 0x15e   :  { %v3328_v58 = vpop.eup %3327  ;;  %v1747_v30 = vpop.f32.mrb[35].mxu0  ;;  %3345 = vpow2.f32 %v2195_v21  ;;  %v2201_v20 = vmul.f32 1.442695, %v2107_v28  ;;  %v4270_v0 = vadd.f32 %v4012_v10, %v1973_v4  ;;  %v1971_v45 = vmul.f32 %v3054_v29, %v4007_v7 }
 0x15f   :  { %v3330_v50 = vpop.eup %3329  ;;  %v2292_v9 = vadd.f32 1.0, %v3328_v58  ;;  %3347 = vrcp.f32 %v2289_v18  ;;  %v2105_v23 = vsub.f32 0.0, %v4267_v63  ;;  %v1976_v47 = vmul.f32 %v3055_v6, %v4007_v7 }
 0x160   :  { %v3332_v31 = vpop.eup %3331  ;;  %v2415_v5 = vmul.f32 %v3330_v50, %v4120_v46  ;;  %v2108_v1 = vsub.f32 0.0, %v4270_v0  ;;  %v4283_v25 = vadd.f32 %v4012_v10, %v1971_v45  ;;  %v3056_v14 = vadd.f32 %v1744_v27, %v1131_v62 }
 0x161   :  { %v3334_v55 = vpop.eup %3333  ;;  %3349 = vrcp.f32 %v2292_v9  ;;  %v2290_v52 = vadd.f32 1.0, %v3332_v31  ;;  %v2197_v60 = vmul.f32 1.442695, %v2105_v23  ;;  %v2929_v57 = vpop.f32.mrb[36].mxu1  ;;  %v4287_v44 = vadd.f32 %v4012_v10, %v1976_v47 }
 0x162   :  { %v3336_v2 = vpop.eup %3335  ;;  %2480 = vst.msk [vmem:[%s4820_s8 + $0x90] sm:$0xff] %vm2461_vm2, %v2415_v5  ;;  %v2413_v46 = vmul.f32 %v3334_v55, %v4136_v39  ;;  %3351 = vpow2.f32 %v2191_v32  ;;  %v2203_v51 = vmul.f32 1.442695, %v2108_v1  ;;  %v2995_v11 = vpop.f32.mrb[36].mxu0  ;;  %v2106_v13 = vsub.f32 0.0, %v4283_v25 }
 0x163   :  { %v3338_v33 = vpop.eup %3337  ;;  %v2416_v37 = vmul.f32 %v3336_v2, %v4139_v40  ;;  %3353 = vrcp.f32 %v2290_v52  ;;  %v1147_v53 = vpop.f32.mrb[37].mxu1  ;;  %v2111_v40 = vsub.f32 0.0, %v4287_v44  ;;  %v3057_v17 = vadd.f32 %v2992_v49, %v2926_v35 }
 0x164   :  { %2478 = vst.msk [vmem:[%s4820_s8 + $0x80] sm:$0xff] %vm2461_vm2, %v2413_v46  ;;  %v2295_v39 = vadd.f32 1.0, %v3338_v33  ;;  %3355 = vpow2.f32 %v2201_v20  ;;  %v1760_v15 = vpop.f32.mrb[37].mxu0  ;;  %v4294_v16 = vpop.f32.mrb[38].mxu1  ;;  %v3058_v34 = vadd.f32 %v1747_v30, %v1134_v43  ;;  %v2199_v38 = vmul.f32 1.442695, %v2106_v13 }
 0x165   :  { %2481 = vst.msk [vmem:[%s4820_s8 + $0x98] sm:$0xff] %vm2461_vm2, %v2416_v37  ;;  %3357 = vpow2.f32 %v2197_v60  ;;  %v2996_v19 = vpop.f32.mrb[38].mxu0  ;;  %v4301_v21 = vpop.f32.mrb[39].mxu1  ;;  %v1974_v62 = vmul.f32 %v3056_v14, %v4007_v7  ;;  %v3059_v3 = vadd.f32 %v2995_v11, %v2929_v57  ;;  %v2209_v42 = vmul.f32 1.442695, %v2111_v40 }
 0x166   :  { %v3340_v24 = vpop.eup %3339  ;;  %3359 = vrcp.f32 %v2295_v39  ;;  %v4304_v32 = vpop.f32.mrb[39].mxu0  ;;  %v1977_v28 = vmul.f32 %v3057_v17, %v4007_v7  ;;  %v1975_v49 = vmul.f32 %v3058_v34, %v4007_v7  ;;  %v3060_v45 = vadd.f32 %v1760_v15, %v1147_v53 }
 0x167   :  { %v3342_v26 = vpop.eup %3341  ;;  %v2293_v27 = vadd.f32 1.0, %v3340_v24  ;;  %3361 = vpow2.f32 %v2203_v51  ;;  %v4309_v29 = vadd.f32 %v4012_v10, %v1974_v62  ;;  %v1980_v6 = vmul.f32 %v3059_v3, %v4007_v7 }
 0x168   :  { %v3344_v4 = vpop.eup %3343  ;;  %v2414_v35 = vmul.f32 %v3342_v26, %v4142_v12  ;;  %3363 = vpow2.f32 %v2199_v38  ;;  %v4314_v18 = vadd.f32 %v4012_v10, %v1977_v28  ;;  %v4323_v9 = vadd.f32 %v4012_v10, %v1975_v49 }
 0x169   :  { %v3346_v43 = vpop.eup %3345  ;;  %v2419_v58 = vmul.f32 %v3344_v4, %v4173_v59  ;;  %3365 = vrcp.f32 %v2293_v27  ;;  %v2109_v50 = vsub.f32 0.0, %v4309_v29  ;;  %v2933_v59 = vpop.f32.mrb[40].mxu1  ;;  %v4332_v23 = vadd.f32 %v4012_v10, %v1980_v6 }
 0x16a   :  { %v3348_v30 = vpop.eup %3347  ;;  %2479 = vst.msk [vmem:[%s4820_s8 + $0x88] sm:$0xff] %vm2461_vm2, %v2414_v35  ;;  %v2296_v12 = vadd.f32 1.0, %v3346_v43  ;;  %3367 = vpow2.f32 %v2209_v42  ;;  %v2112_v5 = vsub.f32 0.0, %v4314_v18  ;;  %v2999_v55 = vpop.f32.mrb[40].mxu0  ;;  %v2110_v46 = vsub.f32 0.0, %v4323_v9 }
 0x16b   :  { %v3350_v20 = vpop.eup %3349  ;;  %2484 = vst.msk [vmem:[%s4820_s8 + $0xb0] sm:$0xff] %vm2461_vm2, %v2419_v58  ;;  %v2417_v31 = vmul.f32 %v3348_v30, %v4180_v48  ;;  %v4334_v52 = vpop.f32.mrb[41].mxu1  ;;  %v2205_v2 = vmul.f32 1.442695, %v2109_v50  ;;  %v2115_v51 = vsub.f32 0.0, %v4332_v23  ;;  %v1978_v11 = vmul.f32 %v3060_v45, %v4007_v7 }
 0x16c   :  { %v3352_v1 = vpop.eup %3351  ;;  %v2420_v47 = vmul.f32 %v3350_v20, %v4183_v41  ;;  %3369 = vrcp.f32 %v2296_v12  ;;  %v1776_v60 = vpop.f32.mrb[41].mxu0  ;;  %v2211_v37 = vmul.f32 1.442695, %v2112_v5  ;;  %v2207_v14 = vmul.f32 1.442695, %v2110_v46 }
 0x16d   :  { %v4338_v57 = vpop.f32.mrb[42].mxu1  ;;  %v3354_v48 = vpop.eup %3353  ;;  %2482 = vst.msk [vmem:[%s4820_s8 + $0xa0] sm:$0xff] %vm2461_vm2, %v2417_v31  ;;  %v2294_v33 = vadd.f32 1.0, %v3352_v1  ;;  %3371 = vpow2.f32 %v2205_v2  ;;  %v3061_v15 = vadd.f32 %v2996_v19, %v4294_v16  ;;  %v2217_v24 = vmul.f32 1.442695, %v2115_v51 }
 0x16e   :  { %v3000_v41 = vpop.f32.mrb[42].mxu0  ;;  %v4346_v53 = vpop.f32.mrb[43].mxu1  ;;  %2485 = vst.msk [vmem:[%s4820_s8 + $0xb8] sm:$0xff] %vm2461_vm2, %v2420_v47  ;;  %v2418_v13 = vmul.f32 %v3354_v48, %v4186_v8  ;;  %v4355_v38 = vadd.f32 %v4012_v10, %v1978_v11  ;;  %v3062_v16 = vadd.f32 %v4304_v32, %v4301_v21  ;;  %v3063_v42 = vadd.f32 %v2999_v55, %v2933_v59 }
 0x16f   :  { %v3356_v39 = vpop.eup %3355  ;;  %v1779_v40 = vpop.f32.mrb[43].mxu0  ;;  %3373 = vrcp.f32 %v2294_v33  ;;  %v1981_v8 = vmul.f32 %v3061_v15, %v4007_v7  ;;  %v3064_v1 = vadd.f32 %v1776_v60, %v4334_v52  ;;  %v3065_v33 = vadd.f32 %v3000_v41, %v4338_v57 }
 0x170   :  { %v3358_v17 = vpop.eup %3357  ;;  %v2299_v34 = vadd.f32 1.0, %v3356_v39  ;;  %2483 = vst.msk [vmem:[%s4820_s8 + $0xa8] sm:$0xff] %vm2461_vm2, %v2418_v13  ;;  %3375 = vpow2.f32 %v2211_v37  ;;  %v2113_v27 = vsub.f32 0.0, %v4355_v38  ;;  %v1979_v49 = vmul.f32 %v3062_v16, %v4007_v7 }
 0x171   :  { %v3360_v62 = vpop.eup %3359  ;;  %v2297_v3 = vadd.f32 1.0, %v3358_v17  ;;  %v4367_v35 = vadd.f32 %v4012_v10, %v1981_v8  ;;  %v2937_v43 = vpop.f32.mrb[44].mxu1  ;;  %v1984_v32 = vmul.f32 %v3063_v42, %v4007_v7  ;;  %v1982_v51 = vmul.f32 %v3064_v1, %v4007_v7 }
 0x172   :  { %v3362_v19 = vpop.eup %3361  ;;  %v2423_v26 = vmul.f32 %v3360_v62, %v4211_v54  ;;  %3377 = vrcp.f32 %v2299_v34  ;;  %v2213_v21 = vmul.f32 1.442695, %v2113_v27  ;;  %v3003_v6 = vpop.f32.mrb[44].mxu0  ;;  %v4380_v20 = vadd.f32 %v4012_v10, %v1979_v49 }
 0x173   :  { %v3364_v28 = vpop.eup %3363  ;;  %3379 = vrcp.f32 %v2297_v3  ;;  %v2300_v4 = vadd.f32 1.0, %v3362_v19  ;;  %v4375_v30 = vpop.f32.mrb[45].mxu1  ;;  %v2116_v59 = vsub.f32 0.0, %v4367_v35  ;;  %v4387_v55 = vadd.f32 %v4012_v10, %v1984_v32 }
 0x174   :  { %v3366_v58 = vpop.eup %3365  ;;  %2488 = vst.msk [vmem:[%s4820_s8 + $0xd0] sm:$0xff] %vm2461_vm2, %v2423_v26  ;;  %v2298_v54 = vadd.f32 1.0, %v3364_v28  ;;  %3381 = vpow2.f32 %v2207_v14  ;;  %v4382_v31 = vpop.f32.mrb[45].mxu0  ;;  %v2114_v48 = vsub.f32 0.0, %v4380_v20  ;;  %v1985_v13 = vmul.f32 %v3065_v33, %v4007_v7 }
 0x175   :  { %v3368_v12 = vpop.eup %3367  ;;  %v2421_v50 = vmul.f32 %v3366_v58, %v4224_v56  ;;  %3383 = vrcp.f32 %v2300_v4  ;;  %v4384_v5 = vpop.f32.mrb[46].mxu1  ;;  %v2219_v46 = vmul.f32 1.442695, %v2116_v59  ;;  %v2119_v60 = vsub.f32 0.0, %v4387_v55 }
 0x176   :  { %3385 = vrcp.f32 %v2298_v54  ;;  %v2303_v45 = vadd.f32 1.0, %v3368_v12  ;;  %v4390_v47 = vpop.f32.mrb[46].mxu0  ;;  %v4392_v56 = vpop.f32.mrb[47].mxu1  ;;  %v2215_v39 = vmul.f32 1.442695, %v2114_v48  ;;  %v3066_v14 = vadd.f32 %v1779_v40, %v4346_v53 }
 0x177   :  { %v3370_v2 = vpop.eup %3369  ;;  %2486 = vst.msk [vmem:[%s4820_s8 + $0xc0] sm:$0xff] %vm2461_vm2, %v2421_v50  ;;  %3387 = vpow2.f32 %v2217_v24  ;;  %v4400_v37 = vpop.f32.mrb[47].mxu0  ;;  %v4412_v41 = vadd.f32 %v4012_v10, %v1982_v51  ;;  %v4416_v24 = vadd.f32 %v4012_v10, %v1985_v13  ;;  %v3067_v16 = vadd.f32 %v3003_v6, %v2937_v43 }
 0x178   :  { %v2424_v52 = vmul.f32 %v3370_v2, %v4229_v61  ;;  %3389 = vrcp.f32 %v2303_v45  ;;  %v3372_v11 = vpop.eup %3371  ;;  %v2225_v61 = vmul.f32 1.442695, %v2119_v60  ;;  %v1983_v53 = vmul.f32 %v3066_v14, %v4007_v7 }
 0x179   :  { %3391 = vpow2.f32 %v2213_v21  ;;  %v3374_v15 = vpop.eup %3373  ;;  %v2301_v57 = vadd.f32 1.0, %v3372_v11  ;;  %v4419_v40 = vpop.f32.mrb[48].mxu1  ;;  %v2117_v8 = vsub.f32 0.0, %v4412_v41  ;;  %v2120_v7 = vsub.f32 0.0, %v4416_v24 }
 0x17a   :  { %2489 = vst.msk [vmem:[%s4820_s8 + $0xd8] sm:$0xff] %vm2461_vm2, %v2424_v52  ;;  %3393 = vpow2.f32 %v2219_v46  ;;  %v3376_v17 = vpop.eup %3375  ;;  %v2422_v34 = vmul.f32 %v3374_v15, %v4234_v36  ;;  %v3007_v19 = vpop.f32.mrb[48].mxu0  ;;  %v4433_v36 = vld [vmem:[%s4819_s7] ss:$0 sm:$0xff]  ;;  %v3068_v59 = vadd.f32 %v4382_v31, %v4375_v30  ;;  %v3069_v48 = vadd.f32 %v4390_v47, %v4384_v5 }
 0x17b   :  { %3395 = vpow2.f32 %v2215_v39  ;;  %v2304_v3 = vadd.f32 1.0, %v3376_v17  ;;  %v4422_v26 = vpop.f32.mrb[49].mxu1  ;;  %v4436_v42 = vadd.f32 %v4433_v36, %v1983_v53  ;;  %v1808_v28 = vpop.f32.mrb[49].mxu0  ;;  %v2221_v58 = vmul.f32 1.442695, %v2117_v8 }
 0x17c   :  { %v3378_v62 = vpop.eup %3377  ;;  %3397 = vrcp.f32 %v2301_v57  ;;  %2487 = vst.msk [vmem:[%s4820_s8 + $0xc8] sm:$0xff] %vm2461_vm2, %v2422_v34  ;;  %v4438_v4 = vpop.f32.mrb[50].mxu1  ;;  %v2227_v12 = vmul.f32 1.442695, %v2120_v7  ;;  %v3070_v39 = vadd.f32 %v4400_v37, %v4392_v56  ;;  %v3072_v7 = vadd.f32 %v1808_v28, %v4422_v26 }
 0x17d   :  { %v3380_v27 = vpop.eup %3379  ;;  %v2427_v10 = vmul.f32 %v3378_v62, %v4255_v22  ;;  %3399 = vpow2.f32 %v2225_v61  ;;  %v4444_v22 = vld [vmem:[%s4818_s6] ss:$0 sm:$0xff]  ;;  %v4447_v21 = vpop.f32.mrb[50].mxu0  ;;  %v2118_v50 = vsub.f32 0.0, %v4436_v42  ;;  %v3071_v62 = vadd.f32 %v3007_v19, %v4419_v40 }
 0x17e   :  { %v3382_v49 = vpop.eup %3381  ;;  %v2425_v43 = vmul.f32 %v3380_v27, %v4267_v63  ;;  %3401 = vrcp.f32 %v2304_v3  ;;  %v1988_v54 = vmul.f32 %v4444_v22, %v3067_v16  ;;  %v4449_v32 = vpop.f32.mrb[51].mxu1  ;;  %v1986_v52 = vmul.f32 %v4444_v22, %v3068_v59 }
 0x17f   :  { %v3384_v6 = vpop.eup %3383  ;;  %2492 = vst.msk [vmem:[%s4820_s8 + $0xf0] sm:$0xff] %vm2461_vm2, %v2427_v10  ;;  %v2302_v63 = vadd.f32 1.0, %v3382_v49  ;;  %v4458_v45 = vpop.f32.mrb[51].mxu0  ;;  %3403 = vpow2.f32 %v2221_v58  ;;  %v2223_v31 = vmul.f32 1.442695, %v2118_v50  ;;  %v1989_v11 = vmul.f32 %v4444_v22, %v3069_v48 }
 0x180   :  { %v3386_v1 = vpop.eup %3385  ;;  %2490 = vst.msk [vmem:[%s4820_s8 + $0xe0] sm:$0xff] %vm2461_vm2, %v2425_v43  ;;  %v2428_v2 = vmul.f32 %v3384_v6, %v4270_v0  ;;  %v4466_v46 = vadd.f32 %v4433_v36, %v1988_v54  ;;  %v4484_v47 = vadd.f32 %v4433_v36, %v1986_v52  ;;  %v1987_v53 = vmul.f32 %v4444_v22, %v3070_v39 }
 0x181   :  { %v3388_v33 = vpop.eup %3387  ;;  %v2426_v30 = vmul.f32 %v3386_v1, %v4283_v25  ;;  %3405 = vrcp.f32 %v2302_v63  ;;  %v4488_v13 = vpop.f32.mrb[52].mxu1  ;;  %v4491_v61 = vadd.f32 %v4433_v36, %v1989_v11  ;;  %v1992_v26 = vmul.f32 %v4444_v22, %v3071_v62 }
 0x182   :  { %v3390_v60 = vpop.eup %3389  ;;  %2493 = vst.msk [vmem:[%s4820_s8 + $0xf8] sm:$0xff] %vm2461_vm2, %v2428_v2  ;;  %v2307_v0 = vadd.f32 1.0, %v3388_v33  ;;  %3407 = vpow2.f32 %v2227_v12  ;;  %v2123_v51 = vsub.f32 0.0, %v4466_v46  ;;  %v4493_v17 = vpop.f32.mrb[52].mxu0  ;;  %v2121_v37 = vsub.f32 0.0, %v4484_v47 }
 0x183   :  { %v3392_v5 = vpop.eup %3391  ;;  %2491 = vst.msk [vmem:[%s4820_s8 + $0xe8] sm:$0xff] %vm2461_vm2, %v2426_v30  ;;  %v2431_v25 = vmul.f32 %v3390_v60, %v4287_v44  ;;  %3409 = vpow2.f32 %v2223_v31  ;;  %v4495_v34 = vpop.f32.mrb[53].mxu1  ;;  %v2124_v10 = vsub.f32 0.0, %v4491_v61  ;;  %v4516_v19 = vadd.f32 %v4433_v36, %v1987_v53 }
 0x184   :  { %v3394_v14 = vpop.eup %3393  ;;  %3411 = vrcp.f32 %v2307_v0  ;;  %v2305_v15 = vadd.f32 1.0, %v3392_v5  ;;  %v2233_v57 = vmul.f32 1.442695, %v2123_v51  ;;  %v4504_v3 = vpop.f32.mrb[53].mxu0  ;;  %v2229_v40 = vmul.f32 1.442695, %v2121_v37 }
 0x185   :  { %v3396_v44 = vpop.eup %3395  ;;  %2496 = vst.msk [vmem:[%s4820_s8 + $0x110] sm:$0xff] %vm2461_vm2, %v2431_v25  ;;  %v2308_v56 = vadd.f32 1.0, %v3394_v14  ;;  %v4506_v8 = vpop.f32.mrb[54].mxu1  ;;  %v2235_v50 = vmul.f32 1.442695, %v2124_v10  ;;  %v2122_v28 = vsub.f32 0.0, %v4516_v19  ;;  %v1990_v59 = vmul.f32 %v4444_v22, %v3072_v7 }
 0x186   :  { %v3398_v16 = vpop.eup %3397  ;;  %3413 = vrcp.f32 %v2305_v15  ;;  %v2306_v27 = vadd.f32 1.0, %v3396_v44  ;;  %v4510_v49 = vpop.f32.mrb[54].mxu0  ;;  %v4529_v2 = vadd.f32 %v4433_v36, %v1992_v26  ;;  %v3073_v48 = vadd.f32 %v4447_v21, %v4438_v4 }
 0x187   :  { %v4512_v43 = vpop.f32.mrb[55].mxu1  ;;  %v3400_v58 = vpop.eup %3399  ;;  %v2429_v54 = vmul.f32 %v3398_v16, %v4309_v29  ;;  %3415 = vrcp.f32 %v2308_v56  ;;  %v3074_v33 = vadd.f32 %v4458_v45, %v4449_v32  ;;  %v2231_v31 = vmul.f32 1.442695, %v2122_v28 }
 0x188   :  { %v4518_v6 = vpop.f32.mrb[55].mxu0  ;;  %v3402_v63 = vpop.eup %3401  ;;  %3417 = vrcp.f32 %v2306_v27  ;;  %v2311_v12 = vadd.f32 1.0, %v3400_v58  ;;  %v4540_v52 = vadd.f32 %v4433_v36, %v1990_v59  ;;  %v2127_v21 = vsub.f32 0.0, %v4529_v2 }
 0x189   :  { %2494 = vst.msk [vmem:[%s4820_s8 + $0x100] sm:$0xff] %vm2461_vm2, %v2429_v54  ;;  %v2432_v29 = vmul.f32 %v3402_v63, %v4314_v18  ;;  %3419 = vpow2.f32 %v2233_v57  ;;  %v3404_v1 = vpop.eup %3403  ;;  %v4542_v60 = vpop.f32.mrb[56].mxu1  ;;  %v1993_v32 = vmul.f32 %v4444_v22, %v3073_v48  ;;  %v1991_v39 = vmul.f32 %v4444_v22, %v3074_v33 }
 0x18a   :  { %3421 = vrcp.f32 %v2311_v12  ;;  %v2309_v18 = vadd.f32 1.0, %v3404_v1  ;;  %v4547_v45 = vpop.f32.mrb[56].mxu0  ;;  %v4549_v51 = vpop.f32.mrb[57].mxu1  ;;  %v2125_v25 = vsub.f32 0.0, %v4540_v52  ;;  %v2241_v44 = vmul.f32 1.442695, %v2127_v21 }
 0x18b   :  { %v3406_v30 = vpop.eup %3405  ;;  %2497 = vst.msk [vmem:[%s4820_s8 + $0x118] sm:$0xff] %vm2461_vm2, %v2432_v29  ;;  %3423 = vpow2.f32 %v2229_v40  ;;  %v4553_v14 = vpop.f32.mrb[57].mxu0  ;;  %v4562_v56 = vadd.f32 %v4433_v36, %v1993_v32  ;;  %v4570_v27 = vadd.f32 %v4433_v36, %v1991_v39  ;;  %v3075_v54 = vadd.f32 %v4493_v17, %v4488_v13 }
 0x18c   :  { %v3408_v0 = vpop.eup %3407  ;;  %v2430_v4 = vmul.f32 %v3406_v30, %v4323_v9  ;;  %3425 = vpow2.f32 %v2235_v50  ;;  %v4555_v15 = vpop.f32.mrb[58].mxu1  ;;  %v2237_v16 = vmul.f32 1.442695, %v2125_v25  ;;  %v3076_v40 = vadd.f32 %v4504_v3, %v4495_v34 }
 0x18d   :  { %v3410_v11 = vpop.eup %3409  ;;  %3427 = vrcp.f32 %v2309_v18  ;;  %v2312_v5 = vadd.f32 1.0, %v3408_v0  ;;  %v4564_v37 = vpop.f32.mrb[58].mxu0  ;;  %v2128_v58 = vsub.f32 0.0, %v4562_v56  ;;  %v2126_v12 = vsub.f32 0.0, %v4570_v27 }
 0x18e   :  { %v3412_v9 = vpop.eup %3411  ;;  %2495 = vst.msk [vmem:[%s4820_s8 + $0x108] sm:$0xff] %vm2461_vm2, %v2430_v4  ;;  %v2310_v57 = vadd.f32 1.0, %v3410_v11  ;;  %3429 = vpow2.f32 %v2231_v31  ;;  %v4566_v53 = vpop.f32.mrb[59].mxu1  ;;  %v3077_v50 = vadd.f32 %v4510_v49, %v4506_v8  ;;  %v1996_v34 = vmul.f32 %v4444_v22, %v3075_v54 }
 0x18f   :  { %v2435_v62 = vmul.f32 %v3412_v9, %v4332_v23  ;;  %3431 = vrcp.f32 %v2312_v5  ;;  %v4572_v10 = vpop.f32.mrb[59].mxu0  ;;  %v2243_v17 = vmul.f32 1.442695, %v2128_v58  ;;  %v2239_v29 = vmul.f32 1.442695, %v2126_v12 }
 0x190   :  { %v3414_v7 = vpop.eup %3413  ;;  %3433 = vrcp.f32 %v2310_v57  ;;  %v1994_v28 = vmul.f32 %v4444_v22, %v3076_v40  ;;  %v1997_v8 = vmul.f32 %v4444_v22, %v3077_v50  ;;  %v4603_v1 = vadd.f32 %v4433_v36, %v1996_v34 }
 0x191   :  { %v3416_v63 = vpop.eup %3415  ;;  %2500 = vst.msk [vmem:[%s4820_s8 + $0x130] sm:$0xff] %vm2461_vm2, %v2435_v62  ;;  %v2433_v23 = vmul.f32 %v3414_v7, %v4355_v38  ;;  %3435 = vpow2.f32 %v2241_v44  ;;  %v4596_v49 = vpop.f32.mrb[60].mxu1  ;;  %v3079_v44 = vadd.f32 %v4547_v45, %v4542_v60  ;;  %v3081_v34 = vadd.f32 %v4564_v37, %v4555_v15 }
 0x192   :  { %v3418_v26 = vpop.eup %3417  ;;  %v2436_v13 = vmul.f32 %v3416_v63, %v4367_v35  ;;  %3437 = vpow2.f32 %v2237_v16  ;;  %v3019_v48 = vpop.f32.mrb[60].mxu0  ;;  %v4615_v31 = vadd.f32 %v4433_v36, %v1994_v28  ;;  %v4618_v0 = vadd.f32 %v4433_v36, %v1997_v8 }
 0x193   :  { %v3420_v3 = vpop.eup %3419  ;;  %2498 = vst.msk [vmem:[%s4820_s8 + $0x120] sm:$0xff] %vm2461_vm2, %v2433_v23  ;;  %v2434_v38 = vmul.f32 %v3418_v26, %v4380_v20  ;;  %3439 = vpow2.f32 %v2243_v17  ;;  %v3078_v20 = vadd.f32 %v4518_v6, %v4512_v43  ;;  %v4607_v33 = vpop.f32.mrb[61].mxu1  ;;  %v2131_v32 = vsub.f32 0.0, %v4603_v1 }
 0x194   :  { %v3422_v35 = vpop.eup %3421  ;;  %2501 = vst.msk [vmem:[%s4820_s8 + $0x138] sm:$0xff] %vm2461_vm2, %v2436_v13  ;;  %v2315_v59 = vadd.f32 1.0, %v3420_v3  ;;  %3441 = vpow2.f32 %v2239_v29  ;;  %v4620_v4 = vpop.f32.mrb[61].mxu0  ;;  %v2129_v9 = vsub.f32 0.0, %v4615_v31  ;;  %v2132_v57 = vsub.f32 0.0, %v4618_v0 }
 0x195   :  { %v3424_v30 = vpop.eup %3423  ;;  %2499 = vst.msk [vmem:[%s4820_s8 + $0x128] sm:$0xff] %vm2461_vm2, %v2434_v38  ;;  %v2439_v18 = vmul.f32 %v3422_v35, %v4387_v55  ;;  %v4622_v43 = vpop.f32.mrb[62].mxu1  ;;  %v1995_v11 = vmul.f32 %v4444_v22, %v3078_v20  ;;  %v2249_v58 = vmul.f32 1.442695, %v2131_v32  ;;  %v2000_v45 = vmul.f32 %v4444_v22, %v3079_v44 }
 0x196   :  { %v3426_v6 = vpop.eup %3425  ;;  %3443 = vrcp.f32 %v2315_v59  ;;  %v2313_v21 = vadd.f32 1.0, %v3424_v30  ;;  %v4626_v5 = vpop.f32.mrb[62].mxu0  ;;  %v2245_v23 = vmul.f32 1.442695, %v2129_v9  ;;  %v2251_v12 = vmul.f32 1.442695, %v2132_v57 }
 0x197   :  { %v4628_v55 = vpop.f32.mrb[63].mxu1  ;;  %v3428_v25 = vpop.eup %3427  ;;  %2504 = vst.msk [vmem:[%s4820_s8 + $0x150] sm:$0xff] %vm2461_vm2, %v2439_v18  ;;  %v2316_v39 = vadd.f32 1.0, %v3426_v6  ;;  %v4642_v54 = vadd.f32 %v4433_v36, %v1995_v11  ;;  %v3080_v17 = vadd.f32 %v4553_v14, %v4549_v51  ;;  %v4661_v29 = vadd.f32 %v4433_v36, %v2000_v45 }
 0x198   :  { %v4638_v62 = vpop.f32.mrb[63].mxu0  ;;  %v3430_v16 = vpop.eup %3429  ;;  %v2437_v7 = vmul.f32 %v3428_v25, %v4412_v41  ;;  %3445 = vrcp.f32 %v2313_v21  ;;  %v2001_v14 = vmul.f32 %v4444_v22, %v3081_v34  ;;  %v3082_v28 = vadd.f32 %v4572_v10, %v4566_v53 }
 0x199   :  { %v3432_v40 = vpop.eup %3431  ;;  %3447 = vrcp.f32 %v2316_v39  ;;  %v2314_v63 = vadd.f32 1.0, %v3430_v16  ;;  %v2130_v41 = vsub.f32 0.0, %v4642_v54  ;;  %v1998_v51 = vmul.f32 %v4444_v22, %v3080_v17 }
 0x19a   :  { %v3434_v50 = vpop.eup %3433  ;;  %2502 = vst.msk [vmem:[%s4820_s8 + $0x140] sm:$0xff] %vm2461_vm2, %v2437_v7  ;;  %v2440_v60 = vmul.f32 %v3432_v40, %v4416_v24  ;;  %3449 = vpow2.f32 %v2249_v58  ;;  %v2135_v37 = vsub.f32 0.0, %v4661_v29  ;;  %v3083_v8 = vadd.f32 %v3019_v48, %v4596_v49 }
 0x19b   :  { %v3436_v26 = vpop.eup %3435  ;;  %v2438_v13 = vmul.f32 %v3434_v50, %v4436_v42  ;;  %3451 = vrcp.f32 %v2314_v63  ;;  %v2247_v38 = vmul.f32 1.442695, %v2130_v41  ;;  %v4674_v20 = vadd.f32 %v4433_v36, %v1998_v51 }
 0x19c   :  { %v3438_v3 = vpop.eup %3437  ;;  %2505 = vst.msk [vmem:[%s4820_s8 + $0x158] sm:$0xff] %vm2461_vm2, %v2440_v60  ;;  %v2319_v24 = vadd.f32 1.0, %v3436_v26  ;;  %3453 = vpow2.f32 %v2245_v23  ;;  %v4677_v30 = vadd.f32 %v4433_v36, %v2001_v14  ;;  %v2257_v21 = vmul.f32 1.442695, %v2135_v37 }
 0x19d   :  { %2503 = vst.msk [vmem:[%s4820_s8 + $0x148] sm:$0xff] %vm2461_vm2, %v2438_v13  ;;  %v2317_v42 = vadd.f32 1.0, %v3438_v3  ;;  %3455 = vpow2.f32 %v2251_v12  ;;  %v3440_v15 = vpop.eup %3439  ;;  %v1999_v32 = vmul.f32 %v4444_v22, %v3082_v28  ;;  %v2133_v53 = vsub.f32 0.0, %v4674_v20 }
 0x19e   :  { %3457 = vrcp.f32 %v2319_v24  ;;  %v3442_v35 = vpop.eup %3441  ;;  %v2320_v59 = vadd.f32 1.0, %v3440_v15  ;;  %v2136_v10 = vsub.f32 0.0, %v4677_v30  ;;  %v2004_v25 = vmul.f32 %v4444_v22, %v3083_v8 }
 0x19f   :  { %3459 = vrcp.f32 %v2317_v42  ;;  %v2318_v6 = vadd.f32 1.0, %v3442_v35  ;;  %v4684_v48 = vadd.f32 %v4433_v36, %v1999_v32  ;;  %v3084_v39 = vadd.f32 %v4620_v4, %v4607_v33 }
 0x1a0   :  { %v3444_v18 = vpop.eup %3443  ;;  %3461 = vpow2.f32 %v2247_v38  ;;  %v2253_v57 = vmul.f32 1.442695, %v2133_v53  ;;  %v2259_v44 = vmul.f32 1.442695, %v2136_v10  ;;  %v4697_v40 = vadd.f32 %v4433_v36, %v2004_v25 }
 0x1a1   :  { %v2443_v11 = vmul.f32 %v3444_v18, %v4466_v46  ;;  %3463 = vrcp.f32 %v2320_v59  ;;  %v2134_v58 = vsub.f32 0.0, %v4684_v48  ;;  %v2002_v33 = vmul.f32 %v4444_v22, %v3084_v39 }
 0x1a2   :  { %v3446_v49 = vpop.eup %3445  ;;  %3465 = vrcp.f32 %v2318_v6  ;;  %v3085_v63 = vadd.f32 %v4626_v5, %v4622_v43  ;;  %v2139_v60 = vsub.f32 0.0, %v4697_v40 }
 0x1a3   :  { %v3448_v9 = vpop.eup %3447  ;;  %2508 = vst.msk [vmem:[%s4820_s8 + $0x170] sm:$0xff] %vm2461_vm2, %v2443_v11  ;;  %v2441_v46 = vmul.f32 %v3446_v49, %v4484_v47  ;;  %3467 = vpow2.f32 %v2257_v21  ;;  %v2255_v50 = vmul.f32 1.442695, %v2134_v58  ;;  %v4715_v43 = vadd.f32 %v4433_v36, %v2002_v33 }
 0x1a4   :  { %v3450_v16 = vpop.eup %3449  ;;  %v2444_v7 = vmul.f32 %v3448_v9, %v4491_v61  ;;  %3469 = vpow2.f32 %v2253_v57  ;;  %v3086_v61 = vadd.f32 %v4638_v62, %v4628_v55  ;;  %v2005_v5 = vmul.f32 %v4444_v22, %v3085_v63 }
 0x1a5   :  { %v3452_v4 = vpop.eup %3451  ;;  %2506 = vst.msk [vmem:[%s4820_s8 + $0x160] sm:$0xff] %vm2461_vm2, %v2441_v46  ;;  %v2323_v47 = vadd.f32 1.0, %v3450_v16  ;;  %3471 = vpow2.f32 %v2259_v44  ;;  %v2137_v34 = vsub.f32 0.0, %v4715_v43 }
 0x1a6   :  { %v3454_v23 = vpop.eup %3453  ;;  %2509 = vst.msk [vmem:[%s4820_s8 + $0x178] sm:$0xff] %vm2461_vm2, %v2444_v7  ;;  %v2442_v12 = vmul.f32 %v3452_v4, %v4516_v19  ;;  %v2265_v19 = vmul.f32 1.442695, %v2139_v60  ;;  %v2003_v26 = vmul.f32 %v4444_v22, %v3086_v61  ;;  %v4726_v3 = vadd.f32 %v4433_v36, %v2005_v5 }
 0x1a7   :  { %v3456_v41 = vpop.eup %3455  ;;  %3473 = vrcp.f32 %v2323_v47  ;;  %v2321_v45 = vadd.f32 1.0, %v3454_v23 }
 0x1a8   :  { %v3458_v55 = vpop.eup %3457  ;;  %2507 = vst.msk [vmem:[%s4820_s8 + $0x168] sm:$0xff] %vm2461_vm2, %v2442_v12  ;;  %v2324_v62 = vadd.f32 1.0, %v3456_v41  ;;  %3475 = vpow2.f32 %v2255_v50  ;;  %v4730_v42 = vadd.f32 %v4433_v36, %v2003_v26  ;;  %v2140_v14 = vsub.f32 0.0, %v4726_v3 }
 0x1a9   :  { %v3460_v13 = vpop.eup %3459  ;;  %v2447_v17 = vmul.f32 %v3458_v55, %v4529_v2  ;;  %3477 = vrcp.f32 %v2321_v45  ;;  %v2261_v2 = vmul.f32 1.442695, %v2137_v34 }
 0x1aa   :  { %v3462_v24 = vpop.eup %3461  ;;  %v2445_v38 = vmul.f32 %v3460_v13, %v4540_v52  ;;  %3479 = vrcp.f32 %v2324_v62  ;;  %v2138_v52 = vsub.f32 0.0, %v4730_v42  ;;  %v2267_v8 = vmul.f32 1.442695, %v2140_v14 }
 0x1ab   :  { %v3464_v51 = vpop.eup %3463  ;;  %2512 = vst.msk [vmem:[%s4820_s8 + $0x190] sm:$0xff] %vm2461_vm2, %v2447_v17  ;;  %v2322_v22 = vadd.f32 1.0, %v3462_v24  ;;  %3481 = vpow2.f32 %v2265_v19 }
 0x1ac   :  { %v3466_v15 = vpop.eup %3465  ;;  %2510 = vst.msk [vmem:[%s4820_s8 + $0x180] sm:$0xff] %vm2461_vm2, %v2445_v38  ;;  %v2448_v36 = vmul.f32 %v3464_v51, %v4562_v56  ;;  %v2263_v59 = vmul.f32 1.442695, %v2138_v52 }
 0x1ad   :  { %v3468_v37 = vpop.eup %3467  ;;  %v2446_v28 = vmul.f32 %v3466_v15, %v4570_v27  ;;  %3483 = vrcp.f32 %v2322_v22 }
 0x1ae   :  { %2513 = vst.msk [vmem:[%s4820_s8 + $0x198] sm:$0xff] %vm2461_vm2, %v2448_v36  ;;  %v2327_v35 = vadd.f32 1.0, %v3468_v37  ;;  %3485 = vpow2.f32 %v2261_v2  ;;  %v3470_v18 = vpop.eup %3469 }
 0x1af   :  { %2511 = vst.msk [vmem:[%s4820_s8 + $0x188] sm:$0xff] %vm2461_vm2, %v2446_v28  ;;  %3487 = vpow2.f32 %v2267_v8  ;;  %v3472_v56 = vpop.eup %3471  ;;  %v2325_v27 = vadd.f32 1.0, %v3470_v18 }
 0x1b0   :  { %3489 = vrcp.f32 %v2327_v35  ;;  %v2328_v21 = vadd.f32 1.0, %v3472_v56 }
 0x1b1   :  { %v3474_v6 = vpop.eup %3473  ;;  %3491 = vpow2.f32 %v2263_v59 }
 0x1b2   :  { %v3476_v32 = vpop.eup %3475  ;;  %v2451_v11 = vmul.f32 %v3474_v6, %v4603_v1  ;;  %3493 = vrcp.f32 %v2325_v27 }
 0x1b3   :  { %v3478_v53 = vpop.eup %3477  ;;  %3495 = vrcp.f32 %v2328_v21  ;;  %v2326_v10 = vadd.f32 1.0, %v3476_v32 }
 0x1b4   :  { %v3480_v49 = vpop.eup %3479  ;;  %2516 = vst.msk [vmem:[%s4820_s8 + $0x1b0] sm:$0xff] %vm2461_vm2, %v2451_v11  ;;  %v2449_v25 = vmul.f32 %v3478_v53, %v4615_v31 }
 0x1b5   :  { %v3482_v39 = vpop.eup %3481  ;;  %v2452_v9 = vmul.f32 %v3480_v49, %v4618_v0  ;;  %3497 = vrcp.f32 %v2326_v10 }
 0x1b6   :  { %2514 = vst.msk [vmem:[%s4820_s8 + $0x1a0] sm:$0xff] %vm2461_vm2, %v2449_v25  ;;  %v2331_v1 = vadd.f32 1.0, %v3482_v39 }
 0x1b7   :  { %v3484_v46 = vpop.eup %3483  ;;  %2517 = vst.msk [vmem:[%s4820_s8 + $0x1b8] sm:$0xff] %vm2461_vm2, %v2452_v9 }
 0x1b8   :  { %v3486_v57 = vpop.eup %3485  ;;  %v2450_v44 = vmul.f32 %v3484_v46, %v4642_v54  ;;  %3499 = vrcp.f32 %v2331_v1 }
 0x1b9   :  { %v3488_v31 = vpop.eup %3487  ;;  %v2329_v16 = vadd.f32 1.0, %v3486_v57 }
 0x1ba   :  { %v3490_v0 = vpop.eup %3489  ;;  %2515 = vst.msk [vmem:[%s4820_s8 + $0x1a8] sm:$0xff] %vm2461_vm2, %v2450_v44  ;;  %v2332_v7 = vadd.f32 1.0, %v3488_v31 }
 0x1bb   :  { %v3492_v58 = vpop.eup %3491  ;;  %v2455_v33 = vmul.f32 %v3490_v0, %v4661_v29  ;;  %3501 = vrcp.f32 %v2329_v16 }
 0x1bc   :  { %v3494_v4 = vpop.eup %3493  ;;  %3503 = vrcp.f32 %v2332_v7  ;;  %v2330_v47 = vadd.f32 1.0, %v3492_v58 }
 0x1bd   :  { %v3496_v63 = vpop.eup %3495  ;;  %2520 = vst.msk [vmem:[%s4820_s8 + $0x1d0] sm:$0xff] %vm2461_vm2, %v2455_v33  ;;  %v2453_v54 = vmul.f32 %v3494_v4, %v4674_v20 }
 0x1be   :  { %v2456_v61 = vmul.f32 %v3496_v63, %v4677_v30  ;;  %3505 = vrcp.f32 %v2330_v47 }
 0x1bf   :  { %v3498_v23 = vpop.eup %3497  ;;  %2518 = vst.msk [vmem:[%s4820_s8 + $0x1c0] sm:$0xff] %vm2461_vm2, %v2453_v54 }
 0x1c0   :  { %2521 = vst.msk [vmem:[%s4820_s8 + $0x1d8] sm:$0xff] %vm2461_vm2, %v2456_v61  ;;  %v2454_v29 = vmul.f32 %v3498_v23, %v4684_v48 }
 0x1c2   :  { %v3500_v12 = vpop.eup %3499  ;;  %2519 = vst.msk [vmem:[%s4820_s8 + $0x1c8] sm:$0xff] %vm2461_vm2, %v2454_v29 }
 0x1c3   :  { %v2459_v20 = vmul.f32 %v3500_v12, %v4697_v40 }
 0x1c5   :  { %v3502_v30 = vpop.eup %3501  ;;  %2524 = vst.msk [vmem:[%s4820_s8 + $0x1f0] sm:$0xff] %vm2461_vm2, %v2459_v20 }
 0x1c6   :  { %v3504_v50 = vpop.eup %3503  ;;  %v2457_v60 = vmul.f32 %v3502_v30, %v4715_v43 }
 0x1c7   :  { %v2460_v41 = vmul.f32 %v3504_v50, %v4726_v3 }
 0x1c8   :  { %v3506_v48 = vpop.eup %3505  ;;  %2522 = vst.msk [vmem:[%s4820_s8 + $0x1e0] sm:$0xff] %vm2461_vm2, %v2457_v60 }
 0x1c9   :  { %2525 = vst.msk [vmem:[%s4820_s8 + $0x1f8] sm:$0xff] %vm2461_vm2, %v2460_v41  ;;  %v2458_v40 = vmul.f32 %v3506_v48, %v4730_v42 }
 0x1cb   :  { %2523 = vst.msk [vmem:[%s4820_s8 + $0x1e8] sm:$0xff] %vm2461_vm2, %v2458_v40 }

</bundles_post_ra>
